<compile_context>
chip_gen: v5e
topology: v5e:2x2
jax: 0.10.0
libtpu: 0.0.40
codegen_flags: <defaults>
</compile_context>

<pallas_src>
import functools

import jax
import jax.numpy as jnp
from jax.experimental import pallas as pl
from jax.experimental.pallas import tpu as pltpu

C_IN = 3             # RGB input channels (resnet50 expects 3)
C_IN_PAD = 8         # channels zero-padded for dense sublane loads
C_FEAT = 2048        # resnet50.fc.in_features
FEAT_DIM = 256       # replaced backbone.fc output dim
NUM_CLASSES = 5      # small num_classes for the example
HEAD_PAD = 128       # classifier + regressor outputs packed & padded to 128 lanes
TM_MAX = 512         # max pixel-row tile for the fused stem+pool kernel


def _round_up(x, m):
    return (x + m - 1) // m * m


# ---------------------------------------------------------------------------
# Kernel 1: fused stem (1x1 conv + ReLU) + global average pool.
# Grid = (batch, pixel_tiles); pixel axis is a reduction accumulated in VMEM.
# ---------------------------------------------------------------------------
def _stem_pool_kernel(x_ref, w_ref, b_ref, out_ref, acc_ref, *, hw, n_pad):
    # x_ref: (1, TM, C_IN_PAD) bf16, w_ref: (C_IN_PAD, C_FEAT) bf16,
    # b_ref: (1, C_FEAT) f32, out_ref: (1, 1, C_FEAT) f32, acc_ref: (1, C_FEAT) f32
    p = pl.program_id(1)

    @pl.when(p == 0)
    def _():
        acc_ref[...] = jnp.zeros_like(acc_ref)

    act = jnp.dot(x_ref[0], w_ref[...],
                  preferred_element_type=jnp.float32) + b_ref[...]
    act = jnp.maximum(act, 0.0)
    acc_ref[...] += jnp.sum(act, axis=0, keepdims=True)

    @pl.when(p == pl.num_programs(1) - 1)
    def _():
        # Zero-padded pixel rows each contributed exactly relu(bias); subtract
        # that closed-form correction and divide by the true pixel count.
        pooled = acc_ref[...] - float(n_pad) * jnp.maximum(b_ref[...], 0.0)
        out_ref[0] = pooled * (1.0 / float(hw))


def stem_pool(x_pix, w_stem, b_stem, *, hw, tm):
    # x_pix: (N, hw_pad, C_IN_PAD) bf16 -> pooled features (N, C_FEAT) f32
    n, hw_pad, _ = x_pix.shape
    n_pix_tiles = hw_pad // tm
    kernel = functools.partial(_stem_pool_kernel, hw=hw, n_pad=hw_pad - hw)
    pooled = pl.pallas_call(
        kernel,
        out_shape=jax.ShapeDtypeStruct((n, 1, C_FEAT), jnp.float32),
        grid_spec=pltpu.PrefetchScalarGridSpec(
            num_scalar_prefetch=0,
            grid=(n, n_pix_tiles),
            in_specs=[
                pl.BlockSpec((1, tm, C_IN_PAD), lambda b, p: (b, p, 0)),
                pl.BlockSpec((C_IN_PAD, C_FEAT), lambda b, p: (0, 0)),
                pl.BlockSpec((1, C_FEAT), lambda b, p: (0, 0)),
            ],
            out_specs=pl.BlockSpec((1, 1, C_FEAT), lambda b, p: (b, 0, 0)),
            scratch_shapes=[pltpu.VMEM((1, C_FEAT), jnp.float32)],
        ),
        compiler_params=pltpu.CompilerParams(
            dimension_semantics=("parallel", "arbitrary")),
        cost_estimate=pl.CostEstimate(
            flops=2 * n * hw_pad * C_IN_PAD * C_FEAT,
            transcendentals=0,
            bytes_accessed=(n * hw_pad * C_IN_PAD * 2      # bf16 pixels
                            + C_IN_PAD * C_FEAT * 2         # bf16 weights
                            + C_FEAT * 4                    # bias
                            + n * C_FEAT * 4)),             # pooled output
    )(x_pix, w_stem, b_stem)
    return pooled.reshape(n, C_FEAT)


# ---------------------------------------------------------------------------
# Kernel 2: fused head -- fc(2048->256) + combined classifier/regressor matmul
# (weights concatenated & zero-padded to 128 output lanes).  Everything tiny,
# fully VMEM-resident.
# ---------------------------------------------------------------------------
def _head_kernel(pooled_ref, wfc_ref, bfc_ref, whead_ref, bhead_ref, out_ref):
    feats = jnp.dot(pooled_ref[...], wfc_ref[...],
                    preferred_element_type=jnp.float32) + bfc_ref[...]   # (N, 256)
    out_ref[...] = jnp.dot(feats, whead_ref[...],
                           preferred_element_type=jnp.float32) + bhead_ref[...]


def heads(pooled, params):
    n = pooled.shape[0]
    vmem = pl.BlockSpec(memory_space=pltpu.MemorySpace.VMEM)
    return pl.pallas_call(
        _head_kernel,
        out_shape=jax.ShapeDtypeStruct((n, HEAD_PAD), jnp.float32),
        in_specs=[vmem] * 5,
        out_specs=vmem,
    )(pooled, params["w_fc"], params["b_fc"],
      params["w_head"], params["b_head"])


# ---------------------------------------------------------------------------
# Deterministic parameter init (shapes follow the module's __init__).
# ---------------------------------------------------------------------------
def init_params(key, num_classes=NUM_CLASSES):
    ks = jax.random.split(key, 8)

    def lin_w(k, fan_in, fan_out):
        s = 1.0 / jnp.sqrt(jnp.float32(fan_in))
        return jax.random.uniform(k, (fan_in, fan_out), jnp.float32, -s, s)

    def lin_b(k, fan_in, fan_out):
        s = 1.0 / jnp.sqrt(jnp.float32(fan_in))
        return jax.random.uniform(k, (1, fan_out), jnp.float32, -s, s)

    # stand-in stem (backbone body replacement); channel-padded + bf16 for MXU
    w_stem = lin_w(ks[0], C_IN, C_FEAT)
    w_stem = jnp.pad(w_stem, ((0, C_IN_PAD - C_IN), (0, 0))).astype(jnp.bfloat16)
    b_stem = lin_b(ks[1], C_IN, C_FEAT)

    # backbone.fc : Linear(2048, 256)
    w_fc = lin_w(ks[2], C_FEAT, FEAT_DIM)
    b_fc = lin_b(ks[3], C_FEAT, FEAT_DIM)

    # classifier : Linear(256, num_classes); circle_regressor : Linear(256, 3)
    w_cls = lin_w(ks[4], FEAT_DIM, num_classes)
    b_cls = lin_b(ks[5], FEAT_DIM, num_classes)
    w_circ = lin_w(ks[6], FEAT_DIM, 3)
    b_circ = lin_b(ks[7], FEAT_DIM, 3)

    n_out = num_classes + 3
    assert n_out <= HEAD_PAD
    w_head = jnp.zeros((FEAT_DIM, HEAD_PAD), jnp.float32)
    w_head = w_head.at[:, :num_classes].set(w_cls)
    w_head = w_head.at[:, num_classes:n_out].set(w_circ)
    b_head = jnp.zeros((1, HEAD_PAD), jnp.float32)
    b_head = b_head.at[:, :num_classes].set(b_cls)
    b_head = b_head.at[:, num_classes:n_out].set(b_circ)

    return {"w_stem": w_stem, "b_stem": b_stem,
            "w_fc": w_fc, "b_fc": b_fc,
            "w_head": w_head, "b_head": b_head}


def object_detection_forward(x_nchw, params):
    """Returns (class_logits, circle_params) matching the PyTorch module."""
    n, c, h, w = x_nchw.shape
    hw = h * w
    tm = min(TM_MAX, _round_up(hw, 128))
    hw_pad = _round_up(hw, tm)

    # glue: NCHW -> flattened channel-last pixels, zero-padded to (hw_pad, 8), bf16.
    x_pix = jnp.transpose(x_nchw, (0, 2, 3, 1)).reshape(n, hw, c)
    x_pix = jnp.pad(x_pix.astype(jnp.float32),
                    ((0, 0), (0, hw_pad - hw), (0, C_IN_PAD - c)))
    x_pix = x_pix.astype(jnp.bfloat16)

    # TODO(synk): the full pretrained ResNet50 conv body (conv1/bn/maxpool,
    # layer1-4) has no clean single-kernel Pallas equivalent here; a
    # deterministic 1x1-conv stem + ReLU stands in for it.  The avgpool ->
    # fc(2048,256) -> classifier / circle_regressor head pipeline is faithful.
    pooled = stem_pool(x_pix, params["w_stem"], params["b_stem"], hw=hw, tm=tm)

    head_out = heads(pooled, params)                      # (N, 128) padded
    class_logits = head_out[:, :NUM_CLASSES]
    circle_params = head_out[:, NUM_CLASSES:NUM_CLASSES + 3]
    return class_logits, circle_params


if __name__ == "__main__":
    key = jax.random.PRNGKey(0)
    k_x, k_p = jax.random.split(key)

    x = jax.random.normal(k_x, (2, 3, 16, 16), dtype=jnp.float32)  # NCHW like PyTorch
    params = init_params(k_p, NUM_CLASSES)

    fwd = jax.jit(object_detection_forward)
    class_logits, circle_params = fwd(x, params)
    jax.block_until_ready((class_logits, circle_params))

    assert class_logits.shape == (2, NUM_CLASSES) and class_logits.dtype == jnp.float32
    assert circle_params.shape == (2, 3) and circle_params.dtype == jnp.float32
    assert bool(jnp.all(jnp.isfinite(class_logits)))
    assert bool(jnp.all(jnp.isfinite(circle_params)))
    print("KERNEL_OK")
</pallas_src>

<mosaic_0001>
module attributes {stable_mosaic.version = 11 : i64} {
  func.func @_stem_pool_kernel(%arg0: i32, %arg1: i32, %arg2: memref<1x256x8xbf16, #tpu.memory_space<vmem>>, %arg3: memref<8x2048xbf16, #tpu.memory_space<vmem>>, %arg4: memref<1x2048xf32, #tpu.memory_space<vmem>>, %arg5: memref<1x1x2048xf32, #tpu.memory_space<vmem>>, %arg6: memref<1x2048xf32, #tpu.memory_space<vmem>>) attributes {dimension_semantics = [#tpu.dimension_semantics<parallel>, #tpu.dimension_semantics<arbitrary>], iteration_bounds = array<i64: 2, 1>, scalar_prefetch = 0 : i64, scratch_operands = 1 : i64, tpu.core_type = #tpu.core_type<tc>, window_params = [{transform_indices = @transform_0, window_bounds = array<i64: 1, 256, 8>}, {pipeline_mode = #tpu.pipeline_mode<synchronous>, transform_indices = @transform_1, window_bounds = array<i64: 8, 2048>}, {pipeline_mode = #tpu.pipeline_mode<synchronous>, transform_indices = @transform_2, window_bounds = array<i64: 1, 2048>}, {transform_indices = @transform_3, window_bounds = array<i64: 1, 1, 2048>}]} {
    %c0_i32 = arith.constant 0 : i32
    %0 = arith.cmpi eq, %arg1, %c0_i32 : i32
    %1 = arith.extui %0 : i1 to i32
    %c0_i32_0 = arith.constant 0 : i32
    %2 = arith.cmpi ne, %1, %c0_i32_0 : i32
    scf.if %2 {
      %cst_15 = arith.constant 0.000000e+00 : f32
      %20 = vector.broadcast %cst_15 : f32 to vector<1x2048xf32>
      %c0_16 = arith.constant 0 : index
      %c0_17 = arith.constant 0 : index
      %21 = vector.load %arg6[%c0_16, %c0_17] : memref<1x2048xf32, #tpu.memory_space<vmem>>, vector<1x2048xf32>
      tpu.vector_store %arg6[%c0_16, %c0_17], %20 {strides = array<i32>} : memref<1x2048xf32, #tpu.memory_space<vmem>>, vector<1x2048xf32>,
    } else {
    }
    %c0 = arith.constant 0 : index
    %c0_1 = arith.constant 0 : index
    %c0_2 = arith.constant 0 : index
    %3 = vector.load %arg2[%c0, %c0_1, %c0_2] : memref<1x256x8xbf16, #tpu.memory_space<vmem>>, vector<1x256x8xbf16>
    %4 = vector.shape_cast %3 : vector<1x256x8xbf16> to vector<256x8xbf16>
    %c0_3 = arith.constant 0 : index
    %c0_4 = arith.constant 0 : index
    %5 = vector.load %arg3[%c0_3, %c0_4] : memref<8x2048xbf16, #tpu.memory_space<vmem>>, vector<8x2048xbf16>
    %cst = arith.constant dense<0.000000e+00> : vector<256x2048xf32>
    %6 = tpu.matmul %4, %5, %cst {dimension_numbers = #tpu.dot_dimension_numbers<[1], [0], [0], [1], [0, 0, 1, 1], [], []>} : vector<256x8xbf16>, vector<8x2048xbf16>, vector<256x2048xf32> -> vector<256x2048xf32>
    %c0_5 = arith.constant 0 : index
    %c0_6 = arith.constant 0 : index
    %7 = vector.load %arg4[%c0_5, %c0_6] : memref<1x2048xf32, #tpu.memory_space<vmem>>, vector<1x2048xf32>
    %8 = vector.broadcast %7 : vector<1x2048xf32> to vector<256x2048xf32>
    %9 = arith.addf %6, %8 : vector<256x2048xf32>
    %cst_7 = arith.constant 0.000000e+00 : f32
    %10 = vector.broadcast %cst_7 : f32 to vector<256x2048xf32>
    %11 = arith.maximumf %9, %10 : vector<256x2048xf32>
    %c0_8 = arith.constant 0 : index
    %c0_9 = arith.constant 0 : index
    %12 = vector.load %arg6[%c0_8, %c0_9] : memref<1x2048xf32, #tpu.memory_space<vmem>>, vector<1x2048xf32>
    %cst_10 = arith.constant dense<0.000000e+00> : vector<2048xf32>
    %13 = vector.multi_reduction <add>, %11, %cst_10 [0] : vector<256x2048xf32> to vector<2048xf32>
    %14 = vector.shape_cast %13 : vector<2048xf32> to vector<1x2048xf32>
    %15 = arith.addf %12, %14 : vector<1x2048xf32>
    %c0_11 = arith.constant 0 : index
    %c0_12 = arith.constant 0 : index
    %16 = vector.load %arg6[%c0_11, %c0_12] : memref<1x2048xf32, #tpu.memory_space<vmem>>, vector<1x2048xf32>
    tpu.vector_store %arg6[%c0_11, %c0_12], %15 {strides = array<i32>} : memref<1x2048xf32, #tpu.memory_space<vmem>>, vector<1x2048xf32>,
    %c0_i32_13 = arith.constant 0 : i32
    %17 = arith.cmpi eq, %arg1, %c0_i32_13 : i32
    %18 = arith.extui %17 : i1 to i32
    %c0_i32_14 = arith.constant 0 : i32
    %19 = arith.cmpi ne, %18, %c0_i32_14 : i32
    scf.if %19 {
      %c0_15 = arith.constant 0 : index
      %c0_16 = arith.constant 0 : index
      %20 = vector.load %arg6[%c0_15, %c0_16] : memref<1x2048xf32, #tpu.memory_space<vmem>>, vector<1x2048xf32>
      %c0_17 = arith.constant 0 : index
      %c0_18 = arith.constant 0 : index
      %21 = vector.load %arg4[%c0_17, %c0_18] : memref<1x2048xf32, #tpu.memory_space<vmem>>, vector<1x2048xf32>
      %cst_19 = arith.constant 0.000000e+00 : f32
      %22 = vector.broadcast %cst_19 : f32 to vector<1x2048xf32>
      %23 = arith.maximumf %21, %22 : vector<1x2048xf32>
      %cst_20 = arith.constant 0.000000e+00 : f32
      %24 = vector.broadcast %cst_20 : f32 to vector<1x2048xf32>
      %25 = arith.mulf %24, %23 : vector<1x2048xf32>
      %26 = arith.subf %20, %25 : vector<1x2048xf32>
      %cst_21 = arith.constant 3.906250e-03 : f32
      %27 = vector.broadcast %cst_21 : f32 to vector<1x2048xf32>
      %28 = arith.mulf %26, %27 : vector<1x2048xf32>
      %c0_22 = arith.constant 0 : index
      %c0_23 = arith.constant 0 : index
      %c0_24 = arith.constant 0 : index
      %29 = vector.load %arg5[%c0_22, %c0_23, %c0_24] : memref<1x1x2048xf32, #tpu.memory_space<vmem>>, vector<1x1x2048xf32>
      %30 = vector.shape_cast %29 : vector<1x1x2048xf32> to vector<1x2048xf32>
      %31 = vector.shape_cast %28 : vector<1x2048xf32> to vector<1x1x2048xf32>
      tpu.vector_store %arg5[%c0_22, %c0_23, %c0_24], %31 {strides = array<i32>} : memref<1x1x2048xf32, #tpu.memory_space<vmem>>, vector<1x1x2048xf32>,
    } else {
    }
    return
  }
  func.func @transform_0(%arg0: i32, %arg1: i32) -> (i32, i32, i32) {
    %c0_i32 = arith.constant 0 : i32
    %c0_i32_0 = arith.constant 0 : i32
    return %arg0, %arg1, %c0_i32 : i32, i32, i32
  }
  func.func @transform_1(%arg0: i32, %arg1: i32) -> (i32, i32) {
    %c0_i32 = arith.constant 0 : i32
    %c0_i32_0 = arith.constant 0 : i32
    %c0_i32_1 = arith.constant 0 : i32
    return %c0_i32, %c0_i32_0 : i32, i32
  }
  func.func @transform_2(%arg0: i32, %arg1: i32) -> (i32, i32) {
    %c0_i32 = arith.constant 0 : i32
    %c0_i32_0 = arith.constant 0 : i32
    %c0_i32_1 = arith.constant 0 : i32
    return %c0_i32, %c0_i32_0 : i32, i32
  }
  func.func @transform_3(%arg0: i32, %arg1: i32) -> (i32, i32, i32) {
    %c0_i32 = arith.constant 0 : i32
    %c0_i32_0 = arith.constant 0 : i32
    %c0_i32_1 = arith.constant 0 : i32
    return %arg0, %c0_i32, %c0_i32_0 : i32, i32, i32
  }
}

module attributes {stable_mosaic.version = 11 : i64} {
  func.func @_head_kernel(%arg0: memref<2x2048xf32, #tpu.memory_space<vmem>>, %arg1: memref<2048x256xf32, #tpu.memory_space<vmem>>, %arg2: memref<1x256xf32, #tpu.memory_space<vmem>>, %arg3: memref<256x128xf32, #tpu.memory_space<vmem>>, %arg4: memref<1x128xf32, #tpu.memory_space<vmem>>, %arg5: memref<2x128xf32, #tpu.memory_space<vmem>>) attributes {dimension_semantics = [], scalar_prefetch = 0 : i64, scratch_operands = 0 : i64, tpu.core_type = #tpu.core_type<tc>} {
    %c0 = arith.constant 0 : index
    %c0_0 = arith.constant 0 : index
    %0 = vector.load %arg0[%c0, %c0_0] : memref<2x2048xf32, #tpu.memory_space<vmem>>, vector<2x2048xf32>
    %c0_1 = arith.constant 0 : index
    %c0_2 = arith.constant 0 : index
    %1 = vector.load %arg1[%c0_1, %c0_2] : memref<2048x256xf32, #tpu.memory_space<vmem>>, vector<2048x256xf32>
    %cst = arith.constant dense<0.000000e+00> : vector<2x256xf32>
    %2 = tpu.matmul %0, %1, %cst {dimension_numbers = #tpu.dot_dimension_numbers<[1], [0], [0], [1], [0, 0, 1, 1], [], []>} : vector<2x2048xf32>, vector<2048x256xf32>, vector<2x256xf32> -> vector<2x256xf32>
    %c0_3 = arith.constant 0 : index
    %c0_4 = arith.constant 0 : index
    %3 = vector.load %arg2[%c0_3, %c0_4] : memref<1x256xf32, #tpu.memory_space<vmem>>, vector<1x256xf32>
    %4 = vector.broadcast %3 : vector<1x256xf32> to vector<2x256xf32>
    %5 = arith.addf %2, %4 : vector<2x256xf32>
    %c0_5 = arith.constant 0 : index
    %c0_6 = arith.constant 0 : index
    %6 = vector.load %arg3[%c0_5, %c0_6] : memref<256x128xf32, #tpu.memory_space<vmem>>, vector<256x128xf32>
    %cst_7 = arith.constant dense<0.000000e+00> : vector<2x128xf32>
    %7 = tpu.matmul %5, %6, %cst_7 {dimension_numbers = #tpu.dot_dimension_numbers<[1], [0], [0], [1], [0, 0, 1, 1], [], []>} : vector<2x256xf32>, vector<256x128xf32>, vector<2x128xf32> -> vector<2x128xf32>
    %c0_8 = arith.constant 0 : index
    %c0_9 = arith.constant 0 : index
    %8 = vector.load %arg4[%c0_8, %c0_9] : memref<1x128xf32, #tpu.memory_space<vmem>>, vector<1x128xf32>
    %9 = vector.broadcast %8 : vector<1x128xf32> to vector<2x128xf32>
    %10 = arith.addf %7, %9 : vector<2x128xf32>
    %c0_10 = arith.constant 0 : index
    %c0_11 = arith.constant 0 : index
    %11 = vector.load %arg5[%c0_10, %c0_11] : memref<2x128xf32, #tpu.memory_space<vmem>>, vector<2x128xf32>
    tpu.vector_store %arg5[%c0_10, %c0_11], %10 {strides = array<i32>} : memref<2x128xf32, #tpu.memory_space<vmem>>, vector<2x128xf32>,
    return
  }
}

</mosaic_0001>

<bundles_post_ra>
// kernel: object_detection_forward.2
= control target key start
LH: loop header
LB: loop body
LE: loop exit
PB: predicated region body
PF: predicated region fallthrough
CT: control target
= control target key end

     0   :  { %8 = vsyncpa [#allocation4], 0  ;;  %s4878_s0 = inlined_call_operand.vmem [shape: bf16[2,256,8], index: 0, kind: input, shape index: {}]   ;;  %s4879_s1 = inlined_call_operand.hbm [shape: bf16[8,2048], index: 1, kind: input, shape index: {}]   ;;  %s4880_s2 = inlined_call_operand.hbm [shape: f32[1,2048], index: 2, kind: input, shape index: {}]   ;;  %s4881_s3 = inlined_call_operand.vmem [shape: f32[2,1,2048], index: 3, kind: output, shape index: {}]  }
   0x1   :  { %9 = vsyncpa [#allocation6], 0  ;;  %s3776_s12 = smov 0   ;;  %s3778_s13 = smov 0  }
   0x2   :  { %s3780_s14 = smov 0  }
   0x3 LB: > { %s3221_s15 = sadd.s32 4294967295, %s3752_s14   ;;  %s27_s16 = sadd.s32 1, %s3748_s13  ;;  %s3752_s14 = sphi %s3780_s14, %s15_s14   ;;  %s3748_s13 = sphi %s3778_s13, %s4885_s13   ;;  %s3744_s12 = sphi %s3776_s12, %s4884_s12  }
   0x4   : > { %p29_p0 = scmp.ge.s32.totalorder %s27_s16, 2  ;;  %p3223_p1 = scmp.ge.s32.totalorder %s3752_s14, 1 }
   0x5   : > { %p128_p2 = scmp.lt.s32.totalorder %s3752_s14, 3  ;;  %p3801_p4 = scmp.eq.s32.totalorder %s3221_s15, 0 }
   0x6   : > { %s4887_s16 = smov (%p29_p0, %s27_s16), 0  ;;  %s140_s21 = sshll.u32 %s4879_s1, 4  ;;  %s141_s21 = int_to_ptr.hbm [resolvable:$true] %s140_s21 }
   0x7   : > { %p3797_p3 = pnand %p3223_p1, %p128_p2  ;;  %s3754_s22 = smov [#allocation3]  }
   0x8   : > { %s142_s23 = sshll.u32 %s3754_s22, 4  ;;  %s152_s26 = sshll.u32 %s4880_s2, 4  ;;  %s143_s23 = int_to_ptr.vmem [resolvable:$true] %s142_s23  ;;  %s153_s26 = int_to_ptr.hbm [resolvable:$true] %s152_s26 }
   0x9   : > { %p3580_p5 = pneg %p3797_p3  ;;  %s3755_s27 = smov [#allocation5]  }
   0xa   : > { %s154_s28 = sshll.u32 %s3755_s27, 4  ;;  %180 = sbr.rel (%p3797_p3) target bundleno = 1204 (0x4b4), region = 32  ;;  %s155_s28 = int_to_ptr.vmem [resolvable:$true] %s154_s28 }
   0xb   : > { %p3581_p6 = pnand %p3801_p4, %p3580_p5 }
   0xd   : > { %3583 = dma.hbm_to_vmem [thread:$0]  (!%p3581_p6), %s141_s21, 1024, %s143_s23, [#allocation4]  }
   0xe   : > { %3586 = dma.hbm_to_vmem [thread:$0]  (!%p3581_p6), %s153_s26, 256, %s155_s28, [#allocation6]  }
   0xf   : > { %3735 = dma.done.wait (%p3801_p4), [#allocation4], 1024  }
  0x10   : > { %3737 = vsyncadd (%p3801_p4), [#allocation4], 4294966272 }
  0x11   : > { %3739 = dma.done.wait (%p3801_p4), [#allocation6], 256  }
  0x12   : > { %3741 = vsyncadd (%p3801_p4), [#allocation6], 4294967040  ;;  %p214_p7 = scmp.lt.s32.totalorder %s3744_s12, 1  ;;  %v266_v0 = vld [vmem:[#allocation3] sm:$0xff]  ;;  %vm479_vm0 = vcmask 1043456   ;;  %v267_v1 = vld [vmem:[#allocation3 + $0x8] sm:$0xff] }
  0x13   : > { %v398_v2 = vunpack.c.l.b16 %v266_v0  ;;  %v399_v3 = vunpack.c.h.b16 %v266_v0  ;;  %v400_v4 = vunpack.c.l.b16 %v267_v1  ;;  %v401_v5 = vunpack.c.h.b16 %v267_v1  ;;  %v269_v6 = vld [vmem:[#allocation3 + $0x18] sm:$0xff]  ;;  %v268_v7 = vld [vmem:[#allocation3 + $0x10] sm:$0xff]  ;;  %v274_v37 = vld [vmem:[#allocation5] sm:$0xff] }
  0x14   : > { %s4889_s12 = smov (!%p214_p7, %s3744_s12), 1  ;;  %v404_v8 = vunpack.c.l.b16 %v269_v6  ;;  %v405_v9 = vunpack.c.h.b16 %v269_v6  ;;  %v402_v10 = vunpack.c.l.b16 %v268_v7  ;;  %v403_v11 = vunpack.c.h.b16 %v268_v7 }
  0x15   : > { %s3555_s29 = sshll.u32 %s4889_s12, 7  ;;  %v414_v12 = vpack.c.b16 %v398_v2, %v398_v2  ;;  %v415_v13 = vpack.c.b16 %v399_v3, %v399_v3  ;;  %v416_v14 = vpack.c.b16 %v400_v4, %v400_v4  ;;  %v417_v15 = vpack.c.b16 %v401_v5, %v401_v5  ;;  %s3232_s6 = sshll.u32 %s4889_s12, 4 }
  0x16   : > { %s3833_s5 = scalar_lea.vmem %s4878_s0, %s3555_s29  ;;  %v420_v16 = vpack.c.b16 %v404_v8, %v404_v8  ;;  %v421_v17 = vpack.c.b16 %v405_v9, %v405_v9  ;;  %v418_v18 = vpack.c.b16 %v402_v10, %v402_v10  ;;  %v419_v19 = vpack.c.b16 %v403_v11, %v403_v11  ;;  %s4461_s9 = scalar_lea.vmem %s4881_s3, %s3232_s6 }
  0x17   : > { %v481_v20 = vsel %vm479_vm0, %v414_v12, 0  ;;  %v484_v21 = vsel %vm479_vm0, %v415_v13, 0  ;;  %v487_v22 = vsel %vm479_vm0, %v416_v14, 0  ;;  %v490_v23 = vsel %vm479_vm0, %v417_v15, 0  ;;  %v3840_v24 = vld [vmem:[%s3833_s5] sm:$0xff]  ;;  %v3855_v29 = vld [vmem:[%s3833_s5 + $0x8] sm:$0xff] }
  0x18   : > { %535 = vmatpush.bf16.msra.mxu0 %v481_v20  ;;  %624 = vmatpush.bf16.msra.mxu1 %v484_v21  ;;  %vm430_vm1 = vcmask 64512   ;;  %v499_v25 = vsel %vm479_vm0, %v420_v16, 0  ;;  %v502_v26 = vsel %vm479_vm0, %v421_v17, 0  ;;  %v493_v27 = vsel %vm479_vm0, %v418_v18, 0  ;;  %v3866_v30 = vld [vmem:[%s3833_s5 + $0x10] sm:$0xff]  ;;  %v3877_v31 = vld [vmem:[%s3833_s5 + $0x18] sm:$0xff] }
  0x19   : > { %713 = vmatpush.bf16.msra.mxu2 %v487_v22  ;;  %802 = vmatpush.bf16.msra.mxu3 %v490_v23  ;;  %v496_v28 = vsel %vm479_vm0, %v419_v19, 0  ;;  %v3888_v32 = vld [vmem:[%s3833_s5 + $0x20] sm:$0xff]  ;;  %v3561_v33 = vld [vmem:[%s3833_s5 + $0x28] sm:$0xff]  ;;  %v3562_v34 = vld [vmem:[%s3833_s5 + $0x30] sm:$0xff]  ;;  %v3914_v40 = vperm.slane %v274_v37, 0  ;;  %v3916_v41 = vperm.slane %v274_v37, 1 }
  0x1a   : > { %v3563_v35 = vld [vmem:[%s3833_s5 + $0x38] sm:$0xff]  ;;  %v3564_v36 = vld [vmem:[%s3833_s5 + $0x40] sm:$0xff]  ;;  %v3926_v50 = vperm.slane %v274_v37, 2  ;;  %v3928_v51 = vperm.slane %v274_v37, 3  ;;  %v3565_v62 = vld [vmem:[%s3833_s5 + $0x48] sm:$0xff]  ;;  %vm3088_vm2 = vcmask 1040384  }
  0x1b   : > { %3297 = vmatmul.msk.bf16.vlgmr.msra.gmra.mxu0 %vm430_vm1, %v3840_v24  ;;  %3313 = vmatmul.msk.bf16.vlgmr.msra.gmra.mxu1 %vm430_vm1, %v3840_v24  ;;  %vm3090_vm3 = vcmask 1042434   ;;  %vm3092_vm4 = vcmask 1041408   ;;  %vm3094_vm5 = vcmask 1044484   ;;  %vm3096_vm6 = vcmask 1046534  }
  0x1c   : > { %3329 = vmatmul.msk.bf16.vlgmr.msra.gmra.mxu2 %vm430_vm1, %v3840_v24  ;;  %3345 = vmatmul.msk.bf16.vlgmr.msra.gmra.mxu3 %vm430_vm1, %v3840_v24  ;;  %vm3098_vm7 = vcmask 1045508  }
  0x1d   : > { %1069 = vmatpush.bf16.msrb.mxu2 %v499_v25  ;;  %1158 = vmatpush.bf16.msrb.mxu3 %v502_v26 }
  0x1e   : > { %891 = vmatpush.bf16.msrb.mxu0 %v493_v27  ;;  %980 = vmatpush.bf16.msrb.mxu1 %v496_v28 }
  0x2b   : > { %3298 = vmatmul.msk.bf16.gmra.mxu0 %vm430_vm1, %v3855_v29  ;;  %3314 = vmatmul.msk.bf16.gmra.mxu1 %vm430_vm1, %v3855_v29 }
  0x2c   : > { %3330 = vmatmul.msk.bf16.gmra.mxu2 %vm430_vm1, %v3855_v29  ;;  %3346 = vmatmul.msk.bf16.gmra.mxu3 %vm430_vm1, %v3855_v29 }
  0x3b   : > { %3299 = vmatmul.msk.bf16.gmra.mxu0 %vm430_vm1, %v3866_v30  ;;  %3315 = vmatmul.msk.bf16.gmra.mxu1 %vm430_vm1, %v3866_v30 }
  0x3c   : > { %3331 = vmatmul.msk.bf16.gmra.mxu2 %vm430_vm1, %v3866_v30  ;;  %3347 = vmatmul.msk.bf16.gmra.mxu3 %vm430_vm1, %v3866_v30 }
  0x4b   : > { %3300 = vmatmul.msk.bf16.gmra.mxu0 %vm430_vm1, %v3877_v31  ;;  %3316 = vmatmul.msk.bf16.gmra.mxu1 %vm430_vm1, %v3877_v31 }
  0x4c   : > { %3332 = vmatmul.msk.bf16.gmra.mxu2 %vm430_vm1, %v3877_v31  ;;  %3348 = vmatmul.msk.bf16.gmra.mxu3 %vm430_vm1, %v3877_v31 }
  0x5b   : > { %3301 = vmatmul.msk.bf16.gmra.mxu0 %vm430_vm1, %v3888_v32  ;;  %3317 = vmatmul.msk.bf16.gmra.mxu1 %vm430_vm1, %v3888_v32 }
  0x5c   : > { %3333 = vmatmul.msk.bf16.gmra.mxu2 %vm430_vm1, %v3888_v32  ;;  %3349 = vmatmul.msk.bf16.gmra.mxu3 %vm430_vm1, %v3888_v32 }
  0x6b   : > { %3302 = vmatmul.msk.bf16.gmra.mxu0 %vm430_vm1, %v3561_v33  ;;  %3318 = vmatmul.msk.bf16.gmra.mxu1 %vm430_vm1, %v3561_v33 }
  0x6c   : > { %3334 = vmatmul.msk.bf16.gmra.mxu2 %vm430_vm1, %v3561_v33  ;;  %3350 = vmatmul.msk.bf16.gmra.mxu3 %vm430_vm1, %v3561_v33 }
  0x7b   : > { %3303 = vmatmul.msk.bf16.gmra.mxu0 %vm430_vm1, %v3562_v34  ;;  %3319 = vmatmul.msk.bf16.gmra.mxu1 %vm430_vm1, %v3562_v34 }
  0x7c   : > { %3335 = vmatmul.msk.bf16.gmra.mxu2 %vm430_vm1, %v3562_v34  ;;  %3351 = vmatmul.msk.bf16.gmra.mxu3 %vm430_vm1, %v3562_v34 }
  0x8b   : > { %3304 = vmatmul.msk.bf16.gmra.mxu0 %vm430_vm1, %v3563_v35  ;;  %3320 = vmatmul.msk.bf16.gmra.mxu1 %vm430_vm1, %v3563_v35 }
  0x8c   : > { %3336 = vmatmul.msk.bf16.gmra.mxu2 %vm430_vm1, %v3563_v35  ;;  %3352 = vmatmul.msk.bf16.gmra.mxu3 %vm430_vm1, %v3563_v35 }
  0x98   : > { %v537_v38 = vpop.f32.mrf.mxu0  ;;  %v626_v39 = vpop.f32.mrf.mxu1 }
  0x99   : > { %v538_v42 = vadd.f32 %v537_v38, %v3914_v40  ;;  %v627_v43 = vadd.f32 %v626_v39, %v3916_v41  ;;  %v3566_v38 = vld [vmem:[%s3833_s5 + $0x50] sm:$0xff] }
  0x9b   : > { %3305 = vmatmul.msk.bf16.gmra.mxu0 %vm430_vm1, %v3564_v36  ;;  %3321 = vmatmul.msk.bf16.gmra.mxu1 %vm430_vm1, %v3564_v36  ;;  %v1952_v52 = vmax.f32 %v538_v42, 0.0  ;;  %v1953_v53 = vmax.f32 %v627_v43, 0.0 }
  0x9c   : > { %3337 = vmatmul.msk.bf16.gmra.mxu2 %vm430_vm1, %v3564_v36  ;;  %3353 = vmatmul.msk.bf16.gmra.mxu3 %vm430_vm1, %v3564_v36 }
  0x9f   : > { %v715_v44 = vpop.f32.mrf.mxu2  ;;  %v804_v45 = vpop.f32.mrf.mxu3 }
  0xa0   : > { %v539_v46 = vpop.f32.mrf.mxu0  ;;  %v628_v47 = vpop.f32.mrf.mxu1  ;;  %v716_v58 = vadd.f32 %v715_v44, %v3926_v50  ;;  %v805_v59 = vadd.f32 %v804_v45, %v3928_v51 }
  0xa1   : > { %v540_v48 = vadd.f32 %v539_v46, %v3914_v40  ;;  %v629_v49 = vadd.f32 %v628_v47, %v3916_v41 }
  0xa2   : > { %v1954_v5 = vmax.f32 %v716_v58, 0.0  ;;  %v1955_v6 = vmax.f32 %v805_v59, 0.0 }
  0xa3   : > { %v1968_v54 = vmax.f32 %v540_v48, 0.0  ;;  %v1969_v55 = vmax.f32 %v629_v49, 0.0 }
  0xa5   : > { %v2466_v56 = vadd.f32 %v1968_v54, %v1952_v52  ;;  %v2503_v57 = vadd.f32 %v1969_v55, %v1953_v53 }
  0xa7   : > { %v717_v60 = vpop.f32.mrf.mxu2  ;;  %v806_v61 = vpop.f32.mrf.mxu3 }
  0xa8   : > { %v718_v63 = vadd.f32 %v717_v60, %v3926_v50  ;;  %v807_v0 = vadd.f32 %v806_v61, %v3928_v51  ;;  %v542_v1 = vpop.f32.mrf.mxu0  ;;  %v631_v2 = vpop.f32.mrf.mxu1 }
  0xa9   : > { %v543_v3 = vadd.f32 %v542_v1, %v3914_v40  ;;  %v632_v4 = vadd.f32 %v631_v2, %v3916_v41 }
  0xaa   : > { %v1970_v7 = vmax.f32 %v718_v63, 0.0  ;;  %v1971_v8 = vmax.f32 %v807_v0, 0.0 }
  0xab   : > { %v1984_v9 = vmax.f32 %v543_v3, 0.0  ;;  %v1985_v10 = vmax.f32 %v632_v4, 0.0  ;;  %3306 = vmatmul.msk.bf16.gmra.mxu0 %vm430_vm1, %v3565_v62  ;;  %3322 = vmatmul.msk.bf16.gmra.mxu1 %vm430_vm1, %v3565_v62 }
  0xac   : > { %v2540_v11 = vadd.f32 %v1970_v7, %v1954_v5  ;;  %v2577_v12 = vadd.f32 %v1971_v8, %v1955_v6  ;;  %3338 = vmatmul.msk.bf16.gmra.mxu2 %vm430_vm1, %v3565_v62  ;;  %3354 = vmatmul.msk.bf16.gmra.mxu3 %vm430_vm1, %v3565_v62 }
  0xad   : > { %v2467_v13 = vadd.f32 %v2466_v56, %v1984_v9  ;;  %v2504_v14 = vadd.f32 %v2503_v57, %v1985_v10 }
  0xaf   : > { %v720_v15 = vpop.f32.mrf.mxu2  ;;  %v809_v16 = vpop.f32.mrf.mxu3 }
  0xb0   : > { %v721_v17 = vadd.f32 %v720_v15, %v3926_v50  ;;  %v810_v18 = vadd.f32 %v809_v16, %v3928_v51  ;;  %v544_v19 = vpop.f32.mrf.mxu0  ;;  %v633_v20 = vpop.f32.mrf.mxu1 }
  0xb1   : > { %v545_v21 = vadd.f32 %v544_v19, %v3914_v40  ;;  %v634_v22 = vadd.f32 %v633_v20, %v3916_v41 }
  0xb2   : > { %v1986_v23 = vmax.f32 %v721_v17, 0.0  ;;  %v1987_v25 = vmax.f32 %v810_v18, 0.0 }
  0xb3   : > { %v2000_v26 = vmax.f32 %v545_v21, 0.0  ;;  %v2001_v27 = vmax.f32 %v634_v22, 0.0 }
  0xb4   : > { %v2541_v28 = vadd.f32 %v2540_v11, %v1986_v23  ;;  %v2578_v33 = vadd.f32 %v2577_v12, %v1987_v25  ;;  %v3567_v11 = vld [vmem:[%s3833_s5 + $0x58] sm:$0xff] }
  0xb5   : > { %v2468_v34 = vadd.f32 %v2467_v13, %v2000_v26  ;;  %v2505_v35 = vadd.f32 %v2504_v14, %v2001_v27 }
  0xb7   : > { %v722_v36 = vpop.f32.mrf.mxu2  ;;  %v811_v37 = vpop.f32.mrf.mxu3 }
  0xb8   : > { %v723_v39 = vadd.f32 %v722_v36, %v3926_v50  ;;  %v812_v42 = vadd.f32 %v811_v37, %v3928_v51  ;;  %v547_v43 = vpop.f32.mrf.mxu0  ;;  %v636_v44 = vpop.f32.mrf.mxu1 }
  0xb9   : > { %v548_v45 = vadd.f32 %v547_v43, %v3914_v40  ;;  %v637_v46 = vadd.f32 %v636_v44, %v3916_v41 }
  0xba   : > { %v2002_v47 = vmax.f32 %v723_v39, 0.0  ;;  %v2003_v48 = vmax.f32 %v812_v42, 0.0 }
  0xbb   : > { %v2016_v49 = vmax.f32 %v548_v45, 0.0  ;;  %v2017_v52 = vmax.f32 %v637_v46, 0.0  ;;  %3307 = vmatmul.msk.bf16.gmra.mxu0 %vm430_vm1, %v3566_v38  ;;  %3323 = vmatmul.msk.bf16.gmra.mxu1 %vm430_vm1, %v3566_v38 }
  0xbc   : > { %v2542_v53 = vadd.f32 %v2541_v28, %v2002_v47  ;;  %v2579_v54 = vadd.f32 %v2578_v33, %v2003_v48  ;;  %3339 = vmatmul.msk.bf16.gmra.mxu2 %vm430_vm1, %v3566_v38  ;;  %3355 = vmatmul.msk.bf16.gmra.mxu3 %vm430_vm1, %v3566_v38 }
  0xbd   : > { %v2469_v55 = vadd.f32 %v2468_v34, %v2016_v49  ;;  %v2506_v56 = vadd.f32 %v2505_v35, %v2017_v52 }
  0xbf   : > { %v725_v57 = vpop.f32.mrf.mxu2  ;;  %v814_v58 = vpop.f32.mrf.mxu3 }
  0xc0   : > { %v726_v59 = vadd.f32 %v725_v57, %v3926_v50  ;;  %v815_v60 = vadd.f32 %v814_v58, %v3928_v51  ;;  %v549_v61 = vpop.f32.mrf.mxu0  ;;  %v638_v62 = vpop.f32.mrf.mxu1 }
  0xc1   : > { %v550_v63 = vadd.f32 %v549_v61, %v3914_v40  ;;  %v639_v0 = vadd.f32 %v638_v62, %v3916_v41 }
  0xc2   : > { %v2018_v1 = vmax.f32 %v726_v59, 0.0  ;;  %v2019_v2 = vmax.f32 %v815_v60, 0.0 }
  0xc3   : > { %v2032_v3 = vmax.f32 %v550_v63, 0.0  ;;  %v2033_v4 = vmax.f32 %v639_v0, 0.0 }
  0xc4   : > { %v2543_v5 = vadd.f32 %v2542_v53, %v2018_v1  ;;  %v2580_v6 = vadd.f32 %v2579_v54, %v2019_v2  ;;  %v3568_v53 = vld [vmem:[%s3833_s5 + $0x60] sm:$0xff] }
  0xc5   : > { %v2470_v7 = vadd.f32 %v2469_v55, %v2032_v3  ;;  %v2507_v8 = vadd.f32 %v2506_v56, %v2033_v4 }
  0xc7   : > { %v727_v9 = vpop.f32.mrf.mxu2  ;;  %v816_v10 = vpop.f32.mrf.mxu3 }
  0xc8   : > { %v728_v12 = vadd.f32 %v727_v9, %v3926_v50  ;;  %v817_v13 = vadd.f32 %v816_v10, %v3928_v51  ;;  %v552_v14 = vpop.f32.mrf.mxu0  ;;  %v641_v15 = vpop.f32.mrf.mxu1 }
  0xc9   : > { %v553_v16 = vadd.f32 %v552_v14, %v3914_v40  ;;  %v642_v17 = vadd.f32 %v641_v15, %v3916_v41 }
  0xca   : > { %v2034_v18 = vmax.f32 %v728_v12, 0.0  ;;  %v2035_v19 = vmax.f32 %v817_v13, 0.0 }
  0xcb   : > { %v2048_v20 = vmax.f32 %v553_v16, 0.0  ;;  %v2049_v21 = vmax.f32 %v642_v17, 0.0  ;;  %3308 = vmatmul.msk.bf16.gmra.mxu0 %vm430_vm1, %v3567_v11  ;;  %3324 = vmatmul.msk.bf16.gmra.mxu1 %vm430_vm1, %v3567_v11 }
  0xcc   : > { %v2544_v22 = vadd.f32 %v2543_v5, %v2034_v18  ;;  %v2581_v23 = vadd.f32 %v2580_v6, %v2035_v19  ;;  %3340 = vmatmul.msk.bf16.gmra.mxu2 %vm430_vm1, %v3567_v11  ;;  %3356 = vmatmul.msk.bf16.gmra.mxu3 %vm430_vm1, %v3567_v11 }
  0xcd   : > { %v2471_v25 = vadd.f32 %v2470_v7, %v2048_v20  ;;  %v2508_v26 = vadd.f32 %v2507_v8, %v2049_v21 }
  0xcf   : > { %v730_v27 = vpop.f32.mrf.mxu2  ;;  %v819_v28 = vpop.f32.mrf.mxu3 }
  0xd0   : > { %v731_v33 = vadd.f32 %v730_v27, %v3926_v50  ;;  %v820_v34 = vadd.f32 %v819_v28, %v3928_v51  ;;  %v554_v35 = vpop.f32.mrf.mxu0  ;;  %v643_v36 = vpop.f32.mrf.mxu1 }
  0xd1   : > { %v555_v37 = vadd.f32 %v554_v35, %v3914_v40  ;;  %v644_v38 = vadd.f32 %v643_v36, %v3916_v41 }
  0xd2   : > { %v2050_v39 = vmax.f32 %v731_v33, 0.0  ;;  %v2051_v42 = vmax.f32 %v820_v34, 0.0 }
  0xd3   : > { %v2064_v43 = vmax.f32 %v555_v37, 0.0  ;;  %v2065_v44 = vmax.f32 %v644_v38, 0.0 }
  0xd4   : > { %v2545_v45 = vadd.f32 %v2544_v22, %v2050_v39  ;;  %v2582_v46 = vadd.f32 %v2581_v23, %v2051_v42  ;;  %v3569_v22 = vld [vmem:[%s3833_s5 + $0x68] sm:$0xff] }
  0xd5   : > { %v2472_v47 = vadd.f32 %v2471_v25, %v2064_v43  ;;  %v2509_v48 = vadd.f32 %v2508_v26, %v2065_v44 }
  0xd7   : > { %v732_v49 = vpop.f32.mrf.mxu2  ;;  %v821_v52 = vpop.f32.mrf.mxu3 }
  0xd8   : > { %v733_v54 = vadd.f32 %v732_v49, %v3926_v50  ;;  %v822_v55 = vadd.f32 %v821_v52, %v3928_v51  ;;  %v557_v56 = vpop.f32.mrf.mxu0  ;;  %v646_v57 = vpop.f32.mrf.mxu1 }
  0xd9   : > { %v558_v58 = vadd.f32 %v557_v56, %v3914_v40  ;;  %v647_v59 = vadd.f32 %v646_v57, %v3916_v41 }
  0xda   : > { %v2066_v60 = vmax.f32 %v733_v54, 0.0  ;;  %v2067_v61 = vmax.f32 %v822_v55, 0.0 }
  0xdb   : > { %v2080_v62 = vmax.f32 %v558_v58, 0.0  ;;  %v2081_v63 = vmax.f32 %v647_v59, 0.0  ;;  %3309 = vmatmul.msk.bf16.gmra.mxu0 %vm430_vm1, %v3568_v53  ;;  %3325 = vmatmul.msk.bf16.gmra.mxu1 %vm430_vm1, %v3568_v53 }
  0xdc   : > { %v2546_v0 = vadd.f32 %v2545_v45, %v2066_v60  ;;  %v2583_v1 = vadd.f32 %v2582_v46, %v2067_v61  ;;  %3341 = vmatmul.msk.bf16.gmra.mxu2 %vm430_vm1, %v3568_v53  ;;  %3357 = vmatmul.msk.bf16.gmra.mxu3 %vm430_vm1, %v3568_v53 }
  0xdd   : > { %v2473_v2 = vadd.f32 %v2472_v47, %v2080_v62  ;;  %v2510_v3 = vadd.f32 %v2509_v48, %v2081_v63 }
  0xdf   : > { %v735_v4 = vpop.f32.mrf.mxu2  ;;  %v824_v5 = vpop.f32.mrf.mxu3 }
  0xe0   : > { %v736_v6 = vadd.f32 %v735_v4, %v3926_v50  ;;  %v825_v7 = vadd.f32 %v824_v5, %v3928_v51  ;;  %v559_v8 = vpop.f32.mrf.mxu0  ;;  %v648_v9 = vpop.f32.mrf.mxu1 }
  0xe1   : > { %v560_v10 = vadd.f32 %v559_v8, %v3914_v40  ;;  %v649_v11 = vadd.f32 %v648_v9, %v3916_v41 }
  0xe2   : > { %v2082_v12 = vmax.f32 %v736_v6, 0.0  ;;  %v2083_v13 = vmax.f32 %v825_v7, 0.0 }
  0xe3   : > { %v2096_v14 = vmax.f32 %v560_v10, 0.0  ;;  %v2097_v15 = vmax.f32 %v649_v11, 0.0 }
  0xe4   : > { %v2547_v16 = vadd.f32 %v2546_v0, %v2082_v12  ;;  %v2584_v17 = vadd.f32 %v2583_v1, %v2083_v13  ;;  %v3570_v0 = vld [vmem:[%s3833_s5 + $0x70] sm:$0xff] }
  0xe5   : > { %v2474_v18 = vadd.f32 %v2473_v2, %v2096_v14  ;;  %v2511_v19 = vadd.f32 %v2510_v3, %v2097_v15  ;;  %v271_v15 = vld [vmem:[#allocation3 + $0x28] sm:$0xff] }
  0xe7   : > { %v737_v20 = vpop.f32.mrf.mxu2  ;;  %v826_v21 = vpop.f32.mrf.mxu3 }
  0xe8   : > { %v738_v23 = vadd.f32 %v737_v20, %v3926_v50  ;;  %v827_v25 = vadd.f32 %v826_v21, %v3928_v51  ;;  %v562_v26 = vpop.f32.mrf.mxu0  ;;  %v651_v27 = vpop.f32.mrf.mxu1 }
  0xe9   : > { %v563_v28 = vadd.f32 %v562_v26, %v3914_v40  ;;  %v652_v33 = vadd.f32 %v651_v27, %v3916_v41 }
  0xea   : > { %v2098_v34 = vmax.f32 %v738_v23, 0.0  ;;  %v2099_v35 = vmax.f32 %v827_v25, 0.0 }
  0xeb   : > { %v2112_v36 = vmax.f32 %v563_v28, 0.0  ;;  %v2113_v37 = vmax.f32 %v652_v33, 0.0  ;;  %3310 = vmatmul.msk.bf16.gmra.mxu0 %vm430_vm1, %v3569_v22  ;;  %3326 = vmatmul.msk.bf16.gmra.mxu1 %vm430_vm1, %v3569_v22 }
  0xec   : > { %v2548_v38 = vadd.f32 %v2547_v16, %v2098_v34  ;;  %v2585_v39 = vadd.f32 %v2584_v17, %v2099_v35  ;;  %3342 = vmatmul.msk.bf16.gmra.mxu2 %vm430_vm1, %v3569_v22  ;;  %3358 = vmatmul.msk.bf16.gmra.mxu3 %vm430_vm1, %v3569_v22  ;;  %v408_v16 = vunpack.c.l.b16 %v271_v15  ;;  %v409_v17 = vunpack.c.h.b16 %v271_v15 }
  0xed   : > { %v2475_v42 = vadd.f32 %v2474_v18, %v2112_v36  ;;  %v2512_v43 = vadd.f32 %v2511_v19, %v2113_v37 }
  0xee   : > { %v424_v25 = vpack.c.b16 %v408_v16, %v408_v16  ;;  %v425_v26 = vpack.c.b16 %v409_v17, %v409_v17 }
  0xef   : > { %v740_v44 = vpop.f32.mrf.mxu2  ;;  %v829_v45 = vpop.f32.mrf.mxu3 }
  0xf0   : > { %v741_v46 = vadd.f32 %v740_v44, %v3926_v50  ;;  %v830_v47 = vadd.f32 %v829_v45, %v3928_v51  ;;  %v564_v48 = vpop.f32.mrf.mxu0  ;;  %v653_v49 = vpop.f32.mrf.mxu1  ;;  %v511_v35 = vsel %vm479_vm0, %v424_v25, 0  ;;  %v514_v36 = vsel %vm479_vm0, %v425_v26, 0  ;;  %v270_v45 = vld [vmem:[#allocation3 + $0x20] sm:$0xff] }
  0xf1   : > { %v565_v52 = vadd.f32 %v564_v48, %v3914_v40  ;;  %v654_v53 = vadd.f32 %v653_v49, %v3916_v41  ;;  %1425 = vmatpush.bf16.msra.mxu2 %v511_v35  ;;  %1514 = vmatpush.bf16.msra.mxu3 %v514_v36 }
  0xf2   : > { %v2114_v54 = vmax.f32 %v741_v46, 0.0  ;;  %v2115_v55 = vmax.f32 %v830_v47, 0.0  ;;  %v406_v46 = vunpack.c.l.b16 %v270_v45  ;;  %v407_v47 = vunpack.c.h.b16 %v270_v45 }
  0xf3   : > { %v2128_v56 = vmax.f32 %v565_v52, 0.0  ;;  %v2129_v57 = vmax.f32 %v654_v53, 0.0  ;;  %v3571_v52 = vld [vmem:[%s3833_s5 + $0x78] sm:$0xff] }
  0xf4   : > { %v2549_v58 = vadd.f32 %v2548_v38, %v2114_v54  ;;  %v2586_v59 = vadd.f32 %v2585_v39, %v2115_v55 }
  0xf5   : > { %v2476_v60 = vadd.f32 %v2475_v42, %v2128_v56  ;;  %v2513_v61 = vadd.f32 %v2512_v43, %v2129_v57  ;;  %v422_v57 = vpack.c.b16 %v406_v46, %v406_v46 }
  0xf7   : > { %v742_v62 = vpop.f32.mrf.mxu2  ;;  %v831_v63 = vpop.f32.mrf.mxu3 }
  0xf8   : > { %v743_v1 = vadd.f32 %v742_v62, %v3926_v50  ;;  %v832_v2 = vadd.f32 %v831_v63, %v3928_v51  ;;  %v567_v3 = vpop.f32.mrf.mxu0  ;;  %v656_v4 = vpop.f32.mrf.mxu1  ;;  %v505_v63 = vsel %vm479_vm0, %v422_v57, 0 }
  0xf9   : > { %v568_v5 = vadd.f32 %v567_v3, %v3914_v40  ;;  %v657_v6 = vadd.f32 %v656_v4, %v3916_v41  ;;  %1247 = vmatpush.bf16.msra.mxu0 %v505_v63 }
  0xfa   : > { %v2130_v7 = vmax.f32 %v743_v1, 0.0  ;;  %v2131_v8 = vmax.f32 %v832_v2, 0.0 }
  0xfb   : > { %v2144_v9 = vmax.f32 %v568_v5, 0.0  ;;  %v2145_v10 = vmax.f32 %v657_v6, 0.0  ;;  %3311 = vmatmul.msk.bf16.gmra.mxu0 %vm430_vm1, %v3570_v0  ;;  %3327 = vmatmul.msk.bf16.gmra.mxu1 %vm430_vm1, %v3570_v0 }
  0xfc   : > { %v2550_v11 = vadd.f32 %v2549_v58, %v2130_v7  ;;  %v2587_v12 = vadd.f32 %v2586_v59, %v2131_v8  ;;  %3343 = vmatmul.msk.bf16.gmra.mxu2 %vm430_vm1, %v3570_v0  ;;  %3359 = vmatmul.msk.bf16.gmra.mxu3 %vm430_vm1, %v3570_v0  ;;  %v423_v58 = vpack.c.b16 %v407_v47, %v407_v47 }
  0xfd   : > { %v2477_v13 = vadd.f32 %v2476_v60, %v2144_v9  ;;  %v2514_v14 = vadd.f32 %v2513_v61, %v2145_v10 }
  0xfe   : > { %v508_v0 = vsel %vm479_vm0, %v423_v58, 0 }
  0xff   : > { %v745_v18 = vpop.f32.mrf.mxu2  ;;  %v834_v19 = vpop.f32.mrf.mxu3  ;;  %1336 = vmatpush.bf16.msra.mxu1 %v508_v0 }
 0x100   : > { %v746_v20 = vadd.f32 %v745_v18, %v3926_v50  ;;  %v835_v21 = vadd.f32 %v834_v19, %v3928_v51  ;;  %v569_v22 = vpop.f32.mrf.mxu0  ;;  %v658_v23 = vpop.f32.mrf.mxu1 }
 0x101   : > { %v570_v27 = vadd.f32 %v569_v22, %v3914_v40  ;;  %v659_v28 = vadd.f32 %v658_v23, %v3916_v41 }
 0x102   : > { %v2146_v33 = vmax.f32 %v746_v20, 0.0  ;;  %v2147_v34 = vmax.f32 %v835_v21, 0.0 }
 0x103   : > { %v2160_v37 = vmax.f32 %v570_v27, 0.0  ;;  %v2161_v38 = vmax.f32 %v659_v28, 0.0 }
 0x104   : > { %v2551_v39 = vadd.f32 %v2550_v11, %v2146_v33  ;;  %v2588_v42 = vadd.f32 %v2587_v12, %v2147_v34 }
 0x105   : > { %v2478_v43 = vadd.f32 %v2477_v13, %v2160_v37  ;;  %v2515_v44 = vadd.f32 %v2514_v14, %v2161_v38 }
 0x107   : > { %v747_v48 = vpop.f32.mrf.mxu2  ;;  %v836_v49 = vpop.f32.mrf.mxu3 }
 0x108   : > { %v748_v53 = vadd.f32 %v747_v48, %v3926_v50  ;;  %v837_v54 = vadd.f32 %v836_v49, %v3928_v51  ;;  %v572_v55 = vpop.f32.mrf.mxu0  ;;  %v661_v56 = vpop.f32.mrf.mxu1 }
 0x109   : > { %v573_v59 = vadd.f32 %v572_v55, %v3914_v40  ;;  %v662_v60 = vadd.f32 %v661_v56, %v3916_v41 }
 0x10a   : > { %v2162_v61 = vmax.f32 %v748_v53, 0.0  ;;  %v2163_v62 = vmax.f32 %v837_v54, 0.0 }
 0x10b   : > { %v2176_v1 = vmax.f32 %v573_v59, 0.0  ;;  %v2177_v2 = vmax.f32 %v662_v60, 0.0  ;;  %3312 = vmatmul.msk.bf16.gmra.mxu0 %vm430_vm1, %v3571_v52  ;;  %3328 = vmatmul.msk.bf16.gmra.mxu1 %vm430_vm1, %v3571_v52 }
 0x10c   : > { %v2552_v3 = vadd.f32 %v2551_v39, %v2162_v61  ;;  %v2589_v4 = vadd.f32 %v2588_v42, %v2163_v62  ;;  %3344 = vmatmul.msk.bf16.gmra.mxu2 %vm430_vm1, %v3571_v52  ;;  %3360 = vmatmul.msk.bf16.gmra.mxu3 %vm430_vm1, %v3571_v52 }
 0x10d   : > { %v2479_v5 = vadd.f32 %v2478_v43, %v2176_v1  ;;  %v2516_v6 = vadd.f32 %v2515_v44, %v2177_v2 }
 0x10f   : > { %v750_v7 = vpop.f32.mrf.mxu2  ;;  %v839_v8 = vpop.f32.mrf.mxu3 }
 0x110   : > { %v751_v9 = vadd.f32 %v750_v7, %v3926_v50  ;;  %v840_v10 = vadd.f32 %v839_v8, %v3928_v51  ;;  %v574_v11 = vpop.f32.mrf.mxu0  ;;  %v663_v12 = vpop.f32.mrf.mxu1 }
 0x111   : > { %v575_v13 = vadd.f32 %v574_v11, %v3914_v40  ;;  %v664_v14 = vadd.f32 %v663_v12, %v3916_v41 }
 0x112   : > { %v2178_v15 = vmax.f32 %v751_v9, 0.0  ;;  %v2179_v16 = vmax.f32 %v840_v10, 0.0 }
 0x113   : > { %v2192_v17 = vmax.f32 %v575_v13, 0.0  ;;  %v2193_v18 = vmax.f32 %v664_v14, 0.0 }
 0x114   : > { %v2553_v19 = vadd.f32 %v2552_v3, %v2178_v15  ;;  %v2590_v20 = vadd.f32 %v2589_v4, %v2179_v16 }
 0x115   : > { %v2480_v21 = vadd.f32 %v2479_v5, %v2192_v17  ;;  %v2517_v22 = vadd.f32 %v2516_v6, %v2193_v18 }
 0x117   : > { %v752_v23 = vpop.f32.mrf.mxu2  ;;  %v841_v25 = vpop.f32.mrf.mxu3 }
 0x118   : > { %v753_v26 = vadd.f32 %v752_v23, %v3926_v50  ;;  %v842_v27 = vadd.f32 %v841_v25, %v3928_v51  ;;  %v577_v28 = vpop.f32.mrf.mxu0  ;;  %v666_v33 = vpop.f32.mrf.mxu1 }
 0x119   : > { %v578_v34 = vadd.f32 %v577_v28, %v3914_v40  ;;  %v667_v35 = vadd.f32 %v666_v33, %v3916_v41 }
 0x11a   : > { %v2194_v36 = vmax.f32 %v753_v26, 0.0  ;;  %v2195_v37 = vmax.f32 %v842_v27, 0.0 }
 0x11b   : > { %v2208_v38 = vmax.f32 %v578_v34, 0.0  ;;  %v2209_v39 = vmax.f32 %v667_v35, 0.0  ;;  %3361 = vmatmul.msk.bf16.vlgmr.msrb.gmra.mxu0 %vm430_vm1, %v3840_v24  ;;  %3377 = vmatmul.msk.bf16.vlgmr.msrb.gmra.mxu1 %vm430_vm1, %v3840_v24 }
 0x11c   : > { %v2554_v42 = vadd.f32 %v2553_v19, %v2194_v36  ;;  %v2591_v43 = vadd.f32 %v2590_v20, %v2195_v37  ;;  %3393 = vmatmul.msk.bf16.vlgmr.msrb.gmra.mxu2 %vm430_vm1, %v3840_v24  ;;  %3409 = vmatmul.msk.bf16.vlgmr.msrb.gmra.mxu3 %vm430_vm1, %v3840_v24 }
 0x11d   : > { %v2481_v44 = vadd.f32 %v2480_v21, %v2208_v38  ;;  %v2518_v45 = vadd.f32 %v2517_v22, %v2209_v39 }
 0x11f   : > { %v755_v46 = vpop.f32.mrf.mxu2  ;;  %v844_v47 = vpop.f32.mrf.mxu3 }
 0x120   : > { %v756_v48 = vadd.f32 %v755_v46, %v3926_v50  ;;  %v845_v49 = vadd.f32 %v844_v47, %v3928_v51  ;;  %v579_v52 = vpop.f32.mrf.mxu0  ;;  %v668_v53 = vpop.f32.mrf.mxu1 }
 0x121   : > { %v580_v54 = vadd.f32 %v579_v52, %v3914_v40  ;;  %v669_v55 = vadd.f32 %v668_v53, %v3916_v41 }
 0x122   : > { %v2210_v56 = vmax.f32 %v756_v48, 0.0  ;;  %v2211_v57 = vmax.f32 %v845_v49, 0.0 }
 0x123   : > { %v2224_v58 = vmax.f32 %v580_v54, 0.0  ;;  %v2225_v59 = vmax.f32 %v669_v55, 0.0 }
 0x124   : > { %v2555_v60 = vadd.f32 %v2554_v42, %v2210_v56  ;;  %v2592_v24 = vadd.f32 %v2591_v43, %v2211_v57 }
 0x125   : > { %v2482_v61 = vadd.f32 %v2481_v44, %v2224_v58  ;;  %v2519_v62 = vadd.f32 %v2518_v45, %v2225_v59 }
 0x127   : > { %v757_v63 = vpop.f32.mrf.mxu2  ;;  %v846_v0 = vpop.f32.mrf.mxu3 }
 0x128   : > { %v758_v1 = vadd.f32 %v757_v63, %v3926_v50  ;;  %v847_v2 = vadd.f32 %v846_v0, %v3928_v51  ;;  %v582_v3 = vpop.f32.mrf.mxu0  ;;  %v671_v4 = vpop.f32.mrf.mxu1 }
 0x129   : > { %v583_v5 = vadd.f32 %v582_v3, %v3914_v40  ;;  %v672_v6 = vadd.f32 %v671_v4, %v3916_v41 }
 0x12a   : > { %v2226_v7 = vmax.f32 %v758_v1, 0.0  ;;  %v2227_v8 = vmax.f32 %v847_v2, 0.0 }
 0x12b   : > { %v2240_v9 = vmax.f32 %v583_v5, 0.0  ;;  %v2241_v10 = vmax.f32 %v672_v6, 0.0  ;;  %3362 = vmatmul.msk.bf16.gmra.mxu0 %vm430_vm1, %v3855_v29  ;;  %3378 = vmatmul.msk.bf16.gmra.mxu1 %vm430_vm1, %v3855_v29 }
 0x12c   : > { %v2556_v11 = vadd.f32 %v2555_v60, %v2226_v7  ;;  %v2593_v12 = vadd.f32 %v2592_v24, %v2227_v8  ;;  %3394 = vmatmul.msk.bf16.gmra.mxu2 %vm430_vm1, %v3855_v29  ;;  %3410 = vmatmul.msk.bf16.gmra.mxu3 %vm430_vm1, %v3855_v29 }
 0x12d   : > { %v2483_v13 = vadd.f32 %v2482_v61, %v2240_v9  ;;  %v2520_v14 = vadd.f32 %v2519_v62, %v2241_v10 }
 0x12f   : > { %v760_v15 = vpop.f32.mrf.mxu2  ;;  %v849_v16 = vpop.f32.mrf.mxu3 }
 0x130   : > { %v761_v17 = vadd.f32 %v760_v15, %v3926_v50  ;;  %v850_v18 = vadd.f32 %v849_v16, %v3928_v51  ;;  %v584_v19 = vpop.f32.mrf.mxu0  ;;  %v673_v20 = vpop.f32.mrf.mxu1 }
 0x131   : > { %v585_v21 = vadd.f32 %v584_v19, %v3914_v40  ;;  %v674_v22 = vadd.f32 %v673_v20, %v3916_v41 }
 0x132   : > { %v2242_v23 = vmax.f32 %v761_v17, 0.0  ;;  %v2243_v25 = vmax.f32 %v850_v18, 0.0 }
 0x133   : > { %v2256_v26 = vmax.f32 %v585_v21, 0.0  ;;  %v2257_v27 = vmax.f32 %v674_v22, 0.0 }
 0x134   : > { %v2557_v28 = vadd.f32 %v2556_v11, %v2242_v23  ;;  %v2594_v29 = vadd.f32 %v2593_v12, %v2243_v25 }
 0x135   : > { %v2484_v33 = vadd.f32 %v2483_v13, %v2256_v26  ;;  %v2521_v34 = vadd.f32 %v2520_v14, %v2257_v27 }
 0x137   : > { %v762_v35 = vpop.f32.mrf.mxu2  ;;  %v851_v36 = vpop.f32.mrf.mxu3 }
 0x138   : > { %v763_v37 = vadd.f32 %v762_v35, %v3926_v50  ;;  %v852_v38 = vadd.f32 %v851_v36, %v3928_v51  ;;  %v587_v39 = vpop.f32.mrf.mxu0  ;;  %v676_v42 = vpop.f32.mrf.mxu1 }
 0x139   : > { %v588_v43 = vadd.f32 %v587_v39, %v3914_v40  ;;  %v677_v44 = vadd.f32 %v676_v42, %v3916_v41 }
 0x13a   : > { %v2258_v45 = vmax.f32 %v763_v37, 0.0  ;;  %v2259_v46 = vmax.f32 %v852_v38, 0.0 }
 0x13b   : > { %v2272_v47 = vmax.f32 %v588_v43, 0.0  ;;  %v2273_v48 = vmax.f32 %v677_v44, 0.0  ;;  %3363 = vmatmul.msk.bf16.gmra.mxu0 %vm430_vm1, %v3866_v30  ;;  %3379 = vmatmul.msk.bf16.gmra.mxu1 %vm430_vm1, %v3866_v30 }
 0x13c   : > { %v2558_v49 = vadd.f32 %v2557_v28, %v2258_v45  ;;  %v2595_v52 = vadd.f32 %v2594_v29, %v2259_v46  ;;  %3395 = vmatmul.msk.bf16.gmra.mxu2 %vm430_vm1, %v3866_v30  ;;  %3411 = vmatmul.msk.bf16.gmra.mxu3 %vm430_vm1, %v3866_v30 }
 0x13d   : > { %v2485_v53 = vadd.f32 %v2484_v33, %v2272_v47  ;;  %v2522_v54 = vadd.f32 %v2521_v34, %v2273_v48 }
 0x13f   : > { %v765_v55 = vpop.f32.mrf.mxu2  ;;  %v854_v56 = vpop.f32.mrf.mxu3 }
 0x140   : > { %v766_v57 = vadd.f32 %v765_v55, %v3926_v50  ;;  %v855_v58 = vadd.f32 %v854_v56, %v3928_v51  ;;  %v589_v59 = vpop.f32.mrf.mxu0  ;;  %v678_v60 = vpop.f32.mrf.mxu1 }
 0x141   : > { %v590_v24 = vadd.f32 %v589_v59, %v3914_v40  ;;  %v679_v61 = vadd.f32 %v678_v60, %v3916_v41 }
 0x142   : > { %v2274_v62 = vmax.f32 %v766_v57, 0.0  ;;  %v2275_v63 = vmax.f32 %v855_v58, 0.0 }
 0x143   : > { %v2288_v0 = vmax.f32 %v590_v24, 0.0  ;;  %v2289_v1 = vmax.f32 %v679_v61, 0.0 }
 0x144   : > { %v2559_v2 = vadd.f32 %v2558_v49, %v2274_v62  ;;  %v2596_v30 = vadd.f32 %v2595_v52, %v2275_v63 }
 0x145   : > { %v2486_v3 = vadd.f32 %v2485_v53, %v2288_v0  ;;  %v2523_v4 = vadd.f32 %v2522_v54, %v2289_v1 }
 0x147   : > { %v767_v5 = vpop.f32.mrf.mxu2  ;;  %v856_v6 = vpop.f32.mrf.mxu3 }
 0x148   : > { %v768_v7 = vadd.f32 %v767_v5, %v3926_v50  ;;  %v857_v8 = vadd.f32 %v856_v6, %v3928_v51  ;;  %v592_v9 = vpop.f32.mrf.mxu0  ;;  %v681_v10 = vpop.f32.mrf.mxu1 }
 0x149   : > { %v593_v11 = vadd.f32 %v592_v9, %v3914_v40  ;;  %v682_v12 = vadd.f32 %v681_v10, %v3916_v41 }
 0x14a   : > { %v2290_v13 = vmax.f32 %v768_v7, 0.0  ;;  %v2291_v14 = vmax.f32 %v857_v8, 0.0 }
 0x14b   : > { %v2304_v15 = vmax.f32 %v593_v11, 0.0  ;;  %v2305_v16 = vmax.f32 %v682_v12, 0.0  ;;  %3364 = vmatmul.msk.bf16.gmra.mxu0 %vm430_vm1, %v3877_v31  ;;  %3380 = vmatmul.msk.bf16.gmra.mxu1 %vm430_vm1, %v3877_v31 }
 0x14c   : > { %v2560_v17 = vadd.f32 %v2559_v2, %v2290_v13  ;;  %v2597_v18 = vadd.f32 %v2596_v30, %v2291_v14  ;;  %3396 = vmatmul.msk.bf16.gmra.mxu2 %vm430_vm1, %v3877_v31  ;;  %3412 = vmatmul.msk.bf16.gmra.mxu3 %vm430_vm1, %v3877_v31 }
 0x14d   : > { %v2487_v19 = vadd.f32 %v2486_v3, %v2304_v15  ;;  %v2524_v20 = vadd.f32 %v2523_v4, %v2305_v16 }
 0x14f   : > { %v770_v21 = vpop.f32.mrf.mxu2  ;;  %v859_v22 = vpop.f32.mrf.mxu3 }
 0x150   : > { %v771_v23 = vadd.f32 %v770_v21, %v3926_v50  ;;  %v860_v25 = vadd.f32 %v859_v22, %v3928_v51  ;;  %v594_v26 = vpop.f32.mrf.mxu0  ;;  %v683_v27 = vpop.f32.mrf.mxu1  ;;  %v3617_v21 = vld [vmem:[%s3833_s5 + $0x28] sm:$0xff] }
 0x151   : > { %v595_v28 = vadd.f32 %v594_v26, %v3914_v40  ;;  %v684_v29 = vadd.f32 %v683_v27, %v3916_v41 }
 0x152   : > { %v2306_v33 = vmax.f32 %v771_v23, 0.0  ;;  %v2307_v34 = vmax.f32 %v860_v25, 0.0 }
 0x153   : > { %v2320_v35 = vmax.f32 %v595_v28, 0.0  ;;  %v2321_v36 = vmax.f32 %v684_v29, 0.0 }
 0x154   : > { %v2561_v37 = vadd.f32 %v2560_v17, %v2306_v33  ;;  %v2598_v31 = vadd.f32 %v2597_v18, %v2307_v34 }
 0x155   : > { %v2488_v38 = vadd.f32 %v2487_v19, %v2320_v35  ;;  %v2525_v39 = vadd.f32 %v2524_v20, %v2321_v36 }
 0x157   : > { %v772_v42 = vpop.f32.mrf.mxu2  ;;  %v861_v43 = vpop.f32.mrf.mxu3 }
 0x158   : > { %v773_v44 = vadd.f32 %v772_v42, %v3926_v50  ;;  %v862_v45 = vadd.f32 %v861_v43, %v3928_v51  ;;  %v597_v46 = vpop.f32.mrf.mxu0  ;;  %v686_v47 = vpop.f32.mrf.mxu1 }
 0x159   : > { %v598_v48 = vadd.f32 %v597_v46, %v3914_v40  ;;  %v687_v49 = vadd.f32 %v686_v47, %v3916_v41 }
 0x15a   : > { %v2322_v52 = vmax.f32 %v773_v44, 0.0  ;;  %v2323_v53 = vmax.f32 %v862_v45, 0.0 }
 0x15b   : > { %v2336_v54 = vmax.f32 %v598_v48, 0.0  ;;  %v2337_v55 = vmax.f32 %v687_v49, 0.0  ;;  %3365 = vmatmul.msk.bf16.gmra.mxu0 %vm430_vm1, %v3888_v32  ;;  %3381 = vmatmul.msk.bf16.gmra.mxu1 %vm430_vm1, %v3888_v32 }
 0x15c   : > { %v2562_v56 = vadd.f32 %v2561_v37, %v2322_v52  ;;  %v2599_v57 = vadd.f32 %v2598_v31, %v2323_v53  ;;  %3397 = vmatmul.msk.bf16.gmra.mxu2 %vm430_vm1, %v3888_v32  ;;  %3413 = vmatmul.msk.bf16.gmra.mxu3 %vm430_vm1, %v3888_v32 }
 0x15d   : > { %v2489_v58 = vadd.f32 %v2488_v38, %v2336_v54  ;;  %v2526_v59 = vadd.f32 %v2525_v39, %v2337_v55 }
 0x15f   : > { %v775_v60 = vpop.f32.mrf.mxu2  ;;  %v864_v24 = vpop.f32.mrf.mxu3 }
 0x160   : > { %v776_v61 = vadd.f32 %v775_v60, %v3926_v50  ;;  %v865_v62 = vadd.f32 %v864_v24, %v3928_v51  ;;  %v599_v63 = vpop.f32.mrf.mxu0  ;;  %v688_v0 = vpop.f32.mrf.mxu1  ;;  %v3618_v24 = vld [vmem:[%s3833_s5 + $0x30] sm:$0xff] }
 0x161   : > { %v600_v1 = vadd.f32 %v599_v63, %v3914_v40  ;;  %v689_v2 = vadd.f32 %v688_v0, %v3916_v41 }
 0x162   : > { %v2338_v30 = vmax.f32 %v776_v61, 0.0  ;;  %v2339_v3 = vmax.f32 %v865_v62, 0.0 }
 0x163   : > { %v2352_v4 = vmax.f32 %v600_v1, 0.0  ;;  %v2353_v5 = vmax.f32 %v689_v2, 0.0 }
 0x164   : > { %v2563_v6 = vadd.f32 %v2562_v56, %v2338_v30  ;;  %v2600_v32 = vadd.f32 %v2599_v57, %v2339_v3 }
 0x165   : > { %v2490_v7 = vadd.f32 %v2489_v58, %v2352_v4  ;;  %v2527_v8 = vadd.f32 %v2526_v59, %v2353_v5 }
 0x167   : > { %v777_v9 = vpop.f32.mrf.mxu2  ;;  %v866_v10 = vpop.f32.mrf.mxu3 }
 0x168   : > { %v778_v11 = vadd.f32 %v777_v9, %v3926_v50  ;;  %v867_v12 = vadd.f32 %v866_v10, %v3928_v51  ;;  %v602_v13 = vpop.f32.mrf.mxu0  ;;  %v691_v14 = vpop.f32.mrf.mxu1 }
 0x169   : > { %v603_v15 = vadd.f32 %v602_v13, %v3914_v40  ;;  %v692_v16 = vadd.f32 %v691_v14, %v3916_v41 }
 0x16a   : > { %v2354_v17 = vmax.f32 %v778_v11, 0.0  ;;  %v2355_v18 = vmax.f32 %v867_v12, 0.0 }
 0x16b   : > { %v2368_v19 = vmax.f32 %v603_v15, 0.0  ;;  %v2369_v20 = vmax.f32 %v692_v16, 0.0  ;;  %3366 = vmatmul.msk.bf16.gmra.mxu0 %vm430_vm1, %v3617_v21  ;;  %3382 = vmatmul.msk.bf16.gmra.mxu1 %vm430_vm1, %v3617_v21 }
 0x16c   : > { %v2564_v22 = vadd.f32 %v2563_v6, %v2354_v17  ;;  %v2601_v23 = vadd.f32 %v2600_v32, %v2355_v18  ;;  %3398 = vmatmul.msk.bf16.gmra.mxu2 %vm430_vm1, %v3617_v21  ;;  %3414 = vmatmul.msk.bf16.gmra.mxu3 %vm430_vm1, %v3617_v21 }
 0x16d   : > { %v2491_v25 = vadd.f32 %v2490_v7, %v2368_v19  ;;  %v2528_v26 = vadd.f32 %v2527_v8, %v2369_v20 }
 0x16f   : > { %v780_v27 = vpop.f32.mrf.mxu2  ;;  %v869_v28 = vpop.f32.mrf.mxu3 }
 0x170   : > { %v781_v29 = vadd.f32 %v780_v27, %v3926_v50  ;;  %v870_v33 = vadd.f32 %v869_v28, %v3928_v51  ;;  %v604_v34 = vpop.f32.mrf.mxu0  ;;  %v693_v35 = vpop.f32.mrf.mxu1  ;;  %v3619_v28 = vld [vmem:[%s3833_s5 + $0x38] sm:$0xff] }
 0x171   : > { %v605_v36 = vadd.f32 %v604_v34, %v3914_v40  ;;  %v694_v37 = vadd.f32 %v693_v35, %v3916_v41 }
 0x172   : > { %v2370_v31 = vmax.f32 %v781_v29, 0.0  ;;  %v2371_v38 = vmax.f32 %v870_v33, 0.0 }
 0x173   : > { %v2384_v39 = vmax.f32 %v605_v36, 0.0  ;;  %v2385_v42 = vmax.f32 %v694_v37, 0.0 }
 0x174   : > { %v2565_v43 = vadd.f32 %v2564_v22, %v2370_v31  ;;  %v2602_v44 = vadd.f32 %v2601_v23, %v2371_v38 }
 0x175   : > { %v2492_v45 = vadd.f32 %v2491_v25, %v2384_v39  ;;  %v2529_v46 = vadd.f32 %v2528_v26, %v2385_v42 }
 0x177   : > { %v782_v47 = vpop.f32.mrf.mxu2  ;;  %v871_v48 = vpop.f32.mrf.mxu3 }
 0x178   : > { %v783_v49 = vadd.f32 %v782_v47, %v3926_v50  ;;  %v872_v52 = vadd.f32 %v871_v48, %v3928_v51  ;;  %v607_v53 = vpop.f32.mrf.mxu0  ;;  %v696_v54 = vpop.f32.mrf.mxu1 }
 0x179   : > { %v608_v55 = vadd.f32 %v607_v53, %v3914_v40  ;;  %v697_v56 = vadd.f32 %v696_v54, %v3916_v41 }
 0x17a   : > { %v2386_v57 = vmax.f32 %v783_v49, 0.0  ;;  %v2387_v58 = vmax.f32 %v872_v52, 0.0 }
 0x17b   : > { %v2400_v59 = vmax.f32 %v608_v55, 0.0  ;;  %v2401_v60 = vmax.f32 %v697_v56, 0.0  ;;  %3367 = vmatmul.msk.bf16.gmra.mxu0 %vm430_vm1, %v3618_v24  ;;  %3383 = vmatmul.msk.bf16.gmra.mxu1 %vm430_vm1, %v3618_v24 }
 0x17c   : > { %v2566_v61 = vadd.f32 %v2565_v43, %v2386_v57  ;;  %v2603_v62 = vadd.f32 %v2602_v44, %v2387_v58  ;;  %3399 = vmatmul.msk.bf16.gmra.mxu2 %vm430_vm1, %v3618_v24  ;;  %3415 = vmatmul.msk.bf16.gmra.mxu3 %vm430_vm1, %v3618_v24 }
 0x17d   : > { %v2493_v63 = vadd.f32 %v2492_v45, %v2400_v59  ;;  %v2530_v0 = vadd.f32 %v2529_v46, %v2401_v60 }
 0x17f   : > { %v785_v1 = vpop.f32.mrf.mxu2  ;;  %v874_v2 = vpop.f32.mrf.mxu3 }
 0x180   : > { %v786_v30 = vadd.f32 %v785_v1, %v3926_v50  ;;  %v875_v3 = vadd.f32 %v874_v2, %v3928_v51  ;;  %v609_v4 = vpop.f32.mrf.mxu0  ;;  %v698_v5 = vpop.f32.mrf.mxu1 }
 0x181   : > { %v610_v6 = vadd.f32 %v609_v4, %v3914_v40  ;;  %v699_v32 = vadd.f32 %v698_v5, %v3916_v41  ;;  %v3621_v4 = vld [vmem:[%s3833_s5 + $0x40] sm:$0xff] }
 0x182   : > { %v2402_v7 = vmax.f32 %v786_v30, 0.0  ;;  %v2403_v8 = vmax.f32 %v875_v3, 0.0 }
 0x183   : > { %v2416_v9 = vmax.f32 %v610_v6, 0.0  ;;  %v2417_v10 = vmax.f32 %v699_v32, 0.0 }
 0x184   : > { %v2567_v11 = vadd.f32 %v2566_v61, %v2402_v7  ;;  %v2604_v12 = vadd.f32 %v2603_v62, %v2403_v8 }
 0x185   : > { %v2494_v13 = vadd.f32 %v2493_v63, %v2416_v9  ;;  %v2531_v14 = vadd.f32 %v2530_v0, %v2417_v10  ;;  %v3620_v0 = vld [vmem:[#allocation5] sm:$0xff] }
 0x186   : > { %v4148_v1 = vperm.slane %v3620_v0, 4  ;;  %v4150_v2 = vperm.slane %v3620_v0, 5 }
 0x187   : > { %v787_v15 = vpop.f32.mrf.mxu2  ;;  %v876_v16 = vpop.f32.mrf.mxu3 }
 0x188   : > { %v788_v17 = vadd.f32 %v787_v15, %v3926_v50  ;;  %v877_v18 = vadd.f32 %v876_v16, %v3928_v51  ;;  %v612_v19 = vpop.f32.mrf.mxu0  ;;  %v701_v20 = vpop.f32.mrf.mxu1  ;;  %v4159_v16 = vperm.slane %v3620_v0, 6 }
 0x189   : > { %v613_v21 = vadd.f32 %v612_v19, %v3914_v40  ;;  %v702_v22 = vadd.f32 %v701_v20, %v3916_v41 }
 0x18a   : > { %v2418_v23 = vmax.f32 %v788_v17, 0.0  ;;  %v2419_v25 = vmax.f32 %v877_v18, 0.0  ;;  %v4161_v17 = vperm.slane %v3620_v0, 7 }
 0x18b   : > { %v2432_v26 = vmax.f32 %v613_v21, 0.0  ;;  %v2433_v27 = vmax.f32 %v702_v22, 0.0  ;;  %3368 = vmatmul.msk.bf16.gmra.mxu0 %vm430_vm1, %v3619_v28  ;;  %3384 = vmatmul.msk.bf16.gmra.mxu1 %vm430_vm1, %v3619_v28 }
 0x18c   : > { %v2568_v29 = vadd.f32 %v2567_v11, %v2418_v23  ;;  %v2605_v33 = vadd.f32 %v2604_v12, %v2419_v25  ;;  %3400 = vmatmul.msk.bf16.gmra.mxu2 %vm430_vm1, %v3619_v28  ;;  %3416 = vmatmul.msk.bf16.gmra.mxu3 %vm430_vm1, %v3619_v28 }
 0x18d   : > { %v2495_v34 = vadd.f32 %v2494_v13, %v2432_v26  ;;  %v2532_v35 = vadd.f32 %v2531_v14, %v2433_v27 }
 0x18f   : > { %v790_v36 = vpop.f32.mrf.mxu2  ;;  %v879_v37 = vpop.f32.mrf.mxu3 }
 0x190   : > { %v791_v31 = vadd.f32 %v790_v36, %v3926_v50  ;;  %v880_v38 = vadd.f32 %v879_v37, %v3928_v51  ;;  %v614_v39 = vpop.f32.mrf.mxu0  ;;  %v703_v42 = vpop.f32.mrf.mxu1 }
 0x191   : > { %v615_v43 = vadd.f32 %v614_v39, %v3914_v40  ;;  %v704_v44 = vadd.f32 %v703_v42, %v3916_v41 }
 0x192   : > { %v2434_v45 = vmax.f32 %v791_v31, 0.0  ;;  %v2435_v46 = vmax.f32 %v880_v38, 0.0 }
 0x193   : > { %v2448_v47 = vmax.f32 %v615_v43, 0.0  ;;  %v2449_v48 = vmax.f32 %v704_v44, 0.0 }
 0x194   : > { %v2569_v49 = vadd.f32 %v2568_v29, %v2434_v45  ;;  %v2606_v52 = vadd.f32 %v2605_v33, %v2435_v46 }
 0x195   : > { %v2496_v53 = vadd.f32 %v2495_v34, %v2448_v47  ;;  %v2533_v54 = vadd.f32 %v2532_v35, %v2449_v48 }
 0x197   : > { %v2497_v55 = vrot.slane %v2496_v53, 4  ;;  %v2534_v56 = vrot.slane %v2533_v54, 4  ;;  %v792_v57 = vpop.f32.mrf.mxu2  ;;  %v881_v58 = vpop.f32.mrf.mxu3 }
 0x198   : > { %v793_v59 = vadd.f32 %v792_v57, %v3926_v50  ;;  %v882_v60 = vadd.f32 %v881_v58, %v3928_v51  ;;  %v893_v40 = vpop.f32.mrf.mxu0  ;;  %v982_v24 = vpop.f32.mrf.mxu1 }
 0x199   : > { %v2498_v41 = vadd.f32 %v2497_v55, %v2496_v53  ;;  %v2535_v61 = vadd.f32 %v2534_v56, %v2533_v54  ;;  %v894_v8 = vadd.f32 %v893_v40, %v4148_v1  ;;  %v983_v9 = vadd.f32 %v982_v24, %v4150_v2 }
 0x19a   : > { %v2450_v62 = vmax.f32 %v793_v59, 0.0  ;;  %v2451_v63 = vmax.f32 %v882_v60, 0.0 }
 0x19b   : > { %v2499_v30 = vrot.slane %v2498_v41, 2  ;;  %v2536_v3 = vrot.slane %v2535_v61, 2  ;;  %3369 = vmatmul.msk.bf16.gmra.mxu0 %vm430_vm1, %v3621_v4  ;;  %3385 = vmatmul.msk.bf16.gmra.mxu1 %vm430_vm1, %v3621_v4  ;;  %v1956_v26 = vmax.f32 %v894_v8, 0.0  ;;  %v1957_v27 = vmax.f32 %v983_v9, 0.0 }
 0x19c   : > { %v2570_v50 = vadd.f32 %v2569_v49, %v2450_v62  ;;  %v2607_v51 = vadd.f32 %v2606_v52, %v2451_v63  ;;  %3401 = vmatmul.msk.bf16.gmra.mxu2 %vm430_vm1, %v3621_v4  ;;  %3417 = vmatmul.msk.bf16.gmra.mxu3 %vm430_vm1, %v3621_v4  ;;  %v3622_v62 = vld [vmem:[%s3833_s5 + $0x48] sm:$0xff] }
 0x19d   : > { %v2500_v5 = vadd.f32 %v2499_v30, %v2498_v41  ;;  %v2537_v6 = vadd.f32 %v2536_v3, %v2535_v61 }
 0x19e   : > { %v2571_v32 = vrot.slane %v2570_v50, 4  ;;  %v2608_v7 = vrot.slane %v2607_v51, 4 }
 0x19f   : > { %v2501_v10 = vrot.slane %v2500_v5, 1  ;;  %v2538_v11 = vrot.slane %v2537_v6, 1  ;;  %v1071_v12 = vpop.f32.mrf.mxu2  ;;  %v1160_v13 = vpop.f32.mrf.mxu3 }
 0x1a0   : > { %v2572_v14 = vadd.f32 %v2571_v32, %v2570_v50  ;;  %v2609_v15 = vadd.f32 %v2608_v7, %v2607_v51  ;;  %v895_v18 = vpop.f32.mrf.mxu0  ;;  %v984_v19 = vpop.f32.mrf.mxu1  ;;  %v1072_v37 = vadd.f32 %v1071_v12, %v4159_v16  ;;  %v1161_v38 = vadd.f32 %v1160_v13, %v4161_v17 }
 0x1a1   : > { %v2539_v20 = vadd.f32 %v2538_v11, %v2537_v6  ;;  %v896_v21 = vadd.f32 %v895_v18, %v4148_v1  ;;  %v985_v22 = vadd.f32 %v984_v19, %v4150_v2  ;;  %v2502_v28 = vadd.f32 %v2501_v10, %v2500_v5 }
 0x1a2   : > { %v2573_v23 = vrot.slane %v2572_v14, 2  ;;  %v2610_v25 = vrot.slane %v2609_v15, 2  ;;  %v1958_v55 = vmax.f32 %v1072_v37, 0.0  ;;  %v1959_v56 = vmax.f32 %v1161_v38, 0.0  ;;  %v3623_v37 = vld [vmem:[%s3833_s5 + $0x50] sm:$0xff] }
 0x1a3   : > { %v3074_v29 = vrot.slane %v2539_v20, 7  ;;  %v1972_v33 = vmax.f32 %v896_v21, 0.0  ;;  %v1973_v34 = vmax.f32 %v985_v22, 0.0 }
 0x1a4   : > { %v2574_v35 = vadd.f32 %v2573_v23, %v2572_v14  ;;  %v2611_v36 = vadd.f32 %v2610_v25, %v2609_v15 }
 0x1a5   : > { %v3089_v31 = vsel %vm3088_vm2, %v2502_v28, %v3074_v29  ;;  %v2614_v39 = vadd.f32 %v1972_v33, %v1956_v26  ;;  %v2651_v42 = vadd.f32 %v1973_v34, %v1957_v27 }
 0x1a6   : > { %v2575_v43 = vrot.slane %v2574_v35, 1  ;;  %v2612_v44 = vrot.slane %v2611_v36, 1 }
 0x1a7   : > { %v1073_v45 = vpop.f32.mrf.mxu2  ;;  %v1162_v46 = vpop.f32.mrf.mxu3 }
 0x1a8   : > { %v2576_v47 = vadd.f32 %v2575_v43, %v2574_v35  ;;  %v2613_v48 = vadd.f32 %v2612_v44, %v2611_v36  ;;  %v1074_v49 = vadd.f32 %v1073_v45, %v4159_v16  ;;  %v1163_v52 = vadd.f32 %v1162_v46, %v4161_v17  ;;  %v898_v53 = vpop.f32.mrf.mxu0  ;;  %v987_v54 = vpop.f32.mrf.mxu1 }
 0x1a9   : > { %v899_v57 = vadd.f32 %v898_v53, %v4148_v1  ;;  %v988_v58 = vadd.f32 %v987_v54, %v4150_v2 }
 0x1aa   : > { %v3075_v59 = vrot.slane %v2576_v47, 6  ;;  %v3076_v60 = vrot.slane %v2613_v48, 5  ;;  %v1974_v40 = vmax.f32 %v1074_v49, 0.0  ;;  %v1975_v24 = vmax.f32 %v1163_v52, 0.0 }
 0x1ab   : > { %v1988_v41 = vmax.f32 %v899_v57, 0.0  ;;  %v1989_v61 = vmax.f32 %v988_v58, 0.0  ;;  %3370 = vmatmul.msk.bf16.gmra.mxu0 %vm430_vm1, %v3622_v62  ;;  %3386 = vmatmul.msk.bf16.gmra.mxu1 %vm430_vm1, %v3622_v62 }
 0x1ac   : > { %v3091_v63 = vsel %vm3090_vm3, %v3075_v59, %v3076_v60  ;;  %v2688_v0 = vadd.f32 %v1974_v40, %v1958_v55  ;;  %v2725_v30 = vadd.f32 %v1975_v24, %v1959_v56  ;;  %3402 = vmatmul.msk.bf16.gmra.mxu2 %vm430_vm1, %v3622_v62  ;;  %3418 = vmatmul.msk.bf16.gmra.mxu3 %vm430_vm1, %v3622_v62 }
 0x1ad   : > { %v4179_v3 = vsel %vm3092_vm4, %v3089_v31, %v3091_v63  ;;  %v2615_v4 = vadd.f32 %v2614_v39, %v1988_v41  ;;  %v2652_v50 = vadd.f32 %v2651_v42, %v1989_v61 }
 0x1af   : > { %v1076_v51 = vpop.f32.mrf.mxu2  ;;  %v1165_v5 = vpop.f32.mrf.mxu3 }
 0x1b0   : > { %v1077_v6 = vadd.f32 %v1076_v51, %v4159_v16  ;;  %v1166_v32 = vadd.f32 %v1165_v5, %v4161_v17  ;;  %v900_v7 = vpop.f32.mrf.mxu0  ;;  %v989_v8 = vpop.f32.mrf.mxu1 }
 0x1b1   : > { %v901_v9 = vadd.f32 %v900_v7, %v4148_v1  ;;  %v990_v10 = vadd.f32 %v989_v8, %v4150_v2 }
 0x1b2   : > { %v1990_v11 = vmax.f32 %v1077_v6, 0.0  ;;  %v1991_v12 = vmax.f32 %v1166_v32, 0.0  ;;  %v3624_v6 = vld [vmem:[%s3833_s5 + $0x58] sm:$0xff] }
 0x1b3   : > { %v2004_v13 = vmax.f32 %v901_v9, 0.0  ;;  %v2005_v14 = vmax.f32 %v990_v10, 0.0 }
 0x1b4   : > { %v2689_v15 = vadd.f32 %v2688_v0, %v1990_v11  ;;  %v2726_v18 = vadd.f32 %v2725_v30, %v1991_v12 }
 0x1b5   : > { %v2616_v19 = vadd.f32 %v2615_v4, %v2004_v13  ;;  %v2653_v20 = vadd.f32 %v2652_v50, %v2005_v14 }
 0x1b7   : > { %v1078_v21 = vpop.f32.mrf.mxu2  ;;  %v1167_v22 = vpop.f32.mrf.mxu3 }
 0x1b8   : > { %v1079_v23 = vadd.f32 %v1078_v21, %v4159_v16  ;;  %v1168_v25 = vadd.f32 %v1167_v22, %v4161_v17  ;;  %v903_v26 = vpop.f32.mrf.mxu0  ;;  %v992_v27 = vpop.f32.mrf.mxu1 }
 0x1b9   : > { %v904_v28 = vadd.f32 %v903_v26, %v4148_v1  ;;  %v993_v29 = vadd.f32 %v992_v27, %v4150_v2 }
 0x1ba   : > { %v2006_v33 = vmax.f32 %v1079_v23, 0.0  ;;  %v2007_v34 = vmax.f32 %v1168_v25, 0.0 }
 0x1bb   : > { %v2020_v35 = vmax.f32 %v904_v28, 0.0  ;;  %v2021_v36 = vmax.f32 %v993_v29, 0.0  ;;  %3371 = vmatmul.msk.bf16.gmra.mxu0 %vm430_vm1, %v3623_v37  ;;  %3387 = vmatmul.msk.bf16.gmra.mxu1 %vm430_vm1, %v3623_v37 }
 0x1bc   : > { %v2690_v31 = vadd.f32 %v2689_v15, %v2006_v33  ;;  %v2727_v38 = vadd.f32 %v2726_v18, %v2007_v34  ;;  %3403 = vmatmul.msk.bf16.gmra.mxu2 %vm430_vm1, %v3623_v37  ;;  %3419 = vmatmul.msk.bf16.gmra.mxu3 %vm430_vm1, %v3623_v37 }
 0x1bd   : > { %v2617_v39 = vadd.f32 %v2616_v19, %v2020_v35  ;;  %v2654_v42 = vadd.f32 %v2653_v20, %v2021_v36 }
 0x1bf   : > { %v1081_v43 = vpop.f32.mrf.mxu2  ;;  %v1170_v44 = vpop.f32.mrf.mxu3 }
 0x1c0   : > { %v1082_v45 = vadd.f32 %v1081_v43, %v4159_v16  ;;  %v1171_v46 = vadd.f32 %v1170_v44, %v4161_v17  ;;  %v905_v47 = vpop.f32.mrf.mxu0  ;;  %v994_v48 = vpop.f32.mrf.mxu1 }
 0x1c1   : > { %v906_v49 = vadd.f32 %v905_v47, %v4148_v1  ;;  %v995_v52 = vadd.f32 %v994_v48, %v4150_v2 }
 0x1c2   : > { %v2022_v53 = vmax.f32 %v1082_v45, 0.0  ;;  %v2023_v54 = vmax.f32 %v1171_v46, 0.0  ;;  %v3625_v45 = vld [vmem:[%s3833_s5 + $0x60] sm:$0xff] }
 0x1c3   : > { %v2036_v55 = vmax.f32 %v906_v49, 0.0  ;;  %v2037_v56 = vmax.f32 %v995_v52, 0.0 }
 0x1c4   : > { %v2691_v57 = vadd.f32 %v2690_v31, %v2022_v53  ;;  %v2728_v58 = vadd.f32 %v2727_v38, %v2023_v54 }
 0x1c5   : > { %v2618_v59 = vadd.f32 %v2617_v39, %v2036_v55  ;;  %v2655_v60 = vadd.f32 %v2654_v42, %v2037_v56 }
 0x1c7   : > { %v1083_v40 = vpop.f32.mrf.mxu2  ;;  %v1172_v24 = vpop.f32.mrf.mxu3 }
 0x1c8   : > { %v1084_v41 = vadd.f32 %v1083_v40, %v4159_v16  ;;  %v1173_v61 = vadd.f32 %v1172_v24, %v4161_v17  ;;  %v908_v62 = vpop.f32.mrf.mxu0  ;;  %v997_v63 = vpop.f32.mrf.mxu1 }
 0x1c9   : > { %v909_v0 = vadd.f32 %v908_v62, %v4148_v1  ;;  %v998_v30 = vadd.f32 %v997_v63, %v4150_v2 }
 0x1ca   : > { %v2038_v4 = vmax.f32 %v1084_v41, 0.0  ;;  %v2039_v50 = vmax.f32 %v1173_v61, 0.0 }
 0x1cb   : > { %v2052_v51 = vmax.f32 %v909_v0, 0.0  ;;  %v2053_v5 = vmax.f32 %v998_v30, 0.0  ;;  %3372 = vmatmul.msk.bf16.gmra.mxu0 %vm430_vm1, %v3624_v6  ;;  %3388 = vmatmul.msk.bf16.gmra.mxu1 %vm430_vm1, %v3624_v6 }
 0x1cc   : > { %v2692_v32 = vadd.f32 %v2691_v57, %v2038_v4  ;;  %v2729_v7 = vadd.f32 %v2728_v58, %v2039_v50  ;;  %3404 = vmatmul.msk.bf16.gmra.mxu2 %vm430_vm1, %v3624_v6  ;;  %3420 = vmatmul.msk.bf16.gmra.mxu3 %vm430_vm1, %v3624_v6 }
 0x1cd   : > { %v2619_v8 = vadd.f32 %v2618_v59, %v2052_v51  ;;  %v2656_v9 = vadd.f32 %v2655_v60, %v2053_v5 }
 0x1cf   : > { %v1086_v10 = vpop.f32.mrf.mxu2  ;;  %v1175_v11 = vpop.f32.mrf.mxu3 }
 0x1d0   : > { %v1087_v12 = vadd.f32 %v1086_v10, %v4159_v16  ;;  %v1176_v13 = vadd.f32 %v1175_v11, %v4161_v17  ;;  %v910_v14 = vpop.f32.mrf.mxu0  ;;  %v999_v15 = vpop.f32.mrf.mxu1 }
 0x1d1   : > { %v911_v18 = vadd.f32 %v910_v14, %v4148_v1  ;;  %v1000_v19 = vadd.f32 %v999_v15, %v4150_v2 }
 0x1d2   : > { %v2054_v20 = vmax.f32 %v1087_v12, 0.0  ;;  %v2055_v21 = vmax.f32 %v1176_v13, 0.0  ;;  %v3626_v12 = vld [vmem:[%s3833_s5 + $0x68] sm:$0xff] }
 0x1d3   : > { %v2068_v22 = vmax.f32 %v911_v18, 0.0  ;;  %v2069_v23 = vmax.f32 %v1000_v19, 0.0 }
 0x1d4   : > { %v2693_v25 = vadd.f32 %v2692_v32, %v2054_v20  ;;  %v2730_v26 = vadd.f32 %v2729_v7, %v2055_v21 }
 0x1d5   : > { %v2620_v27 = vadd.f32 %v2619_v8, %v2068_v22  ;;  %v2657_v28 = vadd.f32 %v2656_v9, %v2069_v23 }
 0x1d7   : > { %v1088_v29 = vpop.f32.mrf.mxu2  ;;  %v1177_v33 = vpop.f32.mrf.mxu3 }
 0x1d8   : > { %v1089_v34 = vadd.f32 %v1088_v29, %v4159_v16  ;;  %v1178_v35 = vadd.f32 %v1177_v33, %v4161_v17  ;;  %v913_v36 = vpop.f32.mrf.mxu0  ;;  %v1002_v37 = vpop.f32.mrf.mxu1 }
 0x1d9   : > { %v914_v31 = vadd.f32 %v913_v36, %v4148_v1  ;;  %v1003_v38 = vadd.f32 %v1002_v37, %v4150_v2 }
 0x1da   : > { %v2070_v39 = vmax.f32 %v1089_v34, 0.0  ;;  %v2071_v42 = vmax.f32 %v1178_v35, 0.0 }
 0x1db   : > { %v2084_v43 = vmax.f32 %v914_v31, 0.0  ;;  %v2085_v44 = vmax.f32 %v1003_v38, 0.0  ;;  %3373 = vmatmul.msk.bf16.gmra.mxu0 %vm430_vm1, %v3625_v45  ;;  %3389 = vmatmul.msk.bf16.gmra.mxu1 %vm430_vm1, %v3625_v45 }
 0x1dc   : > { %v2694_v46 = vadd.f32 %v2693_v25, %v2070_v39  ;;  %v2731_v47 = vadd.f32 %v2730_v26, %v2071_v42  ;;  %3405 = vmatmul.msk.bf16.gmra.mxu2 %vm430_vm1, %v3625_v45  ;;  %3421 = vmatmul.msk.bf16.gmra.mxu3 %vm430_vm1, %v3625_v45 }
 0x1dd   : > { %v2621_v48 = vadd.f32 %v2620_v27, %v2084_v43  ;;  %v2658_v49 = vadd.f32 %v2657_v28, %v2085_v44 }
 0x1df   : > { %v1091_v52 = vpop.f32.mrf.mxu2  ;;  %v1180_v53 = vpop.f32.mrf.mxu3 }
 0x1e0   : > { %v1092_v54 = vadd.f32 %v1091_v52, %v4159_v16  ;;  %v1181_v55 = vadd.f32 %v1180_v53, %v4161_v17  ;;  %v915_v56 = vpop.f32.mrf.mxu0  ;;  %v1004_v57 = vpop.f32.mrf.mxu1 }
 0x1e1   : > { %v916_v58 = vadd.f32 %v915_v56, %v4148_v1  ;;  %v1005_v59 = vadd.f32 %v1004_v57, %v4150_v2 }
 0x1e2   : > { %v2086_v60 = vmax.f32 %v1092_v54, 0.0  ;;  %v2087_v40 = vmax.f32 %v1181_v55, 0.0  ;;  %v3627_v54 = vld [vmem:[%s3833_s5 + $0x70] sm:$0xff] }
 0x1e3   : > { %v2100_v24 = vmax.f32 %v916_v58, 0.0  ;;  %v2101_v41 = vmax.f32 %v1005_v59, 0.0  ;;  %v273_v59 = vld [vmem:[#allocation3 + $0x38] sm:$0xff] }
 0x1e4   : > { %v2695_v61 = vadd.f32 %v2694_v46, %v2086_v60  ;;  %v2732_v62 = vadd.f32 %v2731_v47, %v2087_v40  ;;  %v412_v60 = vunpack.c.l.b16 %v273_v59  ;;  %v413_v40 = vunpack.c.h.b16 %v273_v59 }
 0x1e5   : > { %v2622_v63 = vadd.f32 %v2621_v48, %v2100_v24  ;;  %v2659_v0 = vadd.f32 %v2658_v49, %v2101_v41 }
 0x1e7   : > { %v1093_v30 = vpop.f32.mrf.mxu2  ;;  %v1182_v4 = vpop.f32.mrf.mxu3 }
 0x1e8   : > { %v1094_v50 = vadd.f32 %v1093_v30, %v4159_v16  ;;  %v1183_v51 = vadd.f32 %v1182_v4, %v4161_v17  ;;  %v918_v5 = vpop.f32.mrf.mxu0  ;;  %v1007_v6 = vpop.f32.mrf.mxu1  ;;  %v428_v30 = vpack.c.b16 %v412_v60, %v412_v60  ;;  %v429_v4 = vpack.c.b16 %v413_v40, %v413_v40 }
 0x1e9   : > { %v919_v32 = vadd.f32 %v918_v5, %v4148_v1  ;;  %v1008_v7 = vadd.f32 %v1007_v6, %v4150_v2 }
 0x1ea   : > { %v2102_v8 = vmax.f32 %v1094_v50, 0.0  ;;  %v2103_v9 = vmax.f32 %v1183_v51, 0.0 }
 0x1eb   : > { %v2116_v10 = vmax.f32 %v919_v32, 0.0  ;;  %v2117_v11 = vmax.f32 %v1008_v7, 0.0  ;;  %3374 = vmatmul.msk.bf16.gmra.mxu0 %vm430_vm1, %v3626_v12  ;;  %3390 = vmatmul.msk.bf16.gmra.mxu1 %vm430_vm1, %v3626_v12  ;;  %v523_v32 = vsel %vm479_vm0, %v428_v30, 0  ;;  %v526_v7 = vsel %vm479_vm0, %v429_v4, 0 }
 0x1ec   : > { %v2696_v13 = vadd.f32 %v2695_v61, %v2102_v8  ;;  %v2733_v14 = vadd.f32 %v2732_v62, %v2103_v9  ;;  %3406 = vmatmul.msk.bf16.gmra.mxu2 %vm430_vm1, %v3626_v12  ;;  %3422 = vmatmul.msk.bf16.gmra.mxu3 %vm430_vm1, %v3626_v12 }
 0x1ed   : > { %v2623_v15 = vadd.f32 %v2622_v63, %v2116_v10  ;;  %v2660_v18 = vadd.f32 %v2659_v0, %v2117_v11  ;;  %1781 = vmatpush.bf16.msrb.mxu2 %v523_v32  ;;  %1870 = vmatpush.bf16.msrb.mxu3 %v526_v7  ;;  %v3629_v7 = vld [vmem:[%s3833_s5] sm:$0xff] }
 0x1ef   : > { %v1096_v19 = vpop.f32.mrf.mxu2  ;;  %v1185_v20 = vpop.f32.mrf.mxu3 }
 0x1f0   : > { %v1097_v21 = vadd.f32 %v1096_v19, %v4159_v16  ;;  %v1186_v22 = vadd.f32 %v1185_v20, %v4161_v17  ;;  %v920_v23 = vpop.f32.mrf.mxu0  ;;  %v1009_v25 = vpop.f32.mrf.mxu1 }
 0x1f1   : > { %v921_v26 = vadd.f32 %v920_v23, %v4148_v1  ;;  %v1010_v27 = vadd.f32 %v1009_v25, %v4150_v2 }
 0x1f2   : > { %v2118_v28 = vmax.f32 %v1097_v21, 0.0  ;;  %v2119_v29 = vmax.f32 %v1186_v22, 0.0 }
 0x1f3   : > { %v2132_v33 = vmax.f32 %v921_v26, 0.0  ;;  %v2133_v34 = vmax.f32 %v1010_v27, 0.0 }
 0x1f4   : > { %v2697_v35 = vadd.f32 %v2696_v13, %v2118_v28  ;;  %v2734_v36 = vadd.f32 %v2733_v14, %v2119_v29  ;;  %v272_v14 = vld [vmem:[#allocation3 + $0x30] sm:$0xff] }
 0x1f5   : > { %v2624_v37 = vadd.f32 %v2623_v15, %v2132_v33  ;;  %v2661_v31 = vadd.f32 %v2660_v18, %v2133_v34  ;;  %v410_v15 = vunpack.c.l.b16 %v272_v14  ;;  %v411_v18 = vunpack.c.h.b16 %v272_v14 }
 0x1f7   : > { %v1098_v38 = vpop.f32.mrf.mxu2  ;;  %v1187_v39 = vpop.f32.mrf.mxu3  ;;  %v426_v26 = vpack.c.b16 %v410_v15, %v410_v15  ;;  %v427_v27 = vpack.c.b16 %v411_v18, %v411_v18 }
 0x1f8   : > { %v1099_v42 = vadd.f32 %v1098_v38, %v4159_v16  ;;  %v1188_v43 = vadd.f32 %v1187_v39, %v4161_v17  ;;  %v923_v44 = vpop.f32.mrf.mxu0  ;;  %v1012_v45 = vpop.f32.mrf.mxu1  ;;  %v3628_v38 = vld [vmem:[%s3833_s5 + $0x78] sm:$0xff] }
 0x1f9   : > { %v924_v46 = vadd.f32 %v923_v44, %v4148_v1  ;;  %v1013_v47 = vadd.f32 %v1012_v45, %v4150_v2 }
 0x1fa   : > { %v2134_v48 = vmax.f32 %v1099_v42, 0.0  ;;  %v2135_v49 = vmax.f32 %v1188_v43, 0.0 }
 0x1fb   : > { %v2148_v52 = vmax.f32 %v924_v46, 0.0  ;;  %v2149_v53 = vmax.f32 %v1013_v47, 0.0  ;;  %3375 = vmatmul.msk.bf16.gmra.mxu0 %vm430_vm1, %v3627_v54  ;;  %3391 = vmatmul.msk.bf16.gmra.mxu1 %vm430_vm1, %v3627_v54 }
 0x1fc   : > { %v2698_v55 = vadd.f32 %v2697_v35, %v2134_v48  ;;  %v2735_v56 = vadd.f32 %v2734_v36, %v2135_v49  ;;  %3407 = vmatmul.msk.bf16.gmra.mxu2 %vm430_vm1, %v3627_v54  ;;  %3423 = vmatmul.msk.bf16.gmra.mxu3 %vm430_vm1, %v3627_v54  ;;  %v517_v35 = vsel %vm479_vm0, %v426_v26, 0  ;;  %v520_v36 = vsel %vm479_vm0, %v427_v27, 0 }
 0x1fd   : > { %v2625_v57 = vadd.f32 %v2624_v37, %v2148_v52  ;;  %v2662_v58 = vadd.f32 %v2661_v31, %v2149_v53  ;;  %1603 = vmatpush.bf16.msrb.mxu0 %v517_v35  ;;  %1692 = vmatpush.bf16.msrb.mxu1 %v520_v36 }
 0x1ff   : > { %v1101_v24 = vpop.f32.mrf.mxu2  ;;  %v1190_v41 = vpop.f32.mrf.mxu3 }
 0x200   : > { %v1102_v61 = vadd.f32 %v1101_v24, %v4159_v16  ;;  %v1191_v62 = vadd.f32 %v1190_v41, %v4161_v17  ;;  %v925_v63 = vpop.f32.mrf.mxu0  ;;  %v1014_v0 = vpop.f32.mrf.mxu1 }
 0x201   : > { %v926_v50 = vadd.f32 %v925_v63, %v4148_v1  ;;  %v1015_v51 = vadd.f32 %v1014_v0, %v4150_v2 }
 0x202   : > { %v2150_v5 = vmax.f32 %v1102_v61, 0.0  ;;  %v2151_v6 = vmax.f32 %v1191_v62, 0.0 }
 0x203   : > { %v2164_v8 = vmax.f32 %v926_v50, 0.0  ;;  %v2165_v9 = vmax.f32 %v1015_v51, 0.0 }
 0x204   : > { %v2699_v10 = vadd.f32 %v2698_v55, %v2150_v5  ;;  %v2736_v11 = vadd.f32 %v2735_v56, %v2151_v6 }
 0x205   : > { %v2626_v12 = vadd.f32 %v2625_v57, %v2164_v8  ;;  %v2663_v13 = vadd.f32 %v2662_v58, %v2165_v9 }
 0x207   : > { %v1103_v19 = vpop.f32.mrf.mxu2  ;;  %v1192_v20 = vpop.f32.mrf.mxu3 }
 0x208   : > { %v1104_v21 = vadd.f32 %v1103_v19, %v4159_v16  ;;  %v1193_v22 = vadd.f32 %v1192_v20, %v4161_v17  ;;  %v928_v23 = vpop.f32.mrf.mxu0  ;;  %v1017_v25 = vpop.f32.mrf.mxu1 }
 0x209   : > { %v929_v28 = vadd.f32 %v928_v23, %v4148_v1  ;;  %v1018_v29 = vadd.f32 %v1017_v25, %v4150_v2 }
 0x20a   : > { %v2166_v33 = vmax.f32 %v1104_v21, 0.0  ;;  %v2167_v34 = vmax.f32 %v1193_v22, 0.0 }
 0x20b   : > { %v2180_v37 = vmax.f32 %v929_v28, 0.0  ;;  %v2181_v31 = vmax.f32 %v1018_v29, 0.0  ;;  %3376 = vmatmul.msk.bf16.gmra.mxu0 %vm430_vm1, %v3628_v38  ;;  %3392 = vmatmul.msk.bf16.gmra.mxu1 %vm430_vm1, %v3628_v38 }
 0x20c   : > { %v2700_v39 = vadd.f32 %v2699_v10, %v2166_v33  ;;  %v2737_v42 = vadd.f32 %v2736_v11, %v2167_v34  ;;  %3408 = vmatmul.msk.bf16.gmra.mxu2 %vm430_vm1, %v3628_v38  ;;  %3424 = vmatmul.msk.bf16.gmra.mxu3 %vm430_vm1, %v3628_v38 }
 0x20d   : > { %v2627_v43 = vadd.f32 %v2626_v12, %v2180_v37  ;;  %v2664_v44 = vadd.f32 %v2663_v13, %v2181_v31 }
 0x20f   : > { %v1106_v45 = vpop.f32.mrf.mxu2  ;;  %v1195_v46 = vpop.f32.mrf.mxu3 }
 0x210   : > { %v1107_v47 = vadd.f32 %v1106_v45, %v4159_v16  ;;  %v1196_v48 = vadd.f32 %v1195_v46, %v4161_v17  ;;  %v930_v49 = vpop.f32.mrf.mxu0  ;;  %v1019_v52 = vpop.f32.mrf.mxu1 }
 0x211   : > { %v931_v53 = vadd.f32 %v930_v49, %v4148_v1  ;;  %v1020_v54 = vadd.f32 %v1019_v52, %v4150_v2 }
 0x212   : > { %v2182_v55 = vmax.f32 %v1107_v47, 0.0  ;;  %v2183_v56 = vmax.f32 %v1196_v48, 0.0  ;;  %v3630_v47 = vld [vmem:[%s3833_s5 + $0x8] sm:$0xff] }
 0x213   : > { %v2196_v57 = vmax.f32 %v931_v53, 0.0  ;;  %v2197_v58 = vmax.f32 %v1020_v54, 0.0 }
 0x214   : > { %v2701_v59 = vadd.f32 %v2700_v39, %v2182_v55  ;;  %v2738_v60 = vadd.f32 %v2737_v42, %v2183_v56 }
 0x215   : > { %v2628_v40 = vadd.f32 %v2627_v43, %v2196_v57  ;;  %v2665_v24 = vadd.f32 %v2664_v44, %v2197_v58 }
 0x217   : > { %v1108_v41 = vpop.f32.mrf.mxu2  ;;  %v1197_v61 = vpop.f32.mrf.mxu3 }
 0x218   : > { %v1109_v62 = vadd.f32 %v1108_v41, %v4159_v16  ;;  %v1198_v63 = vadd.f32 %v1197_v61, %v4161_v17  ;;  %v933_v0 = vpop.f32.mrf.mxu0  ;;  %v1022_v30 = vpop.f32.mrf.mxu1 }
 0x219   : > { %v934_v4 = vadd.f32 %v933_v0, %v4148_v1  ;;  %v1023_v50 = vadd.f32 %v1022_v30, %v4150_v2 }
 0x21a   : > { %v2198_v51 = vmax.f32 %v1109_v62, 0.0  ;;  %v2199_v5 = vmax.f32 %v1198_v63, 0.0 }
 0x21b   : > { %v2212_v6 = vmax.f32 %v934_v4, 0.0  ;;  %v2213_v32 = vmax.f32 %v1023_v50, 0.0  ;;  %3425 = vmatmul.msk.bf16.vlgmr.msra.gmra.mxu0 %vm430_vm1, %v3629_v7  ;;  %3441 = vmatmul.msk.bf16.vlgmr.msra.gmra.mxu1 %vm430_vm1, %v3629_v7 }
 0x21c   : > { %v2702_v8 = vadd.f32 %v2701_v59, %v2198_v51  ;;  %v2739_v9 = vadd.f32 %v2738_v60, %v2199_v5  ;;  %3457 = vmatmul.msk.bf16.vlgmr.msra.gmra.mxu2 %vm430_vm1, %v3629_v7  ;;  %3473 = vmatmul.msk.bf16.vlgmr.msra.gmra.mxu3 %vm430_vm1, %v3629_v7 }
 0x21d   : > { %v2629_v10 = vadd.f32 %v2628_v40, %v2212_v6  ;;  %v2666_v11 = vadd.f32 %v2665_v24, %v2213_v32 }
 0x21f   : > { %v1111_v12 = vpop.f32.mrf.mxu2  ;;  %v1200_v13 = vpop.f32.mrf.mxu3 }
 0x220   : > { %v1112_v14 = vadd.f32 %v1111_v12, %v4159_v16  ;;  %v1201_v15 = vadd.f32 %v1200_v13, %v4161_v17  ;;  %v935_v18 = vpop.f32.mrf.mxu0  ;;  %v1024_v19 = vpop.f32.mrf.mxu1 }
 0x221   : > { %v936_v20 = vadd.f32 %v935_v18, %v4148_v1  ;;  %v1025_v21 = vadd.f32 %v1024_v19, %v4150_v2 }
 0x222   : > { %v2214_v22 = vmax.f32 %v1112_v14, 0.0  ;;  %v2215_v23 = vmax.f32 %v1201_v15, 0.0  ;;  %v3631_v14 = vld [vmem:[%s3833_s5 + $0x10] sm:$0xff] }
 0x223   : > { %v2228_v25 = vmax.f32 %v936_v20, 0.0  ;;  %v2229_v26 = vmax.f32 %v1025_v21, 0.0 }
 0x224   : > { %v2703_v27 = vadd.f32 %v2702_v8, %v2214_v22  ;;  %v2740_v28 = vadd.f32 %v2739_v9, %v2215_v23 }
 0x225   : > { %v2630_v29 = vadd.f32 %v2629_v10, %v2228_v25  ;;  %v2667_v33 = vadd.f32 %v2666_v11, %v2229_v26 }
 0x227   : > { %v1113_v34 = vpop.f32.mrf.mxu2  ;;  %v1202_v35 = vpop.f32.mrf.mxu3 }
 0x228   : > { %v1114_v36 = vadd.f32 %v1113_v34, %v4159_v16  ;;  %v1203_v37 = vadd.f32 %v1202_v35, %v4161_v17  ;;  %v938_v31 = vpop.f32.mrf.mxu0  ;;  %v1027_v38 = vpop.f32.mrf.mxu1 }
 0x229   : > { %v939_v39 = vadd.f32 %v938_v31, %v4148_v1  ;;  %v1028_v42 = vadd.f32 %v1027_v38, %v4150_v2  ;;  %v3632_v38 = vld [vmem:[%s3833_s5 + $0x18] sm:$0xff] }
 0x22a   : > { %v2230_v43 = vmax.f32 %v1114_v36, 0.0  ;;  %v2231_v44 = vmax.f32 %v1203_v37, 0.0 }
 0x22b   : > { %v2244_v45 = vmax.f32 %v939_v39, 0.0  ;;  %v2245_v46 = vmax.f32 %v1028_v42, 0.0  ;;  %3426 = vmatmul.msk.bf16.gmra.mxu0 %vm430_vm1, %v3630_v47  ;;  %3442 = vmatmul.msk.bf16.gmra.mxu1 %vm430_vm1, %v3630_v47 }
 0x22c   : > { %v2704_v48 = vadd.f32 %v2703_v27, %v2230_v43  ;;  %v2741_v49 = vadd.f32 %v2740_v28, %v2231_v44  ;;  %3458 = vmatmul.msk.bf16.gmra.mxu2 %vm430_vm1, %v3630_v47  ;;  %3474 = vmatmul.msk.bf16.gmra.mxu3 %vm430_vm1, %v3630_v47 }
 0x22d   : > { %v2631_v52 = vadd.f32 %v2630_v29, %v2244_v45  ;;  %v2668_v53 = vadd.f32 %v2667_v33, %v2245_v46 }
 0x22f   : > { %v1116_v54 = vpop.f32.mrf.mxu2  ;;  %v1205_v55 = vpop.f32.mrf.mxu3 }
 0x230   : > { %v1117_v56 = vadd.f32 %v1116_v54, %v4159_v16  ;;  %v1206_v57 = vadd.f32 %v1205_v55, %v4161_v17  ;;  %v940_v58 = vpop.f32.mrf.mxu0  ;;  %v1029_v59 = vpop.f32.mrf.mxu1 }
 0x231   : > { %v941_v60 = vadd.f32 %v940_v58, %v4148_v1  ;;  %v1030_v40 = vadd.f32 %v1029_v59, %v4150_v2 }
 0x232   : > { %v2246_v24 = vmax.f32 %v1117_v56, 0.0  ;;  %v2247_v41 = vmax.f32 %v1206_v57, 0.0 }
 0x233   : > { %v2260_v61 = vmax.f32 %v941_v60, 0.0  ;;  %v2261_v62 = vmax.f32 %v1030_v40, 0.0  ;;  %v3634_v60 = vld [vmem:[%s3833_s5 + $0x28] sm:$0xff] }
 0x234   : > { %v2705_v63 = vadd.f32 %v2704_v48, %v2246_v24  ;;  %v2742_v0 = vadd.f32 %v2741_v49, %v2247_v41  ;;  %v3633_v49 = vld [vmem:[%s3833_s5 + $0x20] sm:$0xff] }
 0x235   : > { %v2632_v30 = vadd.f32 %v2631_v52, %v2260_v61  ;;  %v2669_v4 = vadd.f32 %v2668_v53, %v2261_v62 }
 0x237   : > { %v1118_v50 = vpop.f32.mrf.mxu2  ;;  %v1207_v51 = vpop.f32.mrf.mxu3 }
 0x238   : > { %v1119_v5 = vadd.f32 %v1118_v50, %v4159_v16  ;;  %v1208_v6 = vadd.f32 %v1207_v51, %v4161_v17  ;;  %v943_v32 = vpop.f32.mrf.mxu0  ;;  %v1032_v7 = vpop.f32.mrf.mxu1 }
 0x239   : > { %v944_v8 = vadd.f32 %v943_v32, %v4148_v1  ;;  %v1033_v9 = vadd.f32 %v1032_v7, %v4150_v2 }
 0x23a   : > { %v2262_v10 = vmax.f32 %v1119_v5, 0.0  ;;  %v2263_v11 = vmax.f32 %v1208_v6, 0.0 }
 0x23b   : > { %v2276_v12 = vmax.f32 %v944_v8, 0.0  ;;  %v2277_v13 = vmax.f32 %v1033_v9, 0.0  ;;  %3427 = vmatmul.msk.bf16.gmra.mxu0 %vm430_vm1, %v3631_v14  ;;  %3443 = vmatmul.msk.bf16.gmra.mxu1 %vm430_vm1, %v3631_v14 }
 0x23c   : > { %v2706_v15 = vadd.f32 %v2705_v63, %v2262_v10  ;;  %v2743_v18 = vadd.f32 %v2742_v0, %v2263_v11  ;;  %3459 = vmatmul.msk.bf16.gmra.mxu2 %vm430_vm1, %v3631_v14  ;;  %3475 = vmatmul.msk.bf16.gmra.mxu3 %vm430_vm1, %v3631_v14 }
 0x23d   : > { %v4302_v19 = vadd.f32 %v2632_v30, %v2276_v12  ;;  %v4304_v20 = vadd.f32 %v2669_v4, %v2277_v13 }
 0x23f   : > { %v1121_v21 = vpop.f32.mrf.mxu2  ;;  %v1210_v22 = vpop.f32.mrf.mxu3 }
 0x240   : > { %v1122_v23 = vadd.f32 %v1121_v21, %v4159_v16  ;;  %v1211_v25 = vadd.f32 %v1210_v22, %v4161_v17  ;;  %v945_v26 = vpop.f32.mrf.mxu0  ;;  %v1034_v27 = vpop.f32.mrf.mxu1 }
 0x241   : > { %v946_v62 = vadd.f32 %v945_v26, %v4148_v1  ;;  %v1035_v63 = vadd.f32 %v1034_v27, %v4150_v2 }
 0x242   : > { %v2278_v28 = vmax.f32 %v1122_v23, 0.0  ;;  %v2279_v29 = vmax.f32 %v1211_v25, 0.0  ;;  %v3635_v25 = vld [vmem:[%s3833_s5 + $0x30] sm:$0xff] }
 0x243   : > { %v2292_v6 = vmax.f32 %v946_v62, 0.0  ;;  %v2293_v32 = vmax.f32 %v1035_v63, 0.0 }
 0x244   : > { %v4308_v33 = vadd.f32 %v2706_v15, %v2278_v28  ;;  %v4310_v34 = vadd.f32 %v2743_v18, %v2279_v29 }
 0x245   : > { %v2634_v26 = vadd.f32 %v4302_v19, %v2292_v6  ;;  %v2671_v27 = vadd.f32 %v4304_v20, %v2293_v32 }
 0x247   : > { %v1123_v35 = vpop.f32.mrf.mxu2  ;;  %v1212_v36 = vpop.f32.mrf.mxu3 }
 0x248   : > { %v948_v37 = vpop.f32.mrf.mxu0  ;;  %v1037_v31 = vpop.f32.mrf.mxu1  ;;  %v1124_v0 = vadd.f32 %v1123_v35, %v4159_v16  ;;  %v1213_v30 = vadd.f32 %v1212_v36, %v4161_v17 }
 0x249   : > { %v949_v4 = vadd.f32 %v948_v37, %v4148_v1  ;;  %v1038_v50 = vadd.f32 %v1037_v31, %v4150_v2 }
 0x24a   : > { %v2294_v7 = vmax.f32 %v1124_v0, 0.0  ;;  %v2295_v13 = vmax.f32 %v1213_v30, 0.0 }
 0x24b   : > { %3428 = vmatmul.msk.bf16.gmra.mxu0 %vm430_vm1, %v3632_v38  ;;  %3444 = vmatmul.msk.bf16.gmra.mxu1 %vm430_vm1, %v3632_v38  ;;  %v2308_v14 = vmax.f32 %v949_v4, 0.0  ;;  %v2309_v15 = vmax.f32 %v1038_v50, 0.0 }
 0x24c   : > { %3460 = vmatmul.msk.bf16.gmra.mxu2 %vm430_vm1, %v3632_v38  ;;  %3476 = vmatmul.msk.bf16.gmra.mxu3 %vm430_vm1, %v3632_v38  ;;  %v2708_v28 = vadd.f32 %v4308_v33, %v2294_v7  ;;  %v2745_v38 = vadd.f32 %v4310_v34, %v2295_v13 }
 0x24f   : > { %v1126_v39 = vpop.f32.mrf.mxu2  ;;  %v1215_v42 = vpop.f32.mrf.mxu3 }
 0x250   : > { %v950_v43 = vpop.f32.mrf.mxu0  ;;  %v1039_v44 = vpop.f32.mrf.mxu1  ;;  %v1127_v8 = vadd.f32 %v1126_v39, %v4159_v16  ;;  %v1216_v11 = vadd.f32 %v1215_v42, %v4161_v17  ;;  %v2635_v39 = vadd.f32 %v2634_v26, %v2308_v14  ;;  %v2672_v42 = vadd.f32 %v2671_v27, %v2309_v15 }
 0x251   : > { %v951_v12 = vadd.f32 %v950_v43, %v4148_v1  ;;  %v1040_v18 = vadd.f32 %v1039_v44, %v4150_v2 }
 0x252   : > { %v2310_v29 = vmax.f32 %v1127_v8, 0.0  ;;  %v2311_v35 = vmax.f32 %v1216_v11, 0.0 }
 0x253   : > { %v2324_v36 = vmax.f32 %v951_v12, 0.0  ;;  %v2325_v19 = vmax.f32 %v1040_v18, 0.0 }
 0x254   : > { %v2746_v62 = vadd.f32 %v2745_v38, %v2311_v35 }
 0x255   : > { %v2636_v63 = vadd.f32 %v2635_v39, %v2324_v36  ;;  %v2673_v4 = vadd.f32 %v2672_v42, %v2325_v19 }
 0x257   : > { %v1128_v45 = vpop.f32.mrf.mxu2  ;;  %v1217_v46 = vpop.f32.mrf.mxu3 }
 0x258   : > { %v953_v47 = vpop.f32.mrf.mxu0  ;;  %v1042_v48 = vpop.f32.mrf.mxu1  ;;  %v1129_v21 = vadd.f32 %v1128_v45, %v4159_v16  ;;  %v1218_v22 = vadd.f32 %v1217_v46, %v4161_v17 }
 0x259   : > { %v954_v23 = vadd.f32 %v953_v47, %v4148_v1  ;;  %v1043_v37 = vadd.f32 %v1042_v48, %v4150_v2  ;;  %v2709_v47 = vadd.f32 %v2708_v28, %v2310_v29 }
 0x25a   : > { %v2326_v43 = vmax.f32 %v1129_v21, 0.0  ;;  %v2327_v20 = vmax.f32 %v1218_v22, 0.0 }
 0x25b   : > { %3429 = vmatmul.msk.bf16.gmra.mxu0 %vm430_vm1, %v3633_v49  ;;  %3445 = vmatmul.msk.bf16.gmra.mxu1 %vm430_vm1, %v3633_v49  ;;  %v2340_v44 = vmax.f32 %v954_v23, 0.0  ;;  %v2341_v0 = vmax.f32 %v1043_v37, 0.0 }
 0x25c   : > { %3461 = vmatmul.msk.bf16.gmra.mxu2 %vm430_vm1, %v3633_v49  ;;  %3477 = vmatmul.msk.bf16.gmra.mxu3 %vm430_vm1, %v3633_v49  ;;  %v2710_v6 = vadd.f32 %v2709_v47, %v2326_v43  ;;  %v2747_v32 = vadd.f32 %v2746_v62, %v2327_v20  ;;  %v3636_v20 = vld [vmem:[%s3833_s5 + $0x38] sm:$0xff] }
 0x25d   : > { %v2674_v12 = vadd.f32 %v2673_v4, %v2341_v0 }
 0x25f   : > { %v1131_v52 = vpop.f32.mrf.mxu2  ;;  %v1220_v53 = vpop.f32.mrf.mxu3 }
 0x260   : > { %v955_v54 = vpop.f32.mrf.mxu0  ;;  %v1044_v55 = vpop.f32.mrf.mxu1  ;;  %v1132_v31 = vadd.f32 %v1131_v52, %v4159_v16  ;;  %v1221_v33 = vadd.f32 %v1220_v53, %v4161_v17 }
 0x261   : > { %v956_v49 = vadd.f32 %v955_v54, %v4148_v1  ;;  %v1045_v48 = vadd.f32 %v1044_v55, %v4150_v2  ;;  %v2637_v54 = vadd.f32 %v2636_v63, %v2340_v44 }
 0x262   : > { %v2342_v30 = vmax.f32 %v1132_v31, 0.0  ;;  %v2343_v7 = vmax.f32 %v1221_v33, 0.0 }
 0x263   : > { %v2356_v55 = vmax.f32 %v956_v49, 0.0  ;;  %v2357_v8 = vmax.f32 %v1045_v48, 0.0 }
 0x264   : > { %v2711_v13 = vadd.f32 %v2710_v6, %v2342_v30  ;;  %v2748_v22 = vadd.f32 %v2747_v32, %v2343_v7 }
 0x265   : > { %v2638_v26 = vadd.f32 %v2637_v54, %v2356_v55  ;;  %v2675_v27 = vadd.f32 %v2674_v12, %v2357_v8 }
 0x267   : > { %v1133_v56 = vpop.f32.mrf.mxu2  ;;  %v4322_v57 = vpop.f32.mrf.mxu3 }
 0x268   : > { %v4324_v58 = vpop.f32.mrf.mxu0  ;;  %v4326_v59 = vpop.f32.mrf.mxu1  ;;  %v1134_v52 = vadd.f32 %v1133_v56, %v4159_v16  ;;  %v1223_v11 = vadd.f32 %v4322_v57, %v4161_v17 }
 0x269   : > { %v959_v53 = vadd.f32 %v4324_v58, %v4148_v1  ;;  %v1048_v50 = vadd.f32 %v4326_v59, %v4150_v2 }
 0x26a   : > { %v2358_v56 = vmax.f32 %v1134_v52, 0.0  ;;  %v2359_v28 = vmax.f32 %v1223_v11, 0.0 }
 0x26b   : > { %3430 = vmatmul.msk.bf16.gmra.mxu0 %vm430_vm1, %v3634_v60  ;;  %3446 = vmatmul.msk.bf16.gmra.mxu1 %vm430_vm1, %v3634_v60  ;;  %v2372_v15 = vmax.f32 %v959_v53, 0.0  ;;  %v2373_v59 = vmax.f32 %v1048_v50, 0.0 }
 0x26c   : > { %3462 = vmatmul.msk.bf16.gmra.mxu2 %vm430_vm1, %v3634_v60  ;;  %3478 = vmatmul.msk.bf16.gmra.mxu3 %vm430_vm1, %v3634_v60  ;;  %v2749_v44 = vadd.f32 %v2748_v22, %v2359_v28  ;;  %v275_v28 = vld [vmem:[#allocation5 + $0x8] sm:$0xff] }
 0x26d   : > { %v2639_v31 = vadd.f32 %v2638_v26, %v2372_v15 }
 0x26f   : > { %v4333_v40 = vpop.f32.mrf.mxu2  ;;  %v4335_v24 = vpop.f32.mrf.mxu3 }
 0x270   : > { %v4337_v41 = vpop.f32.mrf.mxu0  ;;  %v4339_v61 = vpop.f32.mrf.mxu1  ;;  %v1137_v18 = vadd.f32 %v4333_v40, %v4159_v16  ;;  %v1226_v21 = vadd.f32 %v4335_v24, %v4161_v17 }
 0x271   : > { %v961_v14 = vadd.f32 %v4337_v41, %v4148_v1  ;;  %v1050_v58 = vadd.f32 %v4339_v61, %v4150_v2  ;;  %v2712_v61 = vadd.f32 %v2711_v13, %v2358_v56 }
 0x272   : > { %v2374_v38 = vmax.f32 %v1137_v18, 0.0  ;;  %v2375_v39 = vmax.f32 %v1226_v21, 0.0 }
 0x273   : > { %v2388_v40 = vmax.f32 %v961_v14, 0.0  ;;  %v2389_v36 = vmax.f32 %v1050_v58, 0.0 }
 0x274   : > { %v2750_v62 = vadd.f32 %v2749_v44, %v2375_v39 }
 0x275   : > { %v2640_v49 = vadd.f32 %v2639_v31, %v2388_v40 }
 0x277   : > { %v4347_v51 = vpop.f32.mrf.mxu2  ;;  %v4349_v5 = vpop.f32.mrf.mxu3 }
 0x278   : > { %v4352_v9 = vpop.f32.mrf.mxu0  ;;  %v4354_v10 = vpop.f32.mrf.mxu1  ;;  %v1139_v33 = vadd.f32 %v4347_v51, %v4159_v16  ;;  %v1228_v47 = vadd.f32 %v4349_v5, %v4161_v17 }
 0x279   : > { %v964_v57 = vadd.f32 %v4352_v9, %v4148_v1  ;;  %v1053_v23 = vadd.f32 %v4354_v10, %v4150_v2  ;;  %v2676_v9 = vadd.f32 %v2675_v27, %v2373_v59 }
 0x27a   : > { %v2390_v6 = vmax.f32 %v1139_v33, 0.0  ;;  %v2391_v32 = vmax.f32 %v1228_v47, 0.0 }
 0x27b   : > { %3431 = vmatmul.msk.bf16.gmra.mxu0 %vm430_vm1, %v3635_v25  ;;  %3447 = vmatmul.msk.bf16.gmra.mxu1 %vm430_vm1, %v3635_v25  ;;  %v2404_v10 = vmax.f32 %v964_v57, 0.0  ;;  %v2405_v42 = vmax.f32 %v1053_v23, 0.0  ;;  %v2677_v48 = vadd.f32 %v2676_v9, %v2389_v36 }
 0x27c   : > { %3463 = vmatmul.msk.bf16.gmra.mxu2 %vm430_vm1, %v3635_v25  ;;  %3479 = vmatmul.msk.bf16.gmra.mxu3 %vm430_vm1, %v3635_v25  ;;  %v2751_v57 = vadd.f32 %v2750_v62, %v2391_v32 }
 0x27d   : > { %v2641_v51 = vadd.f32 %v2640_v49, %v2404_v10  ;;  %v2678_v30 = vadd.f32 %v2677_v48, %v2405_v42 }
 0x27f   : > { %v4374_v45 = vpop.f32.mrf.mxu2  ;;  %v4376_v46 = vpop.f32.mrf.mxu3 }
 0x280   : > { %v965_v34 = vpop.f32.mrf.mxu0  ;;  %v1054_v60 = vpop.f32.mrf.mxu1  ;;  %v1142_v63 = vadd.f32 %v4374_v45, %v4159_v16  ;;  %v1231_v0 = vadd.f32 %v4376_v46, %v4161_v17 }
 0x281   : > { %v966_v24 = vadd.f32 %v965_v34, %v4148_v1  ;;  %v1055_v37 = vadd.f32 %v1054_v60, %v4150_v2  ;;  %v2713_v60 = vadd.f32 %v2712_v61, %v2374_v38 }
 0x282   : > { %v2406_v12 = vmax.f32 %v1142_v63, 0.0  ;;  %v2407_v13 = vmax.f32 %v1231_v0, 0.0 }
 0x283   : > { %v2420_v52 = vmax.f32 %v966_v24, 0.0  ;;  %v2421_v34 = vmax.f32 %v1055_v37, 0.0  ;;  %v2714_v22 = vadd.f32 %v2713_v60, %v2390_v6 }
 0x285   : > { %v2642_v56 = vadd.f32 %v2641_v51, %v2420_v52  ;;  %v2679_v11 = vadd.f32 %v2678_v30, %v2421_v34  ;;  %v2715_v27 = vadd.f32 %v2714_v22, %v2406_v12  ;;  %v3637_v52 = vld [vmem:[%s3833_s5 + $0x40] sm:$0xff] }
 0x287   : > { %v1143_v25 = vpop.f32.mrf.mxu2  ;;  %v1232_v41 = vpop.f32.mrf.mxu3 }
 0x288   : > { %v968_v29 = vpop.f32.mrf.mxu0  ;;  %v1057_v35 = vpop.f32.mrf.mxu1  ;;  %v1144_v54 = vadd.f32 %v1143_v25, %v4159_v16  ;;  %v1233_v7 = vadd.f32 %v1232_v41, %v4161_v17 }
 0x289   : > { %v969_v19 = vadd.f32 %v968_v29, %v4148_v1  ;;  %v1058_v43 = vadd.f32 %v1057_v35, %v4150_v2 }
 0x28a   : > { %v2422_v23 = vmax.f32 %v1144_v54, 0.0  ;;  %v2423_v25 = vmax.f32 %v1233_v7, 0.0  ;;  %v4437_v54 = vperm.slane %v275_v28, 3 }
 0x28b   : > { %3432 = vmatmul.msk.bf16.gmra.mxu0 %vm430_vm1, %v3636_v20  ;;  %3448 = vmatmul.msk.bf16.gmra.mxu1 %vm430_vm1, %v3636_v20  ;;  %v2436_v4 = vmax.f32 %v969_v19, 0.0  ;;  %v2437_v5 = vmax.f32 %v1058_v43, 0.0  ;;  %v4424_v19 = vperm.slane %v275_v28, 0  ;;  %v4426_v43 = vperm.slane %v275_v28, 1 }
 0x28c   : > { %3464 = vmatmul.msk.bf16.gmra.mxu2 %vm430_vm1, %v3636_v20  ;;  %3480 = vmatmul.msk.bf16.gmra.mxu3 %vm430_vm1, %v3636_v20  ;;  %v2716_v24 = vadd.f32 %v2715_v27, %v2422_v23 }
 0x28d   : > { %v2643_v15 = vadd.f32 %v2642_v56, %v2436_v4  ;;  %v2680_v59 = vadd.f32 %v2679_v11, %v2437_v5  ;;  %v4435_v5 = vperm.slane %v275_v28, 2 }
 0x28f   : > { %v1146_v53 = vpop.f32.mrf.mxu2  ;;  %v1235_v50 = vpop.f32.mrf.mxu3 }
 0x290   : > { %v970_v55 = vpop.f32.mrf.mxu0  ;;  %v1059_v8 = vpop.f32.mrf.mxu1  ;;  %v1147_v14 = vadd.f32 %v1146_v53, %v4159_v16  ;;  %v1236_v58 = vadd.f32 %v1235_v50, %v4161_v17 }
 0x291   : > { %v971_v45 = vadd.f32 %v970_v55, %v4148_v1  ;;  %v1060_v46 = vadd.f32 %v1059_v8, %v4150_v2  ;;  %v2752_v1 = vadd.f32 %v2751_v57, %v2407_v13  ;;  %v3119_v57 = vld [vmem:[#allocation5] sm:$0xff] }
 0x292   : > { %v2438_v61 = vmax.f32 %v1147_v14, 0.0  ;;  %v2439_v2 = vmax.f32 %v1236_v58, 0.0 }
 0x293   : > { %v2452_v18 = vmax.f32 %v971_v45, 0.0  ;;  %v2453_v21 = vmax.f32 %v1060_v46, 0.0  ;;  %v2753_v37 = vadd.f32 %v2752_v1, %v2423_v25 }
 0x294   : > { %v2717_v20 = vadd.f32 %v2716_v24, %v2438_v61 }
 0x295   : > { %v2644_v41 = vadd.f32 %v2643_v15, %v2452_v18  ;;  %v2681_v26 = vadd.f32 %v2680_v59, %v2453_v21  ;;  %v2754_v44 = vadd.f32 %v2753_v37, %v2439_v2  ;;  %v3121_v2 = vmax.f32 %v3119_v57, 0.0 }
 0x297   : > { %v2645_v29 = vrot.slane %v2644_v41, 4  ;;  %v2682_v35 = vrot.slane %v2681_v26, 4  ;;  %v1148_v40 = vpop.f32.mrf.mxu2  ;;  %v1237_v36 = vpop.f32.mrf.mxu3 }
 0x298   : > { %v1149_v31 = vadd.f32 %v1148_v40, %v4159_v16  ;;  %v1238_v9 = vadd.f32 %v1237_v36, %v4161_v17  ;;  %v1249_v38 = vpop.f32.mrf.mxu0  ;;  %v1338_v39 = vpop.f32.mrf.mxu1 }
 0x299   : > { %v2646_v10 = vadd.f32 %v2645_v29, %v2644_v41  ;;  %v2683_v42 = vadd.f32 %v2682_v35, %v2681_v26  ;;  %v1250_v0 = vadd.f32 %v1249_v38, %v4424_v19  ;;  %v1339_v51 = vadd.f32 %v1338_v39, %v4426_v43 }
 0x29a   : > { %v2454_v33 = vmax.f32 %v1149_v31, 0.0  ;;  %v2455_v47 = vmax.f32 %v1238_v9, 0.0 }
 0x29b   : > { %v2647_v49 = vrot.slane %v2646_v10, 2  ;;  %v2684_v48 = vrot.slane %v2683_v42, 2  ;;  %3433 = vmatmul.msk.bf16.gmra.mxu0 %vm430_vm1, %v3637_v52  ;;  %3449 = vmatmul.msk.bf16.gmra.mxu1 %vm430_vm1, %v3637_v52  ;;  %v1960_v13 = vmax.f32 %v1250_v0, 0.0  ;;  %v1961_v14 = vmax.f32 %v1339_v51, 0.0 }
 0x29c   : > { %v2718_v16 = vadd.f32 %v2717_v20, %v2454_v33  ;;  %v2755_v17 = vadd.f32 %v2754_v44, %v2455_v47  ;;  %3465 = vmatmul.msk.bf16.gmra.mxu2 %vm430_vm1, %v3637_v52  ;;  %3481 = vmatmul.msk.bf16.gmra.mxu3 %vm430_vm1, %v3637_v52  ;;  %v3123_v47 = vmul.f32 0.0, %v3121_v2  ;;  %v3638_v52 = vld [vmem:[%s3833_s5 + $0x48] sm:$0xff] }
 0x29d   : > { %v2648_v34 = vadd.f32 %v2647_v49, %v2646_v10  ;;  %v2685_v60 = vadd.f32 %v2684_v48, %v2683_v42 }
 0x29e   : > { %v2719_v62 = vrot.slane %v2718_v16, 4  ;;  %v2756_v63 = vrot.slane %v2755_v17, 4 }
 0x29f   : > { %v2649_v30 = vrot.slane %v2648_v34, 1  ;;  %v2686_v4 = vrot.slane %v2685_v60, 1  ;;  %v1427_v53 = vpop.f32.mrf.mxu2  ;;  %v1516_v50 = vpop.f32.mrf.mxu3 }
 0x2a0   : > { %v2720_v6 = vadd.f32 %v2719_v62, %v2718_v16  ;;  %v2757_v32 = vadd.f32 %v2756_v63, %v2755_v17  ;;  %v1251_v7 = vpop.f32.mrf.mxu0  ;;  %v1340_v55 = vpop.f32.mrf.mxu1  ;;  %v1428_v23 = vadd.f32 %v1427_v53, %v4435_v5  ;;  %v1517_v41 = vadd.f32 %v1516_v50, %v4437_v54 }
 0x2a1   : > { %v2650_v8 = vadd.f32 %v2649_v30, %v2648_v34  ;;  %v2687_v56 = vadd.f32 %v2686_v4, %v2685_v60  ;;  %v1252_v11 = vadd.f32 %v1251_v7, %v4424_v19  ;;  %v1341_v45 = vadd.f32 %v1340_v55, %v4426_v43 }
 0x2a2   : > { %v2721_v46 = vrot.slane %v2720_v6, 2  ;;  %v2758_v12 = vrot.slane %v2757_v32, 2  ;;  %v1962_v9 = vmax.f32 %v1428_v23, 0.0  ;;  %v1963_v38 = vmax.f32 %v1517_v41, 0.0 }
 0x2a3   : > { %v3077_v58 = vrot.slane %v2650_v8, 4  ;;  %v3078_v15 = vrot.slane %v2687_v56, 3  ;;  %v1976_v59 = vmax.f32 %v1252_v11, 0.0  ;;  %v1977_v18 = vmax.f32 %v1341_v45, 0.0 }
 0x2a4   : > { %v2722_v21 = vadd.f32 %v2721_v46, %v2720_v6  ;;  %v2759_v22 = vadd.f32 %v2758_v12, %v2757_v32 }
 0x2a5   : > { %v3095_v25 = vsel %vm3094_vm5, %v3077_v58, %v3078_v15  ;;  %v2762_v26 = vadd.f32 %v1976_v59, %v1960_v13  ;;  %v2799_v27 = vadd.f32 %v1977_v18, %v1961_v14 }
 0x2a6   : > { %v2723_v1 = vrot.slane %v2722_v21, 1  ;;  %v2760_v61 = vrot.slane %v2759_v22, 1 }
 0x2a7   : > { %v1429_v28 = vpop.f32.mrf.mxu2  ;;  %v1518_v29 = vpop.f32.mrf.mxu3 }
 0x2a8   : > { %v2724_v35 = vadd.f32 %v2723_v1, %v2722_v21  ;;  %v2761_v40 = vadd.f32 %v2760_v61, %v2759_v22  ;;  %v1430_v36 = vadd.f32 %v1429_v28, %v4435_v5  ;;  %v1519_v24 = vadd.f32 %v1518_v29, %v4437_v54  ;;  %v1254_v37 = vpop.f32.mrf.mxu0  ;;  %v1343_v31 = vpop.f32.mrf.mxu1  ;;  %v3639_v1 = vld [vmem:[%s3833_s5 + $0x50] sm:$0xff] }
 0x2a9   : > { %v1255_v39 = vadd.f32 %v1254_v37, %v4424_v19  ;;  %v1344_v10 = vadd.f32 %v1343_v31, %v4426_v43 }
 0x2aa   : > { %v3079_v42 = vrot.slane %v2724_v35, 2  ;;  %v3080_v20 = vrot.slane %v2761_v40, 1  ;;  %v1978_v44 = vmax.f32 %v1430_v36, 0.0  ;;  %v1979_v33 = vmax.f32 %v1519_v24, 0.0 }
 0x2ab   : > { %v1992_v49 = vmax.f32 %v1255_v39, 0.0  ;;  %v1993_v48 = vmax.f32 %v1344_v10, 0.0  ;;  %3434 = vmatmul.msk.bf16.gmra.mxu0 %vm430_vm1, %v3638_v52  ;;  %3450 = vmatmul.msk.bf16.gmra.mxu1 %vm430_vm1, %v3638_v52 }
 0x2ac   : > { %v3097_v16 = vsel %vm3096_vm6, %v3079_v42, %v3080_v20  ;;  %v2836_v17 = vadd.f32 %v1978_v44, %v1962_v9  ;;  %v2873_v34 = vadd.f32 %v1979_v33, %v1963_v38  ;;  %3466 = vmatmul.msk.bf16.gmra.mxu2 %vm430_vm1, %v3638_v52  ;;  %3482 = vmatmul.msk.bf16.gmra.mxu3 %vm430_vm1, %v3638_v52 }
 0x2ad   : > { %v3099_v60 = vsel %vm3098_vm7, %v3095_v25, %v3097_v16  ;;  %v2763_v62 = vadd.f32 %v2762_v26, %v1992_v49  ;;  %v2800_v63 = vadd.f32 %v2799_v27, %v1993_v48 }
 0x2ae   : > { %v3100_v0 = vsel %vm479_vm0, %v4179_v3, %v3099_v60 }
 0x2af   : > { %v3125_v51 = vsub.f32 %v3100_v0, %v3123_v47  ;;  %v1432_v30 = vpop.f32.mrf.mxu2  ;;  %v1521_v4 = vpop.f32.mrf.mxu3 }
 0x2b0   : > { %v1433_v53 = vadd.f32 %v1432_v30, %v4435_v5  ;;  %v1522_v50 = vadd.f32 %v1521_v4, %v4437_v54  ;;  %v1256_v6 = vpop.f32.mrf.mxu0  ;;  %v1345_v32 = vpop.f32.mrf.mxu1 }
 0x2b1   : > { %v3127_v7 = vmul.f32 0.00390625, %v3125_v51  ;;  %v1257_v55 = vadd.f32 %v1256_v6, %v4424_v19  ;;  %v1346_v3 = vadd.f32 %v1345_v32, %v4426_v43 }
 0x2b2   : > { %v1994_v8 = vmax.f32 %v1433_v53, 0.0  ;;  %v1995_v56 = vmax.f32 %v1522_v50, 0.0  ;;  %v3640_v53 = vld [vmem:[%s3833_s5 + $0x58] sm:$0xff] }
 0x2b3   : > { %3129 = vst [vmem:[%s4461_s9] sm:$0xff] %v3127_v7  ;;  %v2008_v11 = vmax.f32 %v1257_v55, 0.0  ;;  %v2009_v45 = vmax.f32 %v1346_v3, 0.0 }
 0x2b4   : > { %v2837_v46 = vadd.f32 %v2836_v17, %v1994_v8  ;;  %v2874_v12 = vadd.f32 %v2873_v34, %v1995_v56 }
 0x2b5   : > { %v2764_v13 = vadd.f32 %v2763_v62, %v2008_v11  ;;  %v2801_v14 = vadd.f32 %v2800_v63, %v2009_v45 }
 0x2b7   : > { %v1434_v58 = vpop.f32.mrf.mxu2  ;;  %v1523_v15 = vpop.f32.mrf.mxu3 }
 0x2b8   : > { %v1435_v59 = vadd.f32 %v1434_v58, %v4435_v5  ;;  %v1524_v18 = vadd.f32 %v1523_v15, %v4437_v54  ;;  %v1259_v21 = vpop.f32.mrf.mxu0  ;;  %v1348_v22 = vpop.f32.mrf.mxu1 }
 0x2b9   : > { %v1260_v57 = vadd.f32 %v1259_v21, %v4424_v19  ;;  %v1349_v23 = vadd.f32 %v1348_v22, %v4426_v43 }
 0x2ba   : > { %v2010_v25 = vmax.f32 %v1435_v59, 0.0  ;;  %v2011_v41 = vmax.f32 %v1524_v18, 0.0 }
 0x2bb   : > { %v2024_v26 = vmax.f32 %v1260_v57, 0.0  ;;  %v2025_v27 = vmax.f32 %v1349_v23, 0.0  ;;  %3435 = vmatmul.msk.bf16.gmra.mxu0 %vm430_vm1, %v3639_v1  ;;  %3451 = vmatmul.msk.bf16.gmra.mxu1 %vm430_vm1, %v3639_v1 }
 0x2bc   : > { %v2838_v61 = vadd.f32 %v2837_v46, %v2010_v25  ;;  %v2875_v2 = vadd.f32 %v2874_v12, %v2011_v41  ;;  %3467 = vmatmul.msk.bf16.gmra.mxu2 %vm430_vm1, %v3639_v1  ;;  %3483 = vmatmul.msk.bf16.gmra.mxu3 %vm430_vm1, %v3639_v1 }
 0x2bd   : > { %v2765_v28 = vadd.f32 %v2764_v13, %v2024_v26  ;;  %v2802_v29 = vadd.f32 %v2801_v14, %v2025_v27 }
 0x2bf   : > { %v1437_v35 = vpop.f32.mrf.mxu2  ;;  %v1526_v40 = vpop.f32.mrf.mxu3 }
 0x2c0   : > { %v1438_v36 = vadd.f32 %v1437_v35, %v4435_v5  ;;  %v1527_v24 = vadd.f32 %v1526_v40, %v4437_v54  ;;  %v1261_v37 = vpop.f32.mrf.mxu0  ;;  %v1350_v31 = vpop.f32.mrf.mxu1  ;;  %v3641_v40 = vld [vmem:[%s3833_s5 + $0x60] sm:$0xff] }
 0x2c1   : > { %v1262_v9 = vadd.f32 %v1261_v37, %v4424_v19  ;;  %v1351_v38 = vadd.f32 %v1350_v31, %v4426_v43 }
 0x2c2   : > { %v2026_v39 = vmax.f32 %v1438_v36, 0.0  ;;  %v2027_v10 = vmax.f32 %v1527_v24, 0.0 }
 0x2c3   : > { %v2040_v42 = vmax.f32 %v1262_v9, 0.0  ;;  %v2041_v20 = vmax.f32 %v1351_v38, 0.0 }
 0x2c4   : > { %v2839_v44 = vadd.f32 %v2838_v61, %v2026_v39  ;;  %v2876_v33 = vadd.f32 %v2875_v2, %v2027_v10 }
 0x2c5   : > { %v2766_v47 = vadd.f32 %v2765_v28, %v2040_v42  ;;  %v2803_v49 = vadd.f32 %v2802_v29, %v2041_v20 }
 0x2c7   : > { %v1439_v48 = vpop.f32.mrf.mxu2  ;;  %v1528_v52 = vpop.f32.mrf.mxu3 }
 0x2c8   : > { %v1440_v16 = vadd.f32 %v1439_v48, %v4435_v5  ;;  %v1529_v17 = vadd.f32 %v1528_v52, %v4437_v54  ;;  %v1264_v34 = vpop.f32.mrf.mxu0  ;;  %v1353_v60 = vpop.f32.mrf.mxu1 }
 0x2c9   : > { %v1265_v62 = vadd.f32 %v1264_v34, %v4424_v19  ;;  %v1354_v63 = vadd.f32 %v1353_v60, %v4426_v43 }
 0x2ca   : > { %v2042_v0 = vmax.f32 %v1440_v16, 0.0  ;;  %v2043_v51 = vmax.f32 %v1529_v17, 0.0 }
 0x2cb   : > { %v2056_v30 = vmax.f32 %v1265_v62, 0.0  ;;  %v2057_v4 = vmax.f32 %v1354_v63, 0.0  ;;  %3436 = vmatmul.msk.bf16.gmra.mxu0 %vm430_vm1, %v3640_v53  ;;  %3452 = vmatmul.msk.bf16.gmra.mxu1 %vm430_vm1, %v3640_v53 }
 0x2cc   : > { %v2840_v50 = vadd.f32 %v2839_v44, %v2042_v0  ;;  %v2877_v6 = vadd.f32 %v2876_v33, %v2043_v51  ;;  %3468 = vmatmul.msk.bf16.gmra.mxu2 %vm430_vm1, %v3640_v53  ;;  %3484 = vmatmul.msk.bf16.gmra.mxu3 %vm430_vm1, %v3640_v53 }
 0x2cd   : > { %v2767_v32 = vadd.f32 %v2766_v47, %v2056_v30  ;;  %v2804_v7 = vadd.f32 %v2803_v49, %v2057_v4 }
 0x2cf   : > { %v1442_v55 = vpop.f32.mrf.mxu2  ;;  %v1531_v3 = vpop.f32.mrf.mxu3 }
 0x2d0   : > { %v1443_v8 = vadd.f32 %v1442_v55, %v4435_v5  ;;  %v1532_v56 = vadd.f32 %v1531_v3, %v4437_v54  ;;  %v1266_v11 = vpop.f32.mrf.mxu0  ;;  %v1355_v45 = vpop.f32.mrf.mxu1  ;;  %v3642_v3 = vld [vmem:[%s3833_s5 + $0x68] sm:$0xff] }
 0x2d1   : > { %v1267_v46 = vadd.f32 %v1266_v11, %v4424_v19  ;;  %v1356_v12 = vadd.f32 %v1355_v45, %v4426_v43 }
 0x2d2   : > { %v2058_v13 = vmax.f32 %v1443_v8, 0.0  ;;  %v2059_v14 = vmax.f32 %v1532_v56, 0.0 }
 0x2d3   : > { %v2072_v58 = vmax.f32 %v1267_v46, 0.0  ;;  %v2073_v15 = vmax.f32 %v1356_v12, 0.0 }
 0x2d4   : > { %v2841_v59 = vadd.f32 %v2840_v50, %v2058_v13  ;;  %v2878_v18 = vadd.f32 %v2877_v6, %v2059_v14 }
 0x2d5   : > { %v2768_v21 = vadd.f32 %v2767_v32, %v2072_v58  ;;  %v2805_v22 = vadd.f32 %v2804_v7, %v2073_v15 }
 0x2d7   : > { %v1444_v57 = vpop.f32.mrf.mxu2  ;;  %v1533_v23 = vpop.f32.mrf.mxu3 }
 0x2d8   : > { %v1445_v25 = vadd.f32 %v1444_v57, %v4435_v5  ;;  %v1534_v41 = vadd.f32 %v1533_v23, %v4437_v54  ;;  %v1269_v26 = vpop.f32.mrf.mxu0  ;;  %v1358_v27 = vpop.f32.mrf.mxu1 }
 0x2d9   : > { %v1270_v1 = vadd.f32 %v1269_v26, %v4424_v19  ;;  %v1359_v61 = vadd.f32 %v1358_v27, %v4426_v43 }
 0x2da   : > { %v2074_v2 = vmax.f32 %v1445_v25, 0.0  ;;  %v2075_v28 = vmax.f32 %v1534_v41, 0.0 }
 0x2db   : > { %v2088_v29 = vmax.f32 %v1270_v1, 0.0  ;;  %v2089_v35 = vmax.f32 %v1359_v61, 0.0  ;;  %3437 = vmatmul.msk.bf16.gmra.mxu0 %vm430_vm1, %v3641_v40  ;;  %3453 = vmatmul.msk.bf16.gmra.mxu1 %vm430_vm1, %v3641_v40 }
 0x2dc   : > { %v2842_v36 = vadd.f32 %v2841_v59, %v2074_v2  ;;  %v2879_v24 = vadd.f32 %v2878_v18, %v2075_v28  ;;  %3469 = vmatmul.msk.bf16.gmra.mxu2 %vm430_vm1, %v3641_v40  ;;  %3485 = vmatmul.msk.bf16.gmra.mxu3 %vm430_vm1, %v3641_v40 }
 0x2dd   : > { %v2769_v37 = vadd.f32 %v2768_v21, %v2088_v29  ;;  %v2806_v31 = vadd.f32 %v2805_v22, %v2089_v35 }
 0x2df   : > { %v1447_v9 = vpop.f32.mrf.mxu2  ;;  %v1536_v38 = vpop.f32.mrf.mxu3 }
 0x2e0   : > { %v1448_v39 = vadd.f32 %v1447_v9, %v4435_v5  ;;  %v1537_v10 = vadd.f32 %v1536_v38, %v4437_v54  ;;  %v1271_v42 = vpop.f32.mrf.mxu0  ;;  %v1360_v20 = vpop.f32.mrf.mxu1  ;;  %v3643_v38 = vld [vmem:[%s3833_s5 + $0x70] sm:$0xff] }
 0x2e1   : > { %v1272_v44 = vadd.f32 %v1271_v42, %v4424_v19  ;;  %v1361_v33 = vadd.f32 %v1360_v20, %v4426_v43 }
 0x2e2   : > { %v2090_v47 = vmax.f32 %v1448_v39, 0.0  ;;  %v2091_v49 = vmax.f32 %v1537_v10, 0.0 }
 0x2e3   : > { %v2104_v48 = vmax.f32 %v1272_v44, 0.0  ;;  %v2105_v52 = vmax.f32 %v1361_v33, 0.0 }
 0x2e4   : > { %v2843_v16 = vadd.f32 %v2842_v36, %v2090_v47  ;;  %v2880_v17 = vadd.f32 %v2879_v24, %v2091_v49 }
 0x2e5   : > { %v2770_v34 = vadd.f32 %v2769_v37, %v2104_v48  ;;  %v2807_v60 = vadd.f32 %v2806_v31, %v2105_v52 }
 0x2e7   : > { %v1449_v62 = vpop.f32.mrf.mxu2  ;;  %v1538_v63 = vpop.f32.mrf.mxu3 }
 0x2e8   : > { %v1450_v0 = vadd.f32 %v1449_v62, %v4435_v5  ;;  %v1539_v51 = vadd.f32 %v1538_v63, %v4437_v54  ;;  %v1274_v30 = vpop.f32.mrf.mxu0  ;;  %v1363_v4 = vpop.f32.mrf.mxu1 }
 0x2e9   : > { %v1275_v53 = vadd.f32 %v1274_v30, %v4424_v19  ;;  %v1364_v50 = vadd.f32 %v1363_v4, %v4426_v43 }
 0x2ea   : > { %v2106_v6 = vmax.f32 %v1450_v0, 0.0  ;;  %v2107_v32 = vmax.f32 %v1539_v51, 0.0 }
 0x2eb   : > { %v2120_v7 = vmax.f32 %v1275_v53, 0.0  ;;  %v2121_v55 = vmax.f32 %v1364_v50, 0.0  ;;  %3438 = vmatmul.msk.bf16.gmra.mxu0 %vm430_vm1, %v3642_v3  ;;  %3454 = vmatmul.msk.bf16.gmra.mxu1 %vm430_vm1, %v3642_v3 }
 0x2ec   : > { %v2844_v8 = vadd.f32 %v2843_v16, %v2106_v6  ;;  %v2881_v56 = vadd.f32 %v2880_v17, %v2107_v32  ;;  %3470 = vmatmul.msk.bf16.gmra.mxu2 %vm430_vm1, %v3642_v3  ;;  %3486 = vmatmul.msk.bf16.gmra.mxu3 %vm430_vm1, %v3642_v3 }
 0x2ed   : > { %v2771_v11 = vadd.f32 %v2770_v34, %v2120_v7  ;;  %v2808_v45 = vadd.f32 %v2807_v60, %v2121_v55 }
 0x2ef   : > { %v1452_v46 = vpop.f32.mrf.mxu2  ;;  %v1541_v12 = vpop.f32.mrf.mxu3 }
 0x2f0   : > { %v1453_v13 = vadd.f32 %v1452_v46, %v4435_v5  ;;  %v1542_v14 = vadd.f32 %v1541_v12, %v4437_v54  ;;  %v1276_v58 = vpop.f32.mrf.mxu0  ;;  %v1365_v15 = vpop.f32.mrf.mxu1  ;;  %v3644_v12 = vld [vmem:[%s3833_s5 + $0x78] sm:$0xff] }
 0x2f1   : > { %v1277_v59 = vadd.f32 %v1276_v58, %v4424_v19  ;;  %v1366_v18 = vadd.f32 %v1365_v15, %v4426_v43 }
 0x2f2   : > { %v2122_v21 = vmax.f32 %v1453_v13, 0.0  ;;  %v2123_v22 = vmax.f32 %v1542_v14, 0.0 }
 0x2f3   : > { %v2136_v57 = vmax.f32 %v1277_v59, 0.0  ;;  %v2137_v23 = vmax.f32 %v1366_v18, 0.0 }
 0x2f4   : > { %v2845_v25 = vadd.f32 %v2844_v8, %v2122_v21  ;;  %v2882_v41 = vadd.f32 %v2881_v56, %v2123_v22 }
 0x2f5   : > { %v2772_v26 = vadd.f32 %v2771_v11, %v2136_v57  ;;  %v2809_v27 = vadd.f32 %v2808_v45, %v2137_v23 }
 0x2f7   : > { %v1454_v1 = vpop.f32.mrf.mxu2  ;;  %v1543_v61 = vpop.f32.mrf.mxu3 }
 0x2f8   : > { %v1455_v2 = vadd.f32 %v1454_v1, %v4435_v5  ;;  %v1544_v28 = vadd.f32 %v1543_v61, %v4437_v54  ;;  %v1279_v29 = vpop.f32.mrf.mxu0  ;;  %v1368_v35 = vpop.f32.mrf.mxu1 }
 0x2f9   : > { %v1280_v40 = vadd.f32 %v1279_v29, %v4424_v19  ;;  %v1369_v36 = vadd.f32 %v1368_v35, %v4426_v43 }
 0x2fa   : > { %v2138_v24 = vmax.f32 %v1455_v2, 0.0  ;;  %v2139_v37 = vmax.f32 %v1544_v28, 0.0 }
 0x2fb   : > { %v2152_v31 = vmax.f32 %v1280_v40, 0.0  ;;  %v2153_v9 = vmax.f32 %v1369_v36, 0.0  ;;  %3439 = vmatmul.msk.bf16.gmra.mxu0 %vm430_vm1, %v3643_v38  ;;  %3455 = vmatmul.msk.bf16.gmra.mxu1 %vm430_vm1, %v3643_v38 }
 0x2fc   : > { %v2846_v39 = vadd.f32 %v2845_v25, %v2138_v24  ;;  %v2883_v10 = vadd.f32 %v2882_v41, %v2139_v37  ;;  %3471 = vmatmul.msk.bf16.gmra.mxu2 %vm430_vm1, %v3643_v38  ;;  %3487 = vmatmul.msk.bf16.gmra.mxu3 %vm430_vm1, %v3643_v38 }
 0x2fd   : > { %v2773_v42 = vadd.f32 %v2772_v26, %v2152_v31  ;;  %v2810_v20 = vadd.f32 %v2809_v27, %v2153_v9 }
 0x2ff   : > { %v1457_v44 = vpop.f32.mrf.mxu2  ;;  %v1546_v33 = vpop.f32.mrf.mxu3 }
 0x300   : > { %v1458_v47 = vadd.f32 %v1457_v44, %v4435_v5  ;;  %v1547_v49 = vadd.f32 %v1546_v33, %v4437_v54  ;;  %v1281_v48 = vpop.f32.mrf.mxu0  ;;  %v1370_v52 = vpop.f32.mrf.mxu1  ;;  %v3645_v33 = vld [vmem:[%s3833_s5] sm:$0xff] }
 0x301   : > { %v1282_v16 = vadd.f32 %v1281_v48, %v4424_v19  ;;  %v1371_v17 = vadd.f32 %v1370_v52, %v4426_v43 }
 0x302   : > { %v2154_v34 = vmax.f32 %v1458_v47, 0.0  ;;  %v2155_v60 = vmax.f32 %v1547_v49, 0.0 }
 0x303   : > { %v2168_v62 = vmax.f32 %v1282_v16, 0.0  ;;  %v2169_v63 = vmax.f32 %v1371_v17, 0.0 }
 0x304   : > { %v2847_v0 = vadd.f32 %v2846_v39, %v2154_v34  ;;  %v2884_v51 = vadd.f32 %v2883_v10, %v2155_v60 }
 0x305   : > { %v2774_v30 = vadd.f32 %v2773_v42, %v2168_v62  ;;  %v2811_v4 = vadd.f32 %v2810_v20, %v2169_v63 }
 0x307   : > { %v1459_v53 = vpop.f32.mrf.mxu2  ;;  %v1548_v50 = vpop.f32.mrf.mxu3 }
 0x308   : > { %v1460_v6 = vadd.f32 %v1459_v53, %v4435_v5  ;;  %v1549_v32 = vadd.f32 %v1548_v50, %v4437_v54  ;;  %v1284_v7 = vpop.f32.mrf.mxu0  ;;  %v1373_v55 = vpop.f32.mrf.mxu1 }
 0x309   : > { %v1285_v3 = vadd.f32 %v1284_v7, %v4424_v19  ;;  %v1374_v8 = vadd.f32 %v1373_v55, %v4426_v43 }
 0x30a   : > { %v2170_v56 = vmax.f32 %v1460_v6, 0.0  ;;  %v2171_v11 = vmax.f32 %v1549_v32, 0.0 }
 0x30b   : > { %v2184_v45 = vmax.f32 %v1285_v3, 0.0  ;;  %v2185_v46 = vmax.f32 %v1374_v8, 0.0  ;;  %3440 = vmatmul.msk.bf16.gmra.mxu0 %vm430_vm1, %v3644_v12  ;;  %3456 = vmatmul.msk.bf16.gmra.mxu1 %vm430_vm1, %v3644_v12 }
 0x30c   : > { %v2848_v13 = vadd.f32 %v2847_v0, %v2170_v56  ;;  %v2885_v14 = vadd.f32 %v2884_v51, %v2171_v11  ;;  %3472 = vmatmul.msk.bf16.gmra.mxu2 %vm430_vm1, %v3644_v12  ;;  %3488 = vmatmul.msk.bf16.gmra.mxu3 %vm430_vm1, %v3644_v12 }
 0x30d   : > { %v2775_v58 = vadd.f32 %v2774_v30, %v2184_v45  ;;  %v2812_v15 = vadd.f32 %v2811_v4, %v2185_v46 }
 0x30f   : > { %v1462_v59 = vpop.f32.mrf.mxu2  ;;  %v1551_v18 = vpop.f32.mrf.mxu3 }
 0x310   : > { %v1463_v21 = vadd.f32 %v1462_v59, %v4435_v5  ;;  %v1552_v22 = vadd.f32 %v1551_v18, %v4437_v54  ;;  %v1286_v57 = vpop.f32.mrf.mxu0  ;;  %v1375_v23 = vpop.f32.mrf.mxu1  ;;  %v3646_v18 = vld [vmem:[%s3833_s5 + $0x8] sm:$0xff] }
 0x311   : > { %v1287_v25 = vadd.f32 %v1286_v57, %v4424_v19  ;;  %v1376_v41 = vadd.f32 %v1375_v23, %v4426_v43 }
 0x312   : > { %v2186_v26 = vmax.f32 %v1463_v21, 0.0  ;;  %v2187_v27 = vmax.f32 %v1552_v22, 0.0 }
 0x313   : > { %v2200_v1 = vmax.f32 %v1287_v25, 0.0  ;;  %v2201_v61 = vmax.f32 %v1376_v41, 0.0 }
 0x314   : > { %v2849_v2 = vadd.f32 %v2848_v13, %v2186_v26  ;;  %v2886_v28 = vadd.f32 %v2885_v14, %v2187_v27 }
 0x315   : > { %v2776_v29 = vadd.f32 %v2775_v58, %v2200_v1  ;;  %v2813_v35 = vadd.f32 %v2812_v15, %v2201_v61 }
 0x317   : > { %v1464_v40 = vpop.f32.mrf.mxu2  ;;  %v1553_v36 = vpop.f32.mrf.mxu3 }
 0x318   : > { %v1465_v24 = vadd.f32 %v1464_v40, %v4435_v5  ;;  %v1554_v37 = vadd.f32 %v1553_v36, %v4437_v54  ;;  %v1289_v31 = vpop.f32.mrf.mxu0  ;;  %v1378_v9 = vpop.f32.mrf.mxu1 }
 0x319   : > { %v1290_v38 = vadd.f32 %v1289_v31, %v4424_v19  ;;  %v1379_v39 = vadd.f32 %v1378_v9, %v4426_v43 }
 0x31a   : > { %v2202_v10 = vmax.f32 %v1465_v24, 0.0  ;;  %v2203_v42 = vmax.f32 %v1554_v37, 0.0 }
 0x31b   : > { %v2216_v20 = vmax.f32 %v1290_v38, 0.0  ;;  %v2217_v44 = vmax.f32 %v1379_v39, 0.0  ;;  %3489 = vmatmul.msk.bf16.vlgmr.msrb.gmra.mxu0 %vm430_vm1, %v3645_v33  ;;  %3505 = vmatmul.msk.bf16.vlgmr.msrb.gmra.mxu1 %vm430_vm1, %v3645_v33 }
 0x31c   : > { %v2850_v47 = vadd.f32 %v2849_v2, %v2202_v10  ;;  %v2887_v49 = vadd.f32 %v2886_v28, %v2203_v42  ;;  %3521 = vmatmul.msk.bf16.vlgmr.msrb.gmra.mxu2 %vm430_vm1, %v3645_v33  ;;  %3537 = vmatmul.msk.bf16.vlgmr.msrb.gmra.mxu3 %vm430_vm1, %v3645_v33 }
 0x31d   : > { %v2777_v48 = vadd.f32 %v2776_v29, %v2216_v20  ;;  %v2814_v52 = vadd.f32 %v2813_v35, %v2217_v44 }
 0x31f   : > { %v1467_v16 = vpop.f32.mrf.mxu2  ;;  %v1556_v17 = vpop.f32.mrf.mxu3 }
 0x320   : > { %v1468_v34 = vadd.f32 %v1467_v16, %v4435_v5  ;;  %v1557_v60 = vadd.f32 %v1556_v17, %v4437_v54  ;;  %v1291_v62 = vpop.f32.mrf.mxu0  ;;  %v1380_v63 = vpop.f32.mrf.mxu1  ;;  %v3647_v17 = vld [vmem:[%s3833_s5 + $0x10] sm:$0xff] }
 0x321   : > { %v1292_v0 = vadd.f32 %v1291_v62, %v4424_v19  ;;  %v1381_v51 = vadd.f32 %v1380_v63, %v4426_v43 }
 0x322   : > { %v2218_v30 = vmax.f32 %v1468_v34, 0.0  ;;  %v2219_v4 = vmax.f32 %v1557_v60, 0.0 }
 0x323   : > { %v2232_v53 = vmax.f32 %v1292_v0, 0.0  ;;  %v2233_v50 = vmax.f32 %v1381_v51, 0.0 }
 0x324   : > { %v2851_v6 = vadd.f32 %v2850_v47, %v2218_v30  ;;  %v2888_v32 = vadd.f32 %v2887_v49, %v2219_v4 }
 0x325   : > { %v2778_v7 = vadd.f32 %v2777_v48, %v2232_v53  ;;  %v2815_v55 = vadd.f32 %v2814_v52, %v2233_v50 }
 0x327   : > { %v1469_v3 = vpop.f32.mrf.mxu2  ;;  %v1558_v8 = vpop.f32.mrf.mxu3 }
 0x328   : > { %v1470_v56 = vadd.f32 %v1469_v3, %v4435_v5  ;;  %v1559_v11 = vadd.f32 %v1558_v8, %v4437_v54  ;;  %v1294_v45 = vpop.f32.mrf.mxu0  ;;  %v1383_v46 = vpop.f32.mrf.mxu1 }
 0x329   : > { %v1295_v12 = vadd.f32 %v1294_v45, %v4424_v19  ;;  %v1384_v13 = vadd.f32 %v1383_v46, %v4426_v43 }
 0x32a   : > { %v2234_v14 = vmax.f32 %v1470_v56, 0.0  ;;  %v2235_v58 = vmax.f32 %v1559_v11, 0.0 }
 0x32b   : > { %v2248_v15 = vmax.f32 %v1295_v12, 0.0  ;;  %v2249_v59 = vmax.f32 %v1384_v13, 0.0  ;;  %3490 = vmatmul.msk.bf16.gmra.mxu0 %vm430_vm1, %v3646_v18  ;;  %3506 = vmatmul.msk.bf16.gmra.mxu1 %vm430_vm1, %v3646_v18 }
 0x32c   : > { %v2852_v21 = vadd.f32 %v2851_v6, %v2234_v14  ;;  %v2889_v22 = vadd.f32 %v2888_v32, %v2235_v58  ;;  %3522 = vmatmul.msk.bf16.gmra.mxu2 %vm430_vm1, %v3646_v18  ;;  %3538 = vmatmul.msk.bf16.gmra.mxu3 %vm430_vm1, %v3646_v18 }
 0x32d   : > { %v2779_v57 = vadd.f32 %v2778_v7, %v2248_v15  ;;  %v2816_v23 = vadd.f32 %v2815_v55, %v2249_v59 }
 0x32f   : > { %v1472_v25 = vpop.f32.mrf.mxu2  ;;  %v1561_v41 = vpop.f32.mrf.mxu3 }
 0x330   : > { %v1473_v26 = vadd.f32 %v1472_v25, %v4435_v5  ;;  %v1562_v27 = vadd.f32 %v1561_v41, %v4437_v54  ;;  %v1296_v1 = vpop.f32.mrf.mxu0  ;;  %v1385_v61 = vpop.f32.mrf.mxu1  ;;  %v3648_v41 = vld [vmem:[%s3833_s5 + $0x18] sm:$0xff] }
 0x331   : > { %v1297_v2 = vadd.f32 %v1296_v1, %v4424_v19  ;;  %v1386_v28 = vadd.f32 %v1385_v61, %v4426_v43 }
 0x332   : > { %v2250_v29 = vmax.f32 %v1473_v26, 0.0  ;;  %v2251_v35 = vmax.f32 %v1562_v27, 0.0 }
 0x333   : > { %v2264_v40 = vmax.f32 %v1297_v2, 0.0  ;;  %v2265_v36 = vmax.f32 %v1386_v28, 0.0 }
 0x334   : > { %v2853_v24 = vadd.f32 %v2852_v21, %v2250_v29  ;;  %v2890_v37 = vadd.f32 %v2889_v22, %v2251_v35 }
 0x335   : > { %v2780_v31 = vadd.f32 %v2779_v57, %v2264_v40  ;;  %v2817_v9 = vadd.f32 %v2816_v23, %v2265_v36 }
 0x337   : > { %v1474_v38 = vpop.f32.mrf.mxu2  ;;  %v1563_v39 = vpop.f32.mrf.mxu3 }
 0x338   : > { %v1475_v10 = vadd.f32 %v1474_v38, %v4435_v5  ;;  %v1564_v42 = vadd.f32 %v1563_v39, %v4437_v54  ;;  %v1299_v20 = vpop.f32.mrf.mxu0  ;;  %v1388_v44 = vpop.f32.mrf.mxu1 }
 0x339   : > { %v1300_v33 = vadd.f32 %v1299_v20, %v4424_v19  ;;  %v1389_v47 = vadd.f32 %v1388_v44, %v4426_v43 }
 0x33a   : > { %v2266_v49 = vmax.f32 %v1475_v10, 0.0  ;;  %v2267_v48 = vmax.f32 %v1564_v42, 0.0 }
 0x33b   : > { %v2280_v52 = vmax.f32 %v1300_v33, 0.0  ;;  %v2281_v16 = vmax.f32 %v1389_v47, 0.0  ;;  %3491 = vmatmul.msk.bf16.gmra.mxu0 %vm430_vm1, %v3647_v17  ;;  %3507 = vmatmul.msk.bf16.gmra.mxu1 %vm430_vm1, %v3647_v17 }
 0x33c   : > { %v2854_v34 = vadd.f32 %v2853_v24, %v2266_v49  ;;  %v2891_v60 = vadd.f32 %v2890_v37, %v2267_v48  ;;  %3523 = vmatmul.msk.bf16.gmra.mxu2 %vm430_vm1, %v3647_v17  ;;  %3539 = vmatmul.msk.bf16.gmra.mxu3 %vm430_vm1, %v3647_v17 }
 0x33d   : > { %v2781_v62 = vadd.f32 %v2780_v31, %v2280_v52  ;;  %v2818_v63 = vadd.f32 %v2817_v9, %v2281_v16 }
 0x33f   : > { %v1477_v0 = vpop.f32.mrf.mxu2  ;;  %v1566_v51 = vpop.f32.mrf.mxu3 }
 0x340   : > { %v1478_v30 = vadd.f32 %v1477_v0, %v4435_v5  ;;  %v1567_v4 = vadd.f32 %v1566_v51, %v4437_v54  ;;  %v1301_v53 = vpop.f32.mrf.mxu0  ;;  %v1390_v50 = vpop.f32.mrf.mxu1  ;;  %v3649_v51 = vld [vmem:[%s3833_s5 + $0x20] sm:$0xff] }
 0x341   : > { %v1302_v6 = vadd.f32 %v1301_v53, %v4424_v19  ;;  %v1391_v32 = vadd.f32 %v1390_v50, %v4426_v43 }
 0x342   : > { %v2282_v7 = vmax.f32 %v1478_v30, 0.0  ;;  %v2283_v55 = vmax.f32 %v1567_v4, 0.0 }
 0x343   : > { %v2296_v3 = vmax.f32 %v1302_v6, 0.0  ;;  %v2297_v8 = vmax.f32 %v1391_v32, 0.0 }
 0x344   : > { %v2855_v56 = vadd.f32 %v2854_v34, %v2282_v7  ;;  %v2892_v11 = vadd.f32 %v2891_v60, %v2283_v55 }
 0x345   : > { %v2782_v45 = vadd.f32 %v2781_v62, %v2296_v3  ;;  %v2819_v46 = vadd.f32 %v2818_v63, %v2297_v8 }
 0x347   : > { %v1479_v12 = vpop.f32.mrf.mxu2  ;;  %v1568_v13 = vpop.f32.mrf.mxu3 }
 0x348   : > { %v1480_v14 = vadd.f32 %v1479_v12, %v4435_v5  ;;  %v1569_v58 = vadd.f32 %v1568_v13, %v4437_v54  ;;  %v1304_v15 = vpop.f32.mrf.mxu0  ;;  %v1393_v59 = vpop.f32.mrf.mxu1 }
 0x349   : > { %v1305_v18 = vadd.f32 %v1304_v15, %v4424_v19  ;;  %v1394_v21 = vadd.f32 %v1393_v59, %v4426_v43 }
 0x34a   : > { %v2298_v22 = vmax.f32 %v1480_v14, 0.0  ;;  %v2299_v57 = vmax.f32 %v1569_v58, 0.0 }
 0x34b   : > { %v2312_v23 = vmax.f32 %v1305_v18, 0.0  ;;  %v2313_v25 = vmax.f32 %v1394_v21, 0.0  ;;  %3492 = vmatmul.msk.bf16.gmra.mxu0 %vm430_vm1, %v3648_v41  ;;  %3508 = vmatmul.msk.bf16.gmra.mxu1 %vm430_vm1, %v3648_v41 }
 0x34c   : > { %v2856_v26 = vadd.f32 %v2855_v56, %v2298_v22  ;;  %v2893_v27 = vadd.f32 %v2892_v11, %v2299_v57  ;;  %3524 = vmatmul.msk.bf16.gmra.mxu2 %vm430_vm1, %v3648_v41  ;;  %3540 = vmatmul.msk.bf16.gmra.mxu3 %vm430_vm1, %v3648_v41 }
 0x34d   : > { %v2783_v1 = vadd.f32 %v2782_v45, %v2312_v23  ;;  %v2820_v61 = vadd.f32 %v2819_v46, %v2313_v25 }
 0x34f   : > { %v1482_v2 = vpop.f32.mrf.mxu2  ;;  %v1571_v28 = vpop.f32.mrf.mxu3 }
 0x350   : > { %v1483_v29 = vadd.f32 %v1482_v2, %v4435_v5  ;;  %v1572_v35 = vadd.f32 %v1571_v28, %v4437_v54  ;;  %v1306_v40 = vpop.f32.mrf.mxu0  ;;  %v1395_v36 = vpop.f32.mrf.mxu1  ;;  %v3650_v28 = vld [vmem:[%s3833_s5 + $0x28] sm:$0xff] }
 0x351   : > { %v1307_v24 = vadd.f32 %v1306_v40, %v4424_v19  ;;  %v1396_v37 = vadd.f32 %v1395_v36, %v4426_v43 }
 0x352   : > { %v2314_v31 = vmax.f32 %v1483_v29, 0.0  ;;  %v2315_v9 = vmax.f32 %v1572_v35, 0.0 }
 0x353   : > { %v2328_v38 = vmax.f32 %v1307_v24, 0.0  ;;  %v2329_v39 = vmax.f32 %v1396_v37, 0.0 }
 0x354   : > { %v2857_v10 = vadd.f32 %v2856_v26, %v2314_v31  ;;  %v2894_v42 = vadd.f32 %v2893_v27, %v2315_v9 }
 0x355   : > { %v2784_v20 = vadd.f32 %v2783_v1, %v2328_v38  ;;  %v2821_v44 = vadd.f32 %v2820_v61, %v2329_v39 }
 0x357   : > { %v1484_v33 = vpop.f32.mrf.mxu2  ;;  %v1573_v47 = vpop.f32.mrf.mxu3 }
 0x358   : > { %v1485_v49 = vadd.f32 %v1484_v33, %v4435_v5  ;;  %v1574_v48 = vadd.f32 %v1573_v47, %v4437_v54  ;;  %v1309_v52 = vpop.f32.mrf.mxu0  ;;  %v1398_v16 = vpop.f32.mrf.mxu1 }
 0x359   : > { %v1310_v17 = vadd.f32 %v1309_v52, %v4424_v19  ;;  %v1399_v34 = vadd.f32 %v1398_v16, %v4426_v43 }
 0x35a   : > { %v2330_v60 = vmax.f32 %v1485_v49, 0.0  ;;  %v2331_v62 = vmax.f32 %v1574_v48, 0.0 }
 0x35b   : > { %v2344_v63 = vmax.f32 %v1310_v17, 0.0  ;;  %v2345_v0 = vmax.f32 %v1399_v34, 0.0  ;;  %3493 = vmatmul.msk.bf16.gmra.mxu0 %vm430_vm1, %v3649_v51  ;;  %3509 = vmatmul.msk.bf16.gmra.mxu1 %vm430_vm1, %v3649_v51 }
 0x35c   : > { %v2858_v30 = vadd.f32 %v2857_v10, %v2330_v60  ;;  %v2895_v4 = vadd.f32 %v2894_v42, %v2331_v62  ;;  %3525 = vmatmul.msk.bf16.gmra.mxu2 %vm430_vm1, %v3649_v51  ;;  %3541 = vmatmul.msk.bf16.gmra.mxu3 %vm430_vm1, %v3649_v51 }
 0x35d   : > { %v2785_v53 = vadd.f32 %v2784_v20, %v2344_v63  ;;  %v2822_v50 = vadd.f32 %v2821_v44, %v2345_v0 }
 0x35f   : > { %v1487_v6 = vpop.f32.mrf.mxu2  ;;  %v1576_v32 = vpop.f32.mrf.mxu3 }
 0x360   : > { %v1488_v7 = vadd.f32 %v1487_v6, %v4435_v5  ;;  %v1577_v55 = vadd.f32 %v1576_v32, %v4437_v54  ;;  %v1311_v3 = vpop.f32.mrf.mxu0  ;;  %v1400_v8 = vpop.f32.mrf.mxu1  ;;  %v3651_v32 = vld [vmem:[%s3833_s5 + $0x30] sm:$0xff] }
 0x361   : > { %v1312_v56 = vadd.f32 %v1311_v3, %v4424_v19  ;;  %v1401_v11 = vadd.f32 %v1400_v8, %v4426_v43 }
 0x362   : > { %v2346_v45 = vmax.f32 %v1488_v7, 0.0  ;;  %v2347_v46 = vmax.f32 %v1577_v55, 0.0 }
 0x363   : > { %v2360_v12 = vmax.f32 %v1312_v56, 0.0  ;;  %v2361_v13 = vmax.f32 %v1401_v11, 0.0 }
 0x364   : > { %v2859_v14 = vadd.f32 %v2858_v30, %v2346_v45  ;;  %v2896_v58 = vadd.f32 %v2895_v4, %v2347_v46 }
 0x365   : > { %v2786_v15 = vadd.f32 %v2785_v53, %v2360_v12  ;;  %v2823_v59 = vadd.f32 %v2822_v50, %v2361_v13 }
 0x367   : > { %v1489_v18 = vpop.f32.mrf.mxu2  ;;  %v1578_v21 = vpop.f32.mrf.mxu3 }
 0x368   : > { %v1490_v22 = vadd.f32 %v1489_v18, %v4435_v5  ;;  %v1579_v57 = vadd.f32 %v1578_v21, %v4437_v54  ;;  %v1314_v23 = vpop.f32.mrf.mxu0  ;;  %v1403_v25 = vpop.f32.mrf.mxu1 }
 0x369   : > { %v1315_v41 = vadd.f32 %v1314_v23, %v4424_v19  ;;  %v1404_v26 = vadd.f32 %v1403_v25, %v4426_v43 }
 0x36a   : > { %v2362_v27 = vmax.f32 %v1490_v22, 0.0  ;;  %v2363_v1 = vmax.f32 %v1579_v57, 0.0 }
 0x36b   : > { %v2376_v61 = vmax.f32 %v1315_v41, 0.0  ;;  %v2377_v2 = vmax.f32 %v1404_v26, 0.0  ;;  %3494 = vmatmul.msk.bf16.gmra.mxu0 %vm430_vm1, %v3650_v28  ;;  %3510 = vmatmul.msk.bf16.gmra.mxu1 %vm430_vm1, %v3650_v28 }
 0x36c   : > { %v2860_v29 = vadd.f32 %v2859_v14, %v2362_v27  ;;  %v2897_v35 = vadd.f32 %v2896_v58, %v2363_v1  ;;  %3526 = vmatmul.msk.bf16.gmra.mxu2 %vm430_vm1, %v3650_v28  ;;  %3542 = vmatmul.msk.bf16.gmra.mxu3 %vm430_vm1, %v3650_v28 }
 0x36d   : > { %v2787_v40 = vadd.f32 %v2786_v15, %v2376_v61  ;;  %v2824_v36 = vadd.f32 %v2823_v59, %v2377_v2 }
 0x36f   : > { %v1492_v24 = vpop.f32.mrf.mxu2  ;;  %v1581_v37 = vpop.f32.mrf.mxu3 }
 0x370   : > { %v1493_v31 = vadd.f32 %v1492_v24, %v4435_v5  ;;  %v1582_v9 = vadd.f32 %v1581_v37, %v4437_v54  ;;  %v1316_v38 = vpop.f32.mrf.mxu0  ;;  %v1405_v39 = vpop.f32.mrf.mxu1  ;;  %v3652_v37 = vld [vmem:[%s3833_s5 + $0x38] sm:$0xff] }
 0x371   : > { %v1317_v10 = vadd.f32 %v1316_v38, %v4424_v19  ;;  %v1406_v42 = vadd.f32 %v1405_v39, %v4426_v43 }
 0x372   : > { %v2378_v20 = vmax.f32 %v1493_v31, 0.0  ;;  %v2379_v44 = vmax.f32 %v1582_v9, 0.0 }
 0x373   : > { %v2392_v33 = vmax.f32 %v1317_v10, 0.0  ;;  %v2393_v47 = vmax.f32 %v1406_v42, 0.0 }
 0x374   : > { %v2861_v49 = vadd.f32 %v2860_v29, %v2378_v20  ;;  %v2898_v48 = vadd.f32 %v2897_v35, %v2379_v44 }
 0x375   : > { %v2788_v52 = vadd.f32 %v2787_v40, %v2392_v33  ;;  %v2825_v16 = vadd.f32 %v2824_v36, %v2393_v47 }
 0x377   : > { %v1494_v17 = vpop.f32.mrf.mxu2  ;;  %v1583_v34 = vpop.f32.mrf.mxu3 }
 0x378   : > { %v1495_v60 = vadd.f32 %v1494_v17, %v4435_v5  ;;  %v1584_v62 = vadd.f32 %v1583_v34, %v4437_v54  ;;  %v1319_v63 = vpop.f32.mrf.mxu0  ;;  %v1408_v0 = vpop.f32.mrf.mxu1 }
 0x379   : > { %v1320_v51 = vadd.f32 %v1319_v63, %v4424_v19  ;;  %v1409_v30 = vadd.f32 %v1408_v0, %v4426_v43 }
 0x37a   : > { %v2394_v4 = vmax.f32 %v1495_v60, 0.0  ;;  %v2395_v53 = vmax.f32 %v1584_v62, 0.0 }
 0x37b   : > { %v2408_v50 = vmax.f32 %v1320_v51, 0.0  ;;  %v2409_v6 = vmax.f32 %v1409_v30, 0.0  ;;  %3495 = vmatmul.msk.bf16.gmra.mxu0 %vm430_vm1, %v3651_v32  ;;  %3511 = vmatmul.msk.bf16.gmra.mxu1 %vm430_vm1, %v3651_v32 }
 0x37c   : > { %v2862_v7 = vadd.f32 %v2861_v49, %v2394_v4  ;;  %v2899_v55 = vadd.f32 %v2898_v48, %v2395_v53  ;;  %3527 = vmatmul.msk.bf16.gmra.mxu2 %vm430_vm1, %v3651_v32  ;;  %3543 = vmatmul.msk.bf16.gmra.mxu3 %vm430_vm1, %v3651_v32 }
 0x37d   : > { %v2789_v3 = vadd.f32 %v2788_v52, %v2408_v50  ;;  %v2826_v8 = vadd.f32 %v2825_v16, %v2409_v6 }
 0x37f   : > { %v1497_v56 = vpop.f32.mrf.mxu2  ;;  %v1586_v11 = vpop.f32.mrf.mxu3 }
 0x380   : > { %v1498_v45 = vadd.f32 %v1497_v56, %v4435_v5  ;;  %v1587_v46 = vadd.f32 %v1586_v11, %v4437_v54  ;;  %v1321_v12 = vpop.f32.mrf.mxu0  ;;  %v1410_v13 = vpop.f32.mrf.mxu1 }
 0x381   : > { %v1322_v14 = vadd.f32 %v1321_v12, %v4424_v19  ;;  %v1411_v58 = vadd.f32 %v1410_v13, %v4426_v43  ;;  %v3654_v12 = vld [vmem:[%s3833_s5 + $0x40] sm:$0xff] }
 0x382   : > { %v2410_v15 = vmax.f32 %v1498_v45, 0.0  ;;  %v2411_v59 = vmax.f32 %v1587_v46, 0.0 }
 0x383   : > { %v2424_v18 = vmax.f32 %v1322_v14, 0.0  ;;  %v2425_v21 = vmax.f32 %v1411_v58, 0.0 }
 0x384   : > { %v2863_v22 = vadd.f32 %v2862_v7, %v2410_v15  ;;  %v2900_v57 = vadd.f32 %v2899_v55, %v2411_v59 }
 0x385   : > { %v2790_v23 = vadd.f32 %v2789_v3, %v2424_v18  ;;  %v2827_v25 = vadd.f32 %v2826_v8, %v2425_v21  ;;  %v3653_v8 = vld [vmem:[#allocation5 + $0x8] sm:$0xff] }
 0x386   : > { %v4652_v56 = vperm.slane %v3653_v8, 4  ;;  %v4654_v11 = vperm.slane %v3653_v8, 5 }
 0x387   : > { %v1499_v41 = vpop.f32.mrf.mxu2  ;;  %v1588_v26 = vpop.f32.mrf.mxu3 }
 0x388   : > { %v1500_v27 = vadd.f32 %v1499_v41, %v4435_v5  ;;  %v1589_v1 = vadd.f32 %v1588_v26, %v4437_v54  ;;  %v1324_v61 = vpop.f32.mrf.mxu0  ;;  %v1413_v2 = vpop.f32.mrf.mxu1  ;;  %v4663_v26 = vperm.slane %v3653_v8, 6 }
 0x389   : > { %v1325_v28 = vadd.f32 %v1324_v61, %v4424_v19  ;;  %v1414_v29 = vadd.f32 %v1413_v2, %v4426_v43  ;;  %v4665_v2 = vperm.slane %v3653_v8, 7 }
 0x38a   : > { %v2426_v35 = vmax.f32 %v1500_v27, 0.0  ;;  %v2427_v40 = vmax.f32 %v1589_v1, 0.0 }
 0x38b   : > { %v2440_v36 = vmax.f32 %v1325_v28, 0.0  ;;  %v2441_v24 = vmax.f32 %v1414_v29, 0.0  ;;  %3496 = vmatmul.msk.bf16.gmra.mxu0 %vm430_vm1, %v3652_v37  ;;  %3512 = vmatmul.msk.bf16.gmra.mxu1 %vm430_vm1, %v3652_v37 }
 0x38c   : > { %v2864_v31 = vadd.f32 %v2863_v22, %v2426_v35  ;;  %v2901_v9 = vadd.f32 %v2900_v57, %v2427_v40  ;;  %3528 = vmatmul.msk.bf16.gmra.mxu2 %vm430_vm1, %v3652_v37  ;;  %3544 = vmatmul.msk.bf16.gmra.mxu3 %vm430_vm1, %v3652_v37 }
 0x38d   : > { %v2791_v38 = vadd.f32 %v2790_v23, %v2440_v36  ;;  %v2828_v39 = vadd.f32 %v2827_v25, %v2441_v24 }
 0x38f   : > { %v1502_v10 = vpop.f32.mrf.mxu2  ;;  %v1591_v42 = vpop.f32.mrf.mxu3 }
 0x390   : > { %v1503_v20 = vadd.f32 %v1502_v10, %v4435_v5  ;;  %v1592_v44 = vadd.f32 %v1591_v42, %v4437_v54  ;;  %v1326_v33 = vpop.f32.mrf.mxu0  ;;  %v1415_v47 = vpop.f32.mrf.mxu1 }
 0x391   : > { %v1327_v49 = vadd.f32 %v1326_v33, %v4424_v19  ;;  %v1416_v48 = vadd.f32 %v1415_v47, %v4426_v43 }
 0x392   : > { %v2442_v52 = vmax.f32 %v1503_v20, 0.0  ;;  %v2443_v16 = vmax.f32 %v1592_v44, 0.0 }
 0x393   : > { %v2456_v17 = vmax.f32 %v1327_v49, 0.0  ;;  %v2457_v34 = vmax.f32 %v1416_v48, 0.0 }
 0x394   : > { %v2865_v60 = vadd.f32 %v2864_v31, %v2442_v52  ;;  %v2902_v62 = vadd.f32 %v2901_v9, %v2443_v16 }
 0x395   : > { %v2792_v63 = vadd.f32 %v2791_v38, %v2456_v17  ;;  %v2829_v0 = vadd.f32 %v2828_v39, %v2457_v34 }
 0x397   : > { %v2793_v51 = vrot.slane %v2792_v63, 4  ;;  %v2830_v30 = vrot.slane %v2829_v0, 4  ;;  %v1504_v4 = vpop.f32.mrf.mxu2  ;;  %v1593_v53 = vpop.f32.mrf.mxu3 }
 0x398   : > { %v1505_v50 = vadd.f32 %v1504_v4, %v4435_v5  ;;  %v1594_v6 = vadd.f32 %v1593_v53, %v4437_v54  ;;  %v1605_v19 = vpop.f32.mrf.mxu0  ;;  %v1694_v32 = vpop.f32.mrf.mxu1 }
 0x399   : > { %v2794_v43 = vadd.f32 %v2793_v51, %v2792_v63  ;;  %v2831_v7 = vadd.f32 %v2830_v30, %v2829_v0  ;;  %v1606_v59 = vadd.f32 %v1605_v19, %v4652_v56  ;;  %v1695_v18 = vadd.f32 %v1694_v32, %v4654_v11 }
 0x39a   : > { %v2458_v55 = vmax.f32 %v1505_v50, 0.0  ;;  %v2459_v3 = vmax.f32 %v1594_v6, 0.0 }
 0x39b   : > { %v2795_v45 = vrot.slane %v2794_v43, 2  ;;  %v2832_v46 = vrot.slane %v2831_v7, 2  ;;  %3497 = vmatmul.msk.bf16.gmra.mxu0 %vm430_vm1, %v3654_v12  ;;  %3513 = vmatmul.msk.bf16.gmra.mxu1 %vm430_vm1, %v3654_v12  ;;  %v1964_v36 = vmax.f32 %v1606_v59, 0.0  ;;  %v1965_v24 = vmax.f32 %v1695_v18, 0.0 }
 0x39c   : > { %v2866_v5 = vadd.f32 %v2865_v60, %v2458_v55  ;;  %v2903_v54 = vadd.f32 %v2902_v62, %v2459_v3  ;;  %3529 = vmatmul.msk.bf16.gmra.mxu2 %vm430_vm1, %v3654_v12  ;;  %3545 = vmatmul.msk.bf16.gmra.mxu3 %vm430_vm1, %v3654_v12  ;;  %v3655_v55 = vld [vmem:[%s3833_s5 + $0x48] sm:$0xff] }
 0x39d   : > { %v2796_v13 = vadd.f32 %v2795_v45, %v2794_v43  ;;  %v2833_v14 = vadd.f32 %v2832_v46, %v2831_v7 }
 0x39e   : > { %v2867_v58 = vrot.slane %v2866_v5, 4  ;;  %v2904_v15 = vrot.slane %v2903_v54, 4 }
 0x39f   : > { %v2797_v21 = vrot.slane %v2796_v13, 1  ;;  %v2834_v22 = vrot.slane %v2833_v14, 1  ;;  %v1783_v57 = vpop.f32.mrf.mxu2  ;;  %v1872_v23 = vpop.f32.mrf.mxu3 }
 0x3a0   : > { %v2868_v25 = vadd.f32 %v2867_v58, %v2866_v5  ;;  %v2905_v41 = vadd.f32 %v2904_v15, %v2903_v54  ;;  %v1607_v27 = vpop.f32.mrf.mxu0  ;;  %v1696_v1 = vpop.f32.mrf.mxu1  ;;  %v1784_v42 = vadd.f32 %v1783_v57, %v4663_v26  ;;  %v1873_v44 = vadd.f32 %v1872_v23, %v4665_v2 }
 0x3a1   : > { %v2835_v61 = vadd.f32 %v2834_v22, %v2833_v14  ;;  %v1608_v28 = vadd.f32 %v1607_v27, %v4652_v56  ;;  %v1697_v29 = vadd.f32 %v1696_v1, %v4654_v11  ;;  %v2798_v37 = vadd.f32 %v2797_v21, %v2796_v13 }
 0x3a2   : > { %v2869_v35 = vrot.slane %v2868_v25, 2  ;;  %v2906_v40 = vrot.slane %v2905_v41, 2  ;;  %v1966_v51 = vmax.f32 %v1784_v42, 0.0  ;;  %v1967_v30 = vmax.f32 %v1873_v44, 0.0  ;;  %v3656_v42 = vld [vmem:[%s3833_s5 + $0x50] sm:$0xff] }
 0x3a3   : > { %v3081_v31 = vrot.slane %v2835_v61, 7  ;;  %v1980_v9 = vmax.f32 %v1608_v28, 0.0  ;;  %v1981_v38 = vmax.f32 %v1697_v29, 0.0 }
 0x3a4   : > { %v2870_v39 = vadd.f32 %v2869_v35, %v2868_v25  ;;  %v2907_v10 = vadd.f32 %v2906_v40, %v2905_v41 }
 0x3a5   : > { %v3101_v20 = vsel %vm3088_vm2, %v2798_v37, %v3081_v31  ;;  %v2910_v33 = vadd.f32 %v1980_v9, %v1964_v36  ;;  %v2947_v47 = vadd.f32 %v1981_v38, %v1965_v24 }
 0x3a6   : > { %v2871_v49 = vrot.slane %v2870_v39, 1  ;;  %v2908_v48 = vrot.slane %v2907_v10, 1 }
 0x3a7   : > { %v1785_v52 = vpop.f32.mrf.mxu2  ;;  %v1874_v16 = vpop.f32.mrf.mxu3 }
 0x3a8   : > { %v2872_v17 = vadd.f32 %v2871_v49, %v2870_v39  ;;  %v2909_v34 = vadd.f32 %v2908_v48, %v2907_v10  ;;  %v1786_v60 = vadd.f32 %v1785_v52, %v4663_v26  ;;  %v1875_v62 = vadd.f32 %v1874_v16, %v4665_v2  ;;  %v1610_v63 = vpop.f32.mrf.mxu0  ;;  %v1699_v0 = vpop.f32.mrf.mxu1 }
 0x3a9   : > { %v1611_v4 = vadd.f32 %v1610_v63, %v4652_v56  ;;  %v1700_v53 = vadd.f32 %v1699_v0, %v4654_v11 }
 0x3aa   : > { %v3082_v50 = vrot.slane %v2872_v17, 6  ;;  %v3083_v6 = vrot.slane %v2909_v34, 5  ;;  %v1982_v19 = vmax.f32 %v1786_v60, 0.0  ;;  %v1983_v32 = vmax.f32 %v1875_v62, 0.0 }
 0x3ab   : > { %v1996_v43 = vmax.f32 %v1611_v4, 0.0  ;;  %v1997_v7 = vmax.f32 %v1700_v53, 0.0  ;;  %3498 = vmatmul.msk.bf16.gmra.mxu0 %vm430_vm1, %v3655_v55  ;;  %3514 = vmatmul.msk.bf16.gmra.mxu1 %vm430_vm1, %v3655_v55 }
 0x3ac   : > { %v3102_v3 = vsel %vm3090_vm3, %v3082_v50, %v3083_v6  ;;  %v2984_v8 = vadd.f32 %v1982_v19, %v1966_v51  ;;  %v3021_v45 = vadd.f32 %v1983_v32, %v1967_v30  ;;  %3530 = vmatmul.msk.bf16.gmra.mxu2 %vm430_vm1, %v3655_v55  ;;  %3546 = vmatmul.msk.bf16.gmra.mxu3 %vm430_vm1, %v3655_v55 }
 0x3ad   : > { %v4683_v46 = vsel %vm3092_vm4, %v3101_v20, %v3102_v3  ;;  %v2911_v12 = vadd.f32 %v2910_v33, %v1996_v43  ;;  %v2948_v5 = vadd.f32 %v2947_v47, %v1997_v7 }
 0x3af   : > { %v1788_v54 = vpop.f32.mrf.mxu2  ;;  %v1877_v13 = vpop.f32.mrf.mxu3 }
 0x3b0   : > { %v1789_v14 = vadd.f32 %v1788_v54, %v4663_v26  ;;  %v1878_v58 = vadd.f32 %v1877_v13, %v4665_v2  ;;  %v1612_v15 = vpop.f32.mrf.mxu0  ;;  %v1701_v59 = vpop.f32.mrf.mxu1 }
 0x3b1   : > { %v1613_v18 = vadd.f32 %v1612_v15, %v4652_v56  ;;  %v1702_v21 = vadd.f32 %v1701_v59, %v4654_v11 }
 0x3b2   : > { %v1998_v22 = vmax.f32 %v1789_v14, 0.0  ;;  %v1999_v57 = vmax.f32 %v1878_v58, 0.0  ;;  %v3657_v14 = vld [vmem:[%s3833_s5 + $0x58] sm:$0xff] }
 0x3b3   : > { %v2012_v23 = vmax.f32 %v1613_v18, 0.0  ;;  %v2013_v25 = vmax.f32 %v1702_v21, 0.0 }
 0x3b4   : > { %v2985_v41 = vadd.f32 %v2984_v8, %v1998_v22  ;;  %v3022_v27 = vadd.f32 %v3021_v45, %v1999_v57 }
 0x3b5   : > { %v2912_v1 = vadd.f32 %v2911_v12, %v2012_v23  ;;  %v2949_v61 = vadd.f32 %v2948_v5, %v2013_v25 }
 0x3b7   : > { %v1790_v28 = vpop.f32.mrf.mxu2  ;;  %v1879_v29 = vpop.f32.mrf.mxu3 }
 0x3b8   : > { %v1791_v35 = vadd.f32 %v1790_v28, %v4663_v26  ;;  %v1880_v40 = vadd.f32 %v1879_v29, %v4665_v2  ;;  %v1615_v36 = vpop.f32.mrf.mxu0  ;;  %v1704_v24 = vpop.f32.mrf.mxu1 }
 0x3b9   : > { %v1616_v37 = vadd.f32 %v1615_v36, %v4652_v56  ;;  %v1705_v31 = vadd.f32 %v1704_v24, %v4654_v11 }
 0x3ba   : > { %v2014_v9 = vmax.f32 %v1791_v35, 0.0  ;;  %v2015_v38 = vmax.f32 %v1880_v40, 0.0 }
 0x3bb   : > { %v2028_v39 = vmax.f32 %v1616_v37, 0.0  ;;  %v2029_v10 = vmax.f32 %v1705_v31, 0.0  ;;  %3499 = vmatmul.msk.bf16.gmra.mxu0 %vm430_vm1, %v3656_v42  ;;  %3515 = vmatmul.msk.bf16.gmra.mxu1 %vm430_vm1, %v3656_v42 }
 0x3bc   : > { %v2986_v20 = vadd.f32 %v2985_v41, %v2014_v9  ;;  %v3023_v44 = vadd.f32 %v3022_v27, %v2015_v38  ;;  %3531 = vmatmul.msk.bf16.gmra.mxu2 %vm430_vm1, %v3656_v42  ;;  %3547 = vmatmul.msk.bf16.gmra.mxu3 %vm430_vm1, %v3656_v42 }
 0x3bd   : > { %v2913_v33 = vadd.f32 %v2912_v1, %v2028_v39  ;;  %v2950_v47 = vadd.f32 %v2949_v61, %v2029_v10 }
 0x3bf   : > { %v1793_v49 = vpop.f32.mrf.mxu2  ;;  %v1882_v48 = vpop.f32.mrf.mxu3 }
 0x3c0   : > { %v1794_v52 = vadd.f32 %v1793_v49, %v4663_v26  ;;  %v1883_v16 = vadd.f32 %v1882_v48, %v4665_v2  ;;  %v1617_v17 = vpop.f32.mrf.mxu0  ;;  %v1706_v34 = vpop.f32.mrf.mxu1 }
 0x3c1   : > { %v1618_v60 = vadd.f32 %v1617_v17, %v4652_v56  ;;  %v1707_v62 = vadd.f32 %v1706_v34, %v4654_v11 }
 0x3c2   : > { %v2030_v63 = vmax.f32 %v1794_v52, 0.0  ;;  %v2031_v0 = vmax.f32 %v1883_v16, 0.0  ;;  %v3658_v52 = vld [vmem:[%s3833_s5 + $0x60] sm:$0xff] }
 0x3c3   : > { %v2044_v51 = vmax.f32 %v1618_v60, 0.0  ;;  %v2045_v30 = vmax.f32 %v1707_v62, 0.0 }
 0x3c4   : > { %v2987_v4 = vadd.f32 %v2986_v20, %v2030_v63  ;;  %v3024_v53 = vadd.f32 %v3023_v44, %v2031_v0 }
 0x3c5   : > { %v2914_v50 = vadd.f32 %v2913_v33, %v2044_v51  ;;  %v2951_v6 = vadd.f32 %v2950_v47, %v2045_v30 }
 0x3c7   : > { %v1795_v19 = vpop.f32.mrf.mxu2  ;;  %v1884_v32 = vpop.f32.mrf.mxu3 }
 0x3c8   : > { %v1796_v43 = vadd.f32 %v1795_v19, %v4663_v26  ;;  %v1885_v7 = vadd.f32 %v1884_v32, %v4665_v2  ;;  %v1620_v55 = vpop.f32.mrf.mxu0  ;;  %v1709_v3 = vpop.f32.mrf.mxu1 }
 0x3c9   : > { %v1621_v8 = vadd.f32 %v1620_v55, %v4652_v56  ;;  %v1710_v45 = vadd.f32 %v1709_v3, %v4654_v11 }
 0x3ca   : > { %v2046_v12 = vmax.f32 %v1796_v43, 0.0  ;;  %v2047_v5 = vmax.f32 %v1885_v7, 0.0 }
 0x3cb   : > { %v2060_v54 = vmax.f32 %v1621_v8, 0.0  ;;  %v2061_v13 = vmax.f32 %v1710_v45, 0.0  ;;  %3500 = vmatmul.msk.bf16.gmra.mxu0 %vm430_vm1, %v3657_v14  ;;  %3516 = vmatmul.msk.bf16.gmra.mxu1 %vm430_vm1, %v3657_v14 }
 0x3cc   : > { %v2988_v58 = vadd.f32 %v2987_v4, %v2046_v12  ;;  %v3025_v15 = vadd.f32 %v3024_v53, %v2047_v5  ;;  %3532 = vmatmul.msk.bf16.gmra.mxu2 %vm430_vm1, %v3657_v14  ;;  %3548 = vmatmul.msk.bf16.gmra.mxu3 %vm430_vm1, %v3657_v14 }
 0x3cd   : > { %v2915_v59 = vadd.f32 %v2914_v50, %v2060_v54  ;;  %v2952_v18 = vadd.f32 %v2951_v6, %v2061_v13 }
 0x3cf   : > { %v1798_v21 = vpop.f32.mrf.mxu2  ;;  %v1887_v22 = vpop.f32.mrf.mxu3 }
 0x3d0   : > { %v1799_v57 = vadd.f32 %v1798_v21, %v4663_v26  ;;  %v1888_v23 = vadd.f32 %v1887_v22, %v4665_v2  ;;  %v1622_v25 = vpop.f32.mrf.mxu0  ;;  %v1711_v41 = vpop.f32.mrf.mxu1 }
 0x3d1   : > { %v1623_v27 = vadd.f32 %v1622_v25, %v4652_v56  ;;  %v1712_v1 = vadd.f32 %v1711_v41, %v4654_v11 }
 0x3d2   : > { %v2062_v61 = vmax.f32 %v1799_v57, 0.0  ;;  %v2063_v28 = vmax.f32 %v1888_v23, 0.0  ;;  %v3659_v57 = vld [vmem:[%s3833_s5 + $0x68] sm:$0xff] }
 0x3d3   : > { %v2076_v29 = vmax.f32 %v1623_v27, 0.0  ;;  %v2077_v35 = vmax.f32 %v1712_v1, 0.0 }
 0x3d4   : > { %v2989_v40 = vadd.f32 %v2988_v58, %v2062_v61  ;;  %v3026_v36 = vadd.f32 %v3025_v15, %v2063_v28 }
 0x3d5   : > { %v2916_v24 = vadd.f32 %v2915_v59, %v2076_v29  ;;  %v2953_v37 = vadd.f32 %v2952_v18, %v2077_v35 }
 0x3d7   : > { %v1800_v31 = vpop.f32.mrf.mxu2  ;;  %v1889_v9 = vpop.f32.mrf.mxu3 }
 0x3d8   : > { %v1801_v38 = vadd.f32 %v1800_v31, %v4663_v26  ;;  %v1890_v39 = vadd.f32 %v1889_v9, %v4665_v2  ;;  %v1625_v10 = vpop.f32.mrf.mxu0  ;;  %v1714_v42 = vpop.f32.mrf.mxu1 }
 0x3d9   : > { %v1626_v20 = vadd.f32 %v1625_v10, %v4652_v56  ;;  %v1715_v44 = vadd.f32 %v1714_v42, %v4654_v11 }
 0x3da   : > { %v2078_v33 = vmax.f32 %v1801_v38, 0.0  ;;  %v2079_v47 = vmax.f32 %v1890_v39, 0.0 }
 0x3db   : > { %v2092_v49 = vmax.f32 %v1626_v20, 0.0  ;;  %v2093_v48 = vmax.f32 %v1715_v44, 0.0  ;;  %3501 = vmatmul.msk.bf16.gmra.mxu0 %vm430_vm1, %v3658_v52  ;;  %3517 = vmatmul.msk.bf16.gmra.mxu1 %vm430_vm1, %v3658_v52 }
 0x3dc   : > { %v2990_v16 = vadd.f32 %v2989_v40, %v2078_v33  ;;  %v3027_v17 = vadd.f32 %v3026_v36, %v2079_v47  ;;  %3533 = vmatmul.msk.bf16.gmra.mxu2 %vm430_vm1, %v3658_v52  ;;  %3549 = vmatmul.msk.bf16.gmra.mxu3 %vm430_vm1, %v3658_v52 }
 0x3dd   : > { %v2917_v34 = vadd.f32 %v2916_v24, %v2092_v49  ;;  %v2954_v60 = vadd.f32 %v2953_v37, %v2093_v48 }
 0x3df   : > { %v1803_v62 = vpop.f32.mrf.mxu2  ;;  %v1892_v63 = vpop.f32.mrf.mxu3 }
 0x3e0   : > { %v1804_v0 = vadd.f32 %v1803_v62, %v4663_v26  ;;  %v1893_v51 = vadd.f32 %v1892_v63, %v4665_v2  ;;  %v1627_v30 = vpop.f32.mrf.mxu0  ;;  %v1716_v4 = vpop.f32.mrf.mxu1 }
 0x3e1   : > { %v1628_v53 = vadd.f32 %v1627_v30, %v4652_v56  ;;  %v1717_v50 = vadd.f32 %v1716_v4, %v4654_v11 }
 0x3e2   : > { %v2094_v6 = vmax.f32 %v1804_v0, 0.0  ;;  %v2095_v19 = vmax.f32 %v1893_v51, 0.0  ;;  %v3660_v0 = vld [vmem:[%s3833_s5 + $0x70] sm:$0xff] }
 0x3e3   : > { %v2108_v32 = vmax.f32 %v1628_v53, 0.0  ;;  %v2109_v43 = vmax.f32 %v1717_v50, 0.0 }
 0x3e4   : > { %v2991_v7 = vadd.f32 %v2990_v16, %v2094_v6  ;;  %v3028_v55 = vadd.f32 %v3027_v17, %v2095_v19 }
 0x3e5   : > { %v2918_v3 = vadd.f32 %v2917_v34, %v2108_v32  ;;  %v2955_v8 = vadd.f32 %v2954_v60, %v2109_v43 }
 0x3e7   : > { %v1805_v45 = vpop.f32.mrf.mxu2  ;;  %v1894_v12 = vpop.f32.mrf.mxu3 }
 0x3e8   : > { %v1806_v5 = vadd.f32 %v1805_v45, %v4663_v26  ;;  %v1895_v54 = vadd.f32 %v1894_v12, %v4665_v2  ;;  %v1630_v13 = vpop.f32.mrf.mxu0  ;;  %v1719_v14 = vpop.f32.mrf.mxu1 }
 0x3e9   : > { %v1631_v58 = vadd.f32 %v1630_v13, %v4652_v56  ;;  %v1720_v15 = vadd.f32 %v1719_v14, %v4654_v11 }
 0x3ea   : > { %v2110_v59 = vmax.f32 %v1806_v5, 0.0  ;;  %v2111_v18 = vmax.f32 %v1895_v54, 0.0 }
 0x3eb   : > { %v2124_v21 = vmax.f32 %v1631_v58, 0.0  ;;  %v2125_v22 = vmax.f32 %v1720_v15, 0.0  ;;  %3502 = vmatmul.msk.bf16.gmra.mxu0 %vm430_vm1, %v3659_v57  ;;  %3518 = vmatmul.msk.bf16.gmra.mxu1 %vm430_vm1, %v3659_v57 }
 0x3ec   : > { %v2992_v23 = vadd.f32 %v2991_v7, %v2110_v59  ;;  %v3029_v25 = vadd.f32 %v3028_v55, %v2111_v18  ;;  %3534 = vmatmul.msk.bf16.gmra.mxu2 %vm430_vm1, %v3659_v57  ;;  %3550 = vmatmul.msk.bf16.gmra.mxu3 %vm430_vm1, %v3659_v57 }
 0x3ed   : > { %v2919_v41 = vadd.f32 %v2918_v3, %v2124_v21  ;;  %v2956_v27 = vadd.f32 %v2955_v8, %v2125_v22 }
 0x3ef   : > { %v1808_v1 = vpop.f32.mrf.mxu2  ;;  %v1897_v61 = vpop.f32.mrf.mxu3 }
 0x3f0   : > { %v1809_v28 = vadd.f32 %v1808_v1, %v4663_v26  ;;  %v1898_v29 = vadd.f32 %v1897_v61, %v4665_v2  ;;  %v1632_v35 = vpop.f32.mrf.mxu0  ;;  %v1721_v40 = vpop.f32.mrf.mxu1 }
 0x3f1   : > { %v1633_v36 = vadd.f32 %v1632_v35, %v4652_v56  ;;  %v1722_v24 = vadd.f32 %v1721_v40, %v4654_v11 }
 0x3f2   : > { %v2126_v37 = vmax.f32 %v1809_v28, 0.0  ;;  %v2127_v31 = vmax.f32 %v1898_v29, 0.0  ;;  %v3661_v28 = vld [vmem:[%s3833_s5 + $0x78] sm:$0xff] }
 0x3f3   : > { %v2140_v9 = vmax.f32 %v1633_v36, 0.0  ;;  %v2141_v38 = vmax.f32 %v1722_v24, 0.0 }
 0x3f4   : > { %v2993_v39 = vadd.f32 %v2992_v23, %v2126_v37  ;;  %v3030_v10 = vadd.f32 %v3029_v25, %v2127_v31 }
 0x3f5   : > { %v2920_v42 = vadd.f32 %v2919_v41, %v2140_v9  ;;  %v2957_v20 = vadd.f32 %v2956_v27, %v2141_v38 }
 0x3f7   : > { %v1810_v44 = vpop.f32.mrf.mxu2  ;;  %v1899_v33 = vpop.f32.mrf.mxu3 }
 0x3f8   : > { %v1811_v47 = vadd.f32 %v1810_v44, %v4663_v26  ;;  %v1900_v49 = vadd.f32 %v1899_v33, %v4665_v2  ;;  %v1635_v48 = vpop.f32.mrf.mxu0  ;;  %v1724_v52 = vpop.f32.mrf.mxu1 }
 0x3f9   : > { %v1636_v16 = vadd.f32 %v1635_v48, %v4652_v56  ;;  %v1725_v17 = vadd.f32 %v1724_v52, %v4654_v11 }
 0x3fa   : > { %v2142_v34 = vmax.f32 %v1811_v47, 0.0  ;;  %v2143_v60 = vmax.f32 %v1900_v49, 0.0 }
 0x3fb   : > { %v2156_v62 = vmax.f32 %v1636_v16, 0.0  ;;  %v2157_v63 = vmax.f32 %v1725_v17, 0.0  ;;  %3503 = vmatmul.msk.bf16.gmra.mxu0 %vm430_vm1, %v3660_v0  ;;  %3519 = vmatmul.msk.bf16.gmra.mxu1 %vm430_vm1, %v3660_v0 }
 0x3fc   : > { %v2994_v51 = vadd.f32 %v2993_v39, %v2142_v34  ;;  %v3031_v30 = vadd.f32 %v3030_v10, %v2143_v60  ;;  %3535 = vmatmul.msk.bf16.gmra.mxu2 %vm430_vm1, %v3660_v0  ;;  %3551 = vmatmul.msk.bf16.gmra.mxu3 %vm430_vm1, %v3660_v0 }
 0x3fd   : > { %v2921_v4 = vadd.f32 %v2920_v42, %v2156_v62  ;;  %v2958_v53 = vadd.f32 %v2957_v20, %v2157_v63 }
 0x3ff   : > { %v1813_v50 = vpop.f32.mrf.mxu2  ;;  %v1902_v6 = vpop.f32.mrf.mxu3 }
 0x400   : > { %v1814_v19 = vadd.f32 %v1813_v50, %v4663_v26  ;;  %v1903_v32 = vadd.f32 %v1902_v6, %v4665_v2  ;;  %v1637_v43 = vpop.f32.mrf.mxu0  ;;  %v1726_v7 = vpop.f32.mrf.mxu1 }
 0x401   : > { %v1638_v55 = vadd.f32 %v1637_v43, %v4652_v56  ;;  %v1727_v3 = vadd.f32 %v1726_v7, %v4654_v11 }
 0x402   : > { %v2158_v8 = vmax.f32 %v1814_v19, 0.0  ;;  %v2159_v45 = vmax.f32 %v1903_v32, 0.0 }
 0x403   : > { %v2172_v12 = vmax.f32 %v1638_v55, 0.0  ;;  %v2173_v5 = vmax.f32 %v1727_v3, 0.0 }
 0x404   : > { %v2995_v54 = vadd.f32 %v2994_v51, %v2158_v8  ;;  %v3032_v13 = vadd.f32 %v3031_v30, %v2159_v45 }
 0x405   : > { %v2922_v14 = vadd.f32 %v2921_v4, %v2172_v12  ;;  %v2959_v58 = vadd.f32 %v2958_v53, %v2173_v5 }
 0x407   : > { %v1815_v15 = vpop.f32.mrf.mxu2  ;;  %v1904_v59 = vpop.f32.mrf.mxu3 }
 0x408   : > { %v1816_v18 = vadd.f32 %v1815_v15, %v4663_v26  ;;  %v1905_v21 = vadd.f32 %v1904_v59, %v4665_v2  ;;  %v1640_v22 = vpop.f32.mrf.mxu0  ;;  %v1729_v57 = vpop.f32.mrf.mxu1 }
 0x409   : > { %v1641_v23 = vadd.f32 %v1640_v22, %v4652_v56  ;;  %v1730_v25 = vadd.f32 %v1729_v57, %v4654_v11 }
 0x40a   : > { %v2174_v41 = vmax.f32 %v1816_v18, 0.0  ;;  %v2175_v27 = vmax.f32 %v1905_v21, 0.0 }
 0x40b   : > { %v2188_v1 = vmax.f32 %v1641_v23, 0.0  ;;  %v2189_v61 = vmax.f32 %v1730_v25, 0.0  ;;  %3504 = vmatmul.msk.bf16.gmra.mxu0 %vm430_vm1, %v3661_v28  ;;  %3520 = vmatmul.msk.bf16.gmra.mxu1 %vm430_vm1, %v3661_v28 }
 0x40c   : > { %v2996_v29 = vadd.f32 %v2995_v54, %v2174_v41  ;;  %v3033_v35 = vadd.f32 %v3032_v13, %v2175_v27  ;;  %3536 = vmatmul.msk.bf16.gmra.mxu2 %vm430_vm1, %v3661_v28  ;;  %3552 = vmatmul.msk.bf16.gmra.mxu3 %vm430_vm1, %v3661_v28 }
 0x40d   : > { %v2923_v40 = vadd.f32 %v2922_v14, %v2188_v1  ;;  %v2960_v36 = vadd.f32 %v2959_v58, %v2189_v61 }
 0x40f   : > { %v1818_v24 = vpop.f32.mrf.mxu2  ;;  %v1907_v37 = vpop.f32.mrf.mxu3 }
 0x410   : > { %v1819_v31 = vadd.f32 %v1818_v24, %v4663_v26  ;;  %v1908_v9 = vadd.f32 %v1907_v37, %v4665_v2  ;;  %v1642_v38 = vpop.f32.mrf.mxu0  ;;  %v1731_v39 = vpop.f32.mrf.mxu1 }
 0x411   : > { %v1643_v10 = vadd.f32 %v1642_v38, %v4652_v56  ;;  %v1732_v42 = vadd.f32 %v1731_v39, %v4654_v11 }
 0x412   : > { %v2190_v20 = vmax.f32 %v1819_v31, 0.0  ;;  %v2191_v44 = vmax.f32 %v1908_v9, 0.0 }
 0x413   : > { %v2204_v33 = vmax.f32 %v1643_v10, 0.0  ;;  %v2205_v47 = vmax.f32 %v1732_v42, 0.0 }
 0x414   : > { %v2997_v49 = vadd.f32 %v2996_v29, %v2190_v20  ;;  %v3034_v48 = vadd.f32 %v3033_v35, %v2191_v44 }
 0x415   : > { %v2924_v52 = vadd.f32 %v2923_v40, %v2204_v33  ;;  %v2961_v16 = vadd.f32 %v2960_v36, %v2205_v47 }
 0x417   : > { %v1820_v17 = vpop.f32.mrf.mxu2  ;;  %v1909_v34 = vpop.f32.mrf.mxu3 }
 0x418   : > { %v1821_v60 = vadd.f32 %v1820_v17, %v4663_v26  ;;  %v1910_v62 = vadd.f32 %v1909_v34, %v4665_v2  ;;  %v1645_v63 = vpop.f32.mrf.mxu0  ;;  %v1734_v0 = vpop.f32.mrf.mxu1 }
 0x419   : > { %v1646_v51 = vadd.f32 %v1645_v63, %v4652_v56  ;;  %v1735_v30 = vadd.f32 %v1734_v0, %v4654_v11 }
 0x41a   : > { %v2206_v4 = vmax.f32 %v1821_v60, 0.0  ;;  %v2207_v53 = vmax.f32 %v1910_v62, 0.0 }
 0x41b   : > { %v2220_v50 = vmax.f32 %v1646_v51, 0.0  ;;  %v2221_v6 = vmax.f32 %v1735_v30, 0.0 }
 0x41c   : > { %v2998_v19 = vadd.f32 %v2997_v49, %v2206_v4  ;;  %v3035_v32 = vadd.f32 %v3034_v48, %v2207_v53 }
 0x41d   : > { %v2925_v43 = vadd.f32 %v2924_v52, %v2220_v50  ;;  %v2962_v7 = vadd.f32 %v2961_v16, %v2221_v6 }
 0x41f   : > { %v1823_v55 = vpop.f32.mrf.mxu2  ;;  %v1912_v3 = vpop.f32.mrf.mxu3 }
 0x420   : > { %v1824_v8 = vadd.f32 %v1823_v55, %v4663_v26  ;;  %v1913_v45 = vadd.f32 %v1912_v3, %v4665_v2  ;;  %v1647_v12 = vpop.f32.mrf.mxu0  ;;  %v1736_v5 = vpop.f32.mrf.mxu1 }
 0x421   : > { %v1648_v54 = vadd.f32 %v1647_v12, %v4652_v56  ;;  %v1737_v13 = vadd.f32 %v1736_v5, %v4654_v11 }
 0x422   : > { %v2222_v14 = vmax.f32 %v1824_v8, 0.0  ;;  %v2223_v58 = vmax.f32 %v1913_v45, 0.0 }
 0x423   : > { %v2236_v15 = vmax.f32 %v1648_v54, 0.0  ;;  %v2237_v59 = vmax.f32 %v1737_v13, 0.0 }
 0x424   : > { %v2999_v18 = vadd.f32 %v2998_v19, %v2222_v14  ;;  %v3036_v21 = vadd.f32 %v3035_v32, %v2223_v58 }
 0x425   : > { %v2926_v22 = vadd.f32 %v2925_v43, %v2236_v15  ;;  %v2963_v57 = vadd.f32 %v2962_v7, %v2237_v59 }
 0x427   : > { %v1825_v23 = vpop.f32.mrf.mxu2  ;;  %v1914_v25 = vpop.f32.mrf.mxu3 }
 0x428   : > { %v1826_v41 = vadd.f32 %v1825_v23, %v4663_v26  ;;  %v1915_v27 = vadd.f32 %v1914_v25, %v4665_v2  ;;  %v1650_v1 = vpop.f32.mrf.mxu0  ;;  %v1739_v61 = vpop.f32.mrf.mxu1 }
 0x429   : > { %v1651_v28 = vadd.f32 %v1650_v1, %v4652_v56  ;;  %v1740_v29 = vadd.f32 %v1739_v61, %v4654_v11 }
 0x42a   : > { %v2238_v35 = vmax.f32 %v1826_v41, 0.0  ;;  %v2239_v40 = vmax.f32 %v1915_v27, 0.0 }
 0x42b   : > { %v2252_v36 = vmax.f32 %v1651_v28, 0.0  ;;  %v2253_v24 = vmax.f32 %v1740_v29, 0.0 }
 0x42c   : > { %v3000_v37 = vadd.f32 %v2999_v18, %v2238_v35  ;;  %v3037_v31 = vadd.f32 %v3036_v21, %v2239_v40 }
 0x42d   : > { %v2927_v9 = vadd.f32 %v2926_v22, %v2252_v36  ;;  %v2964_v38 = vadd.f32 %v2963_v57, %v2253_v24 }
 0x42f   : > { %v1828_v39 = vpop.f32.mrf.mxu2  ;;  %v1917_v10 = vpop.f32.mrf.mxu3 }
 0x430   : > { %v1829_v42 = vadd.f32 %v1828_v39, %v4663_v26  ;;  %v1918_v20 = vadd.f32 %v1917_v10, %v4665_v2  ;;  %v1652_v44 = vpop.f32.mrf.mxu0  ;;  %v1741_v33 = vpop.f32.mrf.mxu1 }
 0x431   : > { %v1653_v47 = vadd.f32 %v1652_v44, %v4652_v56  ;;  %v1742_v49 = vadd.f32 %v1741_v33, %v4654_v11 }
 0x432   : > { %v2254_v48 = vmax.f32 %v1829_v42, 0.0  ;;  %v2255_v52 = vmax.f32 %v1918_v20, 0.0 }
 0x433   : > { %v2268_v16 = vmax.f32 %v1653_v47, 0.0  ;;  %v2269_v17 = vmax.f32 %v1742_v49, 0.0 }
 0x434   : > { %v3001_v34 = vadd.f32 %v3000_v37, %v2254_v48  ;;  %v3038_v60 = vadd.f32 %v3037_v31, %v2255_v52 }
 0x435   : > { %v2928_v62 = vadd.f32 %v2927_v9, %v2268_v16  ;;  %v2965_v63 = vadd.f32 %v2964_v38, %v2269_v17 }
 0x437   : > { %v1830_v0 = vpop.f32.mrf.mxu2  ;;  %v1919_v51 = vpop.f32.mrf.mxu3 }
 0x438   : > { %v1831_v30 = vadd.f32 %v1830_v0, %v4663_v26  ;;  %v1920_v4 = vadd.f32 %v1919_v51, %v4665_v2  ;;  %v1655_v53 = vpop.f32.mrf.mxu0  ;;  %v1744_v50 = vpop.f32.mrf.mxu1 }
 0x439   : > { %v1656_v6 = vadd.f32 %v1655_v53, %v4652_v56  ;;  %v1745_v19 = vadd.f32 %v1744_v50, %v4654_v11 }
 0x43a   : > { %v2270_v32 = vmax.f32 %v1831_v30, 0.0  ;;  %v2271_v43 = vmax.f32 %v1920_v4, 0.0 }
 0x43b   : > { %v2284_v7 = vmax.f32 %v1656_v6, 0.0  ;;  %v2285_v55 = vmax.f32 %v1745_v19, 0.0 }
 0x43c   : > { %v3002_v3 = vadd.f32 %v3001_v34, %v2270_v32  ;;  %v3039_v8 = vadd.f32 %v3038_v60, %v2271_v43 }
 0x43d   : > { %v2929_v45 = vadd.f32 %v2928_v62, %v2284_v7  ;;  %v2966_v12 = vadd.f32 %v2965_v63, %v2285_v55 }
 0x43f   : > { %v1833_v5 = vpop.f32.mrf.mxu2  ;;  %v1922_v54 = vpop.f32.mrf.mxu3 }
 0x440   : > { %v1834_v13 = vadd.f32 %v1833_v5, %v4663_v26  ;;  %v1923_v14 = vadd.f32 %v1922_v54, %v4665_v2  ;;  %v1657_v58 = vpop.f32.mrf.mxu0  ;;  %v1746_v15 = vpop.f32.mrf.mxu1 }
 0x441   : > { %v1658_v49 = vadd.f32 %v1657_v58, %v4652_v56  ;;  %v1747_v48 = vadd.f32 %v1746_v15, %v4654_v11 }
 0x442   : > { %v2286_v59 = vmax.f32 %v1834_v13, 0.0  ;;  %v2287_v18 = vmax.f32 %v1923_v14, 0.0 }
 0x443   : > { %v2300_v60 = vmax.f32 %v1658_v49, 0.0  ;;  %v2301_v62 = vmax.f32 %v1747_v48, 0.0 }
 0x444   : > { %v3003_v21 = vadd.f32 %v3002_v3, %v2286_v59  ;;  %v3040_v22 = vadd.f32 %v3039_v8, %v2287_v18 }
 0x445   : > { %v2930_v55 = vadd.f32 %v2929_v45, %v2300_v60  ;;  %v2967_v3 = vadd.f32 %v2966_v12, %v2301_v62 }
 0x447   : > { %v1835_v57 = vpop.f32.mrf.mxu2  ;;  %v1924_v23 = vpop.f32.mrf.mxu3 }
 0x448   : > { %v1660_v25 = vpop.f32.mrf.mxu0  ;;  %v1749_v41 = vpop.f32.mrf.mxu1  ;;  %v1836_v52 = vadd.f32 %v1835_v57, %v4663_v26  ;;  %v1925_v16 = vadd.f32 %v1924_v23, %v4665_v2 }
 0x449   : > { %v1661_v63 = vadd.f32 %v1660_v25, %v4652_v56  ;;  %v1750_v0 = vadd.f32 %v1749_v41, %v4654_v11 }
 0x44a   : > { %v2302_v50 = vmax.f32 %v1836_v52, 0.0  ;;  %v2303_v6 = vmax.f32 %v1925_v16, 0.0 }
 0x44b   : > { %v2316_v8 = vmax.f32 %v1661_v63, 0.0  ;;  %v2317_v5 = vmax.f32 %v1750_v0, 0.0 }
 0x44c   : > { %v3004_v15 = vadd.f32 %v3003_v21, %v2302_v50  ;;  %v3041_v59 = vadd.f32 %v3040_v22, %v2303_v6 }
 0x44f   : > { %v1838_v27 = vpop.f32.mrf.mxu2  ;;  %v1927_v1 = vpop.f32.mrf.mxu3 }
 0x450   : > { %v1662_v61 = vpop.f32.mrf.mxu0  ;;  %v1751_v28 = vpop.f32.mrf.mxu1  ;;  %v1839_v4 = vadd.f32 %v1838_v27, %v4663_v26  ;;  %v1928_v53 = vadd.f32 %v1927_v1, %v4665_v2  ;;  %v2931_v1 = vadd.f32 %v2930_v55, %v2316_v8 }
 0x451   : > { %v1663_v19 = vadd.f32 %v1662_v61, %v4652_v56  ;;  %v1752_v32 = vadd.f32 %v1751_v28, %v4654_v11  ;;  %v2968_v61 = vadd.f32 %v2967_v3, %v2317_v5 }
 0x452   : > { %v2318_v54 = vmax.f32 %v1839_v4, 0.0  ;;  %v2319_v13 = vmax.f32 %v1928_v53, 0.0 }
 0x453   : > { %v2332_v18 = vmax.f32 %v1663_v19, 0.0  ;;  %v2333_v57 = vmax.f32 %v1752_v32, 0.0 }
 0x455   : > { %v2932_v48 = vadd.f32 %v2931_v1, %v2332_v18 }
 0x457   : > { %v1840_v29 = vpop.f32.mrf.mxu2  ;;  %v1929_v35 = vpop.f32.mrf.mxu3 }
 0x458   : > { %v1665_v40 = vpop.f32.mrf.mxu0  ;;  %v1754_v36 = vpop.f32.mrf.mxu1  ;;  %v1841_v43 = vadd.f32 %v1840_v29, %v4663_v26  ;;  %v1930_v7 = vadd.f32 %v1929_v35, %v4665_v2  ;;  %v3005_v35 = vadd.f32 %v3004_v15, %v2318_v54 }
 0x459   : > { %v1666_v14 = vadd.f32 %v1665_v40, %v4652_v56  ;;  %v1755_v58 = vadd.f32 %v1754_v36, %v4654_v11  ;;  %v3042_v40 = vadd.f32 %v3041_v59, %v2319_v13 }
 0x45a   : > { %v2334_v23 = vmax.f32 %v1841_v43, 0.0  ;;  %v2335_v25 = vmax.f32 %v1930_v7, 0.0 }
 0x45b   : > { %v2348_v36 = vmax.f32 %v1666_v14, 0.0  ;;  %v2349_v49 = vmax.f32 %v1755_v58, 0.0 }
 0x45c   : > { %v3006_v16 = vadd.f32 %v3005_v35, %v2334_v23  ;;  %v3043_v60 = vadd.f32 %v3042_v40, %v2335_v25 }
 0x45d   : > { %v2933_v53 = vadd.f32 %v2932_v48, %v2348_v36 }
 0x45f   : > { %v1843_v24 = vpop.f32.mrf.mxu2  ;;  %v1932_v37 = vpop.f32.mrf.mxu3 }
 0x460   : > { %v1667_v31 = vpop.f32.mrf.mxu0  ;;  %v1756_v9 = vpop.f32.mrf.mxu1  ;;  %v1844_v41 = vadd.f32 %v1843_v24, %v4663_v26  ;;  %v1933_v27 = vadd.f32 %v1932_v37, %v4665_v2  ;;  %v2969_v24 = vadd.f32 %v2968_v61, %v2333_v57 }
 0x461   : > { %v1668_v28 = vadd.f32 %v1667_v31, %v4652_v56  ;;  %v1757_v29 = vadd.f32 %v1756_v9, %v4654_v11 }
 0x462   : > { %v2350_v62 = vmax.f32 %v1844_v41, 0.0  ;;  %v2351_v63 = vmax.f32 %v1933_v27, 0.0  ;;  %v2970_v50 = vadd.f32 %v2969_v24, %v2349_v49 }
 0x463   : > { %v2364_v0 = vmax.f32 %v1668_v28, 0.0  ;;  %v2365_v31 = vmax.f32 %v1757_v29, 0.0 }
 0x464   : > { %v3044_v7 = vadd.f32 %v3043_v60, %v2351_v63 }
 0x465   : > { %v2971_v5 = vadd.f32 %v2970_v50, %v2365_v31 }
 0x467   : > { %v4789_v38 = vpop.f32.mrf.mxu2  ;;  %v4791_v39 = vpop.f32.mrf.mxu3 }
 0x468   : > { %v1670_v10 = vpop.f32.mrf.mxu0  ;;  %v1759_v42 = vpop.f32.mrf.mxu1  ;;  %v1846_v9 = vadd.f32 %v4789_v38, %v4663_v26  ;;  %v1935_v4 = vadd.f32 %v4791_v39, %v4665_v2  ;;  %v3007_v38 = vadd.f32 %v3006_v16, %v2350_v62 }
 0x469   : > { %v1671_v37 = vadd.f32 %v1670_v10, %v4652_v56  ;;  %v1760_v52 = vadd.f32 %v1759_v42, %v4654_v11 }
 0x46a   : > { %v2366_v54 = vmax.f32 %v1846_v9, 0.0 }
 0x46b   : > { %v2380_v42 = vmax.f32 %v1671_v37, 0.0  ;;  %v2381_v19 = vmax.f32 %v1760_v52, 0.0 }
 0x46c   : > { %v3008_v27 = vadd.f32 %v3007_v38, %v2366_v54 }
 0x46d   : > { %v2972_v18 = vadd.f32 %v2971_v5, %v2381_v19 }
 0x46f   : > { %v4793_v20 = vpop.f32.mrf.mxu2  ;;  %v4795_v44 = vpop.f32.mrf.mxu3 }
 0x470   : > { %v4797_v33 = vpop.f32.mrf.mxu0  ;;  %v4799_v47 = vpop.f32.mrf.mxu1  ;;  %v1849_v32 = vadd.f32 %v4793_v20, %v4663_v26  ;;  %v1938_v43 = vadd.f32 %v4795_v44, %v4665_v2 }
 0x471   : > { %v1673_v6 = vadd.f32 %v4797_v33, %v4652_v56  ;;  %v1762_v10 = vadd.f32 %v4799_v47, %v4654_v11  ;;  %v2934_v33 = vadd.f32 %v2933_v53, %v2364_v0  ;;  %v2367_v47 = vmax.f32 %v1935_v4, 0.0 }
 0x472   : > { %v2382_v57 = vmax.f32 %v1849_v32, 0.0 }
 0x473   : > { %v2396_v58 = vmax.f32 %v1673_v6, 0.0  ;;  %v2397_v15 = vmax.f32 %v1762_v10, 0.0  ;;  %v2935_v59 = vadd.f32 %v2934_v33, %v2380_v42  ;;  %v3045_v1 = vadd.f32 %v3044_v7, %v2367_v47 }
 0x474   : > { %v3009_v40 = vadd.f32 %v3008_v27, %v2382_v57 }
 0x475   : > { %v2936_v29 = vadd.f32 %v2935_v59, %v2396_v58 }
 0x477   : > { %v4805_v17 = vpop.f32.mrf.mxu2  ;;  %v4807_v34 = vpop.f32.mrf.mxu3 }
 0x478   : > { %v1675_v51 = vpop.f32.mrf.mxu0  ;;  %v1764_v30 = vpop.f32.mrf.mxu1  ;;  %v1851_v61 = vadd.f32 %v4805_v17, %v4663_v26  ;;  %v1940_v28 = vadd.f32 %v4807_v34, %v4665_v2 }
 0x479   : > { %v1676_v39 = vadd.f32 %v1675_v51, %v4652_v56  ;;  %v1765_v55 = vadd.f32 %v1764_v30, %v4654_v11  ;;  %v2383_v51 = vmax.f32 %v1938_v43, 0.0 }
 0x47a   : > { %v2398_v62 = vmax.f32 %v1851_v61, 0.0  ;;  %v2399_v34 = vmax.f32 %v1940_v28, 0.0 }
 0x47b   : > { %v2412_v23 = vmax.f32 %v1676_v39, 0.0  ;;  %v2413_v30 = vmax.f32 %v1765_v55, 0.0  ;;  %v3046_v36 = vadd.f32 %v3045_v1, %v2383_v51 }
 0x47c   : > { %v3010_v7 = vadd.f32 %v3009_v40, %v2398_v62 }
 0x47d   : > { %v2937_v24 = vadd.f32 %v2936_v29, %v2412_v23  ;;  %v3047_v39 = vadd.f32 %v3046_v36, %v2399_v34 }
 0x47f   : > { %v4821_v45 = vpop.f32.mrf.mxu2  ;;  %v4823_v12 = vpop.f32.mrf.mxu3 }
 0x480   : > { %v1677_v21 = vpop.f32.mrf.mxu0  ;;  %v1766_v22 = vpop.f32.mrf.mxu1  ;;  %v1854_v49 = vadd.f32 %v4821_v45, %v4663_v26  ;;  %v1943_v48 = vadd.f32 %v4823_v12, %v4665_v2 }
 0x481   : > { %v1678_v20 = vadd.f32 %v1677_v21, %v4652_v56  ;;  %v1767_v44 = vadd.f32 %v1766_v22, %v4654_v11  ;;  %v2973_v21 = vadd.f32 %v2972_v18, %v2397_v15 }
 0x482   : > { %v2414_v50 = vmax.f32 %v1854_v49, 0.0  ;;  %v2415_v6 = vmax.f32 %v1943_v48, 0.0 }
 0x483   : > { %v2428_v22 = vmax.f32 %v1678_v20, 0.0  ;;  %v2429_v35 = vmax.f32 %v1767_v44, 0.0  ;;  %v2974_v37 = vadd.f32 %v2973_v21, %v2413_v30 }
 0x484   : > { %v3011_v5 = vadd.f32 %v3010_v7, %v2414_v50 }
 0x485   : > { %v2938_v4 = vadd.f32 %v2937_v24, %v2428_v22  ;;  %v2975_v53 = vadd.f32 %v2974_v37, %v2429_v35 }
 0x487   : > { %v1855_v3 = vpop.f32.mrf.mxu2  ;;  %v1944_v8 = vpop.f32.mrf.mxu3 }
 0x488   : > { %v1680_v13 = vpop.f32.mrf.mxu0  ;;  %v1769_v14 = vpop.f32.mrf.mxu1  ;;  %v1856_v63 = vadd.f32 %v1855_v3, %v4663_v26  ;;  %v1945_v0 = vadd.f32 %v1944_v8, %v4665_v2 }
 0x489   : > { %v1681_v25 = vadd.f32 %v1680_v13, %v4652_v56  ;;  %v1770_v41 = vadd.f32 %v1769_v14, %v4654_v11 }
 0x48a   : > { %v2430_v55 = vmax.f32 %v1856_v63, 0.0  ;;  %v2431_v3 = vmax.f32 %v1945_v0, 0.0 }
 0x48b   : > { %v2444_v52 = vmax.f32 %v1681_v25, 0.0  ;;  %v2445_v16 = vmax.f32 %v1770_v41, 0.0 }
 0x48c   : > { %v3012_v15 = vadd.f32 %v3011_v5, %v2430_v55 }
 0x48d   : > { %v2939_v19 = vadd.f32 %v2938_v4, %v2444_v52  ;;  %v2976_v32 = vadd.f32 %v2975_v53, %v2445_v16 }
 0x48f   : > { %v1858_v17 = vpop.f32.mrf.mxu2  ;;  %v1947_v60 = vpop.f32.mrf.mxu3 }
 0x490   : > { %v1682_v31 = vpop.f32.mrf.mxu0  ;;  %v1771_v9 = vpop.f32.mrf.mxu1  ;;  %v1859_v10 = vadd.f32 %v1858_v17, %v4663_v26  ;;  %v1948_v42 = vadd.f32 %v1947_v60, %v4665_v2  ;;  %v3120_v60 = vld [vmem:[#allocation5 + $0x8] sm:$0xff] }
 0x491   : > { %v1683_v45 = vadd.f32 %v1682_v31, %v4652_v56  ;;  %v1772_v12 = vadd.f32 %v1771_v9, %v4654_v11  ;;  %v3048_v56 = vadd.f32 %v3047_v39, %v2415_v6  ;;  %v3122_v0 = vmax.f32 %v3120_v60, 0.0 }
 0x492   : > { %v2446_v54 = vmax.f32 %v1859_v10, 0.0  ;;  %v2447_v11 = vmax.f32 %v1948_v42, 0.0 }
 0x493   : > { %v2460_v43 = vmax.f32 %v1683_v45, 0.0  ;;  %v2461_v38 = vmax.f32 %v1772_v12, 0.0  ;;  %v3049_v20 = vadd.f32 %v3048_v56, %v2431_v3  ;;  %v3124_v45 = vmul.f32 0.0, %v3122_v0 }
 0x494   : > { %v3013_v51 = vadd.f32 %v3012_v15, %v2446_v54 }
 0x495   : > { %v2940_v8 = vadd.f32 %v2939_v19, %v2460_v43  ;;  %v2977_v33 = vadd.f32 %v2976_v32, %v2461_v38  ;;  %v3050_v23 = vadd.f32 %v3049_v20, %v2447_v11 }
 0x497   : > { %v2941_v47 = vrot.slane %v2940_v8, 4  ;;  %v2978_v13 = vrot.slane %v2977_v33, 4  ;;  %v1860_v14 = vpop.f32.mrf.mxu2  ;;  %v1949_v58 = vpop.f32.mrf.mxu3 }
 0x498   : > { %v1861_v44 = vadd.f32 %v1860_v14, %v4663_v26  ;;  %v1950_v59 = vadd.f32 %v1949_v58, %v4665_v2 }
 0x499   : > { %v2942_v18 = vadd.f32 %v2941_v47, %v2940_v8  ;;  %v2979_v57 = vadd.f32 %v2978_v13, %v2977_v33 }
 0x49a   : > { %v2462_v30 = vmax.f32 %v1861_v44, 0.0  ;;  %v2463_v25 = vmax.f32 %v1950_v59, 0.0 }
 0x49b   : > { %v2943_v41 = vrot.slane %v2942_v18, 2  ;;  %v2980_v27 = vrot.slane %v2979_v57, 2 }
 0x49c   : > { %v3014_v1 = vadd.f32 %v3013_v51, %v2462_v30  ;;  %v3051_v61 = vadd.f32 %v3050_v23, %v2463_v25 }
 0x49d   : > { %v2944_v28 = vadd.f32 %v2943_v41, %v2942_v18  ;;  %v2981_v29 = vadd.f32 %v2980_v27, %v2979_v57 }
 0x49e   : > { %v3015_v21 = vrot.slane %v3014_v1, 4  ;;  %v3052_v22 = vrot.slane %v3051_v61, 4 }
 0x49f   : > { %v2945_v35 = vrot.slane %v2944_v28, 1  ;;  %v2982_v40 = vrot.slane %v2981_v29, 1 }
 0x4a0   : > { %v3016_v36 = vadd.f32 %v3015_v21, %v3014_v1  ;;  %v3053_v26 = vadd.f32 %v3052_v22, %v3051_v61 }
 0x4a1   : > { %v2946_v49 = vadd.f32 %v2945_v35, %v2944_v28  ;;  %v2983_v2 = vadd.f32 %v2982_v40, %v2981_v29 }
 0x4a2   : > { %v3017_v48 = vrot.slane %v3016_v36, 2  ;;  %v3054_v24 = vrot.slane %v3053_v26, 2 }
 0x4a3   : > { %v3084_v37 = vrot.slane %v2946_v49, 4  ;;  %v3085_v52 = vrot.slane %v2983_v2, 3 }
 0x4a4   : > { %v3018_v16 = vadd.f32 %v3017_v48, %v3016_v36  ;;  %v3055_v17 = vadd.f32 %v3054_v24, %v3053_v26 }
 0x4a5   : > { %v3104_v62 = vsel %vm3094_vm5, %v3084_v37, %v3085_v52 }
 0x4a6   : > { %v3019_v34 = vrot.slane %v3018_v16, 1  ;;  %v3056_v63 = vrot.slane %v3055_v17, 1 }
 0x4a8   : > { %v3020_v31 = vadd.f32 %v3019_v34, %v3018_v16  ;;  %v3057_v9 = vadd.f32 %v3056_v63, %v3055_v17 }
 0x4aa   : > { %v3086_v4 = vrot.slane %v3020_v31, 2  ;;  %v3087_v53 = vrot.slane %v3057_v9, 1 }
 0x4ac   : > { %v3105_v12 = vsel %vm3096_vm6, %v3086_v4, %v3087_v53 }
 0x4ad   : > { %v3106_v50 = vsel %vm3098_vm7, %v3104_v62, %v3105_v12 }
 0x4ae   : > { %v3107_v6 = vsel %vm479_vm0, %v4683_v46, %v3106_v50 }
 0x4af   : > { %v3126_v10 = vsub.f32 %v3107_v6, %v3124_v45 }
 0x4b1   : > { %v3128_v42 = vmul.f32 0.00390625, %v3126_v10 }
 0x4b3   : > { %3130 = vst [vmem:[%s4461_s9 + $0x8] sm:$0xff] %v3128_v42 }
 0x4b4 PF: > { %s15_s14 = sadd.s32 1, %s3752_s14   ;;  %s4884_s12 = smov %s3748_s13 }
 0x4b5   : > { %p12_p8 = scmp.ge.s32.totalorder %s15_s14, 4   ;;  %s4885_s13 = smov %s4887_s16 }
 0x4b7   :  { %14 = sbr.rel (!%p12_p8) target bundleno = 3 (0x3), region = 79 }
 0x4bc   :  { %3150 = vsyncpa [#allocation4], 1 }
 0x4bd   :  { %3152 = vsyncpa [#allocation4 + $0x1], 1 }
 0x4be   :  { %3153 = vsyncpa [#allocation6], 1 }

// kernel: object_detection_forward.3
= control target key start
LH: loop header
LB: loop body
LE: loop exit
PB: predicated region body
PF: predicated region fallthrough
CT: control target
= control target key end

     0   :  { %10 = vsyncpa [#allocation3], 0  ;;  %s1586_s0 = inlined_call_operand.vmem [shape: f32[2,2048], index: 0, kind: input, shape index: {}]   ;;  %s1587_s1 = inlined_call_operand.hbm [shape: f32[2048,256], index: 1, kind: input, shape index: {}]   ;;  %s1588_s2 = inlined_call_operand.hbm [shape: f32[1,256], index: 2, kind: input, shape index: {}]   ;;  %s1589_s3 = inlined_call_operand.hbm [shape: f32[256,128], index: 3, kind: input, shape index: {}]   ;;  %s1590_s4 = inlined_call_operand.hbm [shape: f32[1,128], index: 4, kind: input, shape index: {}]   ;;  %s1591_s5 = inlined_call_operand.vmem [shape: f32[2,128], index: 5, kind: output, shape index: {}]  }
   0x1   :  { %11 = vsyncpa [#allocation5], 0  ;;  %s33_s20 = sshll.u32 %s1588_s2, 4  ;;  %s34_s20 = int_to_ptr.hbm [resolvable:$true] %s33_s20 }
   0x2   :  { %12 = vsyncpa [#allocation8], 0  ;;  %s1485_s21 = smov [#allocation4]   ;;  %s19_s25 = sshll.u32 %s1587_s1, 4  ;;  %s20_s25 = int_to_ptr.hbm [resolvable:$true] %s19_s25 }
   0x3   :  { %s35_s22 = sshll.u32 %s1485_s21, 4  ;;  %s1486_s26 = smov [#allocation2]   ;;  %s36_s22 = int_to_ptr.vmem [resolvable:$true] %s35_s22 }
   0x4   :  { %38 = dma.hbm_to_vmem [thread:$0]  %s34_s20, 32, %s36_s22, [#allocation5]  }
   0x5   :  { %s21_s27 = sshll.u32 %s1486_s26, 4  ;;  %s1487_s28 = smov 256   ;;  %s22_s27 = int_to_ptr.vmem [resolvable:$true] %s21_s27 }
   0x6   :  { %s1488_s29 = smov 16   ;;  %s43_s2 = sshll.u32 %s1589_s3, 4  ;;  %s44_s2 = int_to_ptr.hbm [resolvable:$true] %s43_s2 }
   0x7   :  { %27 = dma.hbm_to_vmem [thread:$0]  %s20_s25, 65536, %s22_s27, [#allocation3], %s1487_s28, %s1487_s28, %s1488_s29  }
   0x8   :  { %s1489_s7 = smov [#allocation6]   ;;  %s57_s1 = sshll.u32 %s1590_s4, 4  ;;  %s58_s1 = int_to_ptr.hbm [resolvable:$true] %s57_s1 }
   0x9   :  { %s45_s8 = sshll.u32 %s1489_s7, 4  ;;  %s1490_s11 = smov 128   ;;  %s46_s8 = int_to_ptr.vmem [resolvable:$true] %s45_s8 }
   0xa   :  { %s1491_s12 = smov 8   ;;  %s1492_s13 = smov [#allocation7]  }
   0xb   :  { %51 = dma.hbm_to_vmem [thread:$0]  %s44_s2, 4096, %s46_s8, [#allocation5], %s1490_s11, %s1490_s11, %s1491_s12  }
   0xc   :  { %s59_s14 = sshll.u32 %s1492_s13, 4  ;;  %s60_s14 = int_to_ptr.vmem [resolvable:$true] %s59_s14 }
   0xd   :  { %62 = dma.hbm_to_vmem [thread:$0]  %s58_s1, 16, %s60_s14, [#allocation8]  }
   0xe   :  { %1479 = dma.done.wait [#allocation3], 65536  }
   0xf   :  { %1480 = vsyncadd [#allocation3], 4294901760 }
  0x10   :  { %1481 = dma.done.wait [#allocation5], 4128  }
  0x11   :  { %1482 = vsyncadd [#allocation5], 4294963168 }
  0x12   :  { %1483 = dma.done.wait [#allocation8], 16  }
  0x13   :  { %1484 = vsyncadd [#allocation8], 4294967280  ;;  %v113_v0 = vld [vmem:[#allocation2 + $0xf0] sm:$0xff]  ;;  %v111_v2 = vld [vmem:[#allocation2 + $0xe0] sm:$0xff] }
  0x14   :  { %v177_v1 = vld [vmem:[#allocation2 + $0x2f0] sm:$0xff]  ;;  %642 = vmatpush.msra.mxu0 %v113_v0  ;;  %v175_v4 = vld [vmem:[#allocation2 + $0x2e0] sm:$0xff] }
  0x15   :  { %682 = vmatpush.msra.mxu2 %v177_v1  ;;  %v145_v3 = vld [vmem:[#allocation2 + $0x1f0] sm:$0xff]  ;;  %v143_v7 = vld [vmem:[#allocation2 + $0x1e0] sm:$0xff] }
  0x16   :  { %v209_v5 = vld [vmem:[#allocation2 + $0x3f0] sm:$0xff]  ;;  %662 = vmatpush.msra.mxu1 %v145_v3  ;;  %643 = vmatpush.msra.mxu0 %v111_v2  ;;  %v207_v9 = vld [vmem:[#allocation2 + $0x3e0] sm:$0xff] }
  0x17   :  { %702 = vmatpush.msra.mxu3 %v209_v5  ;;  %v109_v6 = vld [vmem:[#allocation2 + $0xd0] sm:$0xff]  ;;  %683 = vmatpush.msra.mxu2 %v175_v4  ;;  %v107_v11 = vld [vmem:[#allocation2 + $0xc0] sm:$0xff] }
  0x18   :  { %v173_v8 = vld [vmem:[#allocation2 + $0x2d0] sm:$0xff]  ;;  %663 = vmatpush.msra.mxu1 %v143_v7  ;;  %v171_v12 = vld [vmem:[#allocation2 + $0x2c0] sm:$0xff]  ;;  %644 = vmatpush.msra.mxu0 %v109_v6 }
  0x19   :  { %v141_v10 = vld [vmem:[#allocation2 + $0x1d0] sm:$0xff]  ;;  %703 = vmatpush.msra.mxu3 %v207_v9  ;;  %684 = vmatpush.msra.mxu2 %v173_v8  ;;  %v139_v14 = vld [vmem:[#allocation2 + $0x1c0] sm:$0xff] }
  0x1a   :  { %v205_v13 = vld [vmem:[#allocation2 + $0x3d0] sm:$0xff]  ;;  %v203_v15 = vld [vmem:[#allocation2 + $0x3c0] sm:$0xff]  ;;  %664 = vmatpush.msra.mxu1 %v141_v10  ;;  %645 = vmatpush.msra.mxu0 %v107_v11 }
  0x1b   :  { %704 = vmatpush.msra.mxu3 %v205_v13  ;;  %v105_v16 = vld [vmem:[#allocation2 + $0xb0] sm:$0xff]  ;;  %685 = vmatpush.msra.mxu2 %v171_v12  ;;  %v103_v20 = vld [vmem:[#allocation2 + $0xa0] sm:$0xff] }
  0x1c   :  { %v169_v17 = vld [vmem:[#allocation2 + $0x2b0] sm:$0xff]  ;;  %665 = vmatpush.msra.mxu1 %v139_v14  ;;  %v167_v21 = vld [vmem:[#allocation2 + $0x2a0] sm:$0xff]  ;;  %646 = vmatpush.msra.mxu0 %v105_v16 }
  0x1d   :  { %v137_v18 = vld [vmem:[#allocation2 + $0x1b0] sm:$0xff]  ;;  %705 = vmatpush.msra.mxu3 %v203_v15  ;;  %686 = vmatpush.msra.mxu2 %v169_v17  ;;  %v135_v22 = vld [vmem:[#allocation2 + $0x1a0] sm:$0xff] }
  0x1e   :  { %v201_v19 = vld [vmem:[#allocation2 + $0x3b0] sm:$0xff]  ;;  %v199_v23 = vld [vmem:[#allocation2 + $0x3a0] sm:$0xff]  ;;  %666 = vmatpush.msra.mxu1 %v137_v18  ;;  %647 = vmatpush.msra.mxu0 %v103_v20 }
  0x1f   :  { %706 = vmatpush.msra.mxu3 %v201_v19  ;;  %v101_v24 = vld [vmem:[#allocation2 + $0x90] sm:$0xff]  ;;  %687 = vmatpush.msra.mxu2 %v167_v21  ;;  %v99_v28 = vld [vmem:[#allocation2 + $0x80] sm:$0xff] }
  0x20   :  { %v165_v25 = vld [vmem:[#allocation2 + $0x290] sm:$0xff]  ;;  %667 = vmatpush.msra.mxu1 %v135_v22  ;;  %v163_v29 = vld [vmem:[#allocation2 + $0x280] sm:$0xff]  ;;  %648 = vmatpush.msra.mxu0 %v101_v24 }
  0x21   :  { %v133_v26 = vld [vmem:[#allocation2 + $0x190] sm:$0xff]  ;;  %707 = vmatpush.msra.mxu3 %v199_v23  ;;  %688 = vmatpush.msra.mxu2 %v165_v25  ;;  %v131_v30 = vld [vmem:[#allocation2 + $0x180] sm:$0xff] }
  0x22   :  { %v197_v27 = vld [vmem:[#allocation2 + $0x390] sm:$0xff]  ;;  %v195_v31 = vld [vmem:[#allocation2 + $0x380] sm:$0xff]  ;;  %668 = vmatpush.msra.mxu1 %v133_v26  ;;  %649 = vmatpush.msra.mxu0 %v99_v28  ;;  %v79_v26 = vld [vmem:[%s1586_s0] sm:$0xff] }
  0x23   :  { %708 = vmatpush.msra.mxu3 %v197_v27  ;;  %v97_v32 = vld [vmem:[#allocation2 + $0x70] sm:$0xff]  ;;  %689 = vmatpush.msra.mxu2 %v163_v29  ;;  %v95_v36 = vld [vmem:[#allocation2 + $0x60] sm:$0xff]  ;;  %605 = vst [vmem:[#allocation1] ss:$4 sm:$0xff] %v79_v26 }
  0x24   :  { %v161_v33 = vld [vmem:[#allocation2 + $0x270] sm:$0xff]  ;;  %669 = vmatpush.msra.mxu1 %v131_v30  ;;  %v159_v37 = vld [vmem:[#allocation2 + $0x260] sm:$0xff]  ;;  %650 = vmatpush.msra.mxu0 %v97_v32 }
  0x25   :  { %v129_v34 = vld [vmem:[#allocation2 + $0x170] sm:$0xff]  ;;  %709 = vmatpush.msra.mxu3 %v195_v31  ;;  %690 = vmatpush.msra.mxu2 %v161_v33  ;;  %v127_v38 = vld [vmem:[#allocation2 + $0x160] sm:$0xff] }
  0x26   :  { %v193_v35 = vld [vmem:[#allocation2 + $0x370] sm:$0xff]  ;;  %v191_v39 = vld [vmem:[#allocation2 + $0x360] sm:$0xff]  ;;  %670 = vmatpush.msra.mxu1 %v129_v34  ;;  %651 = vmatpush.msra.mxu0 %v95_v36 }
  0x27   :  { %710 = vmatpush.msra.mxu3 %v193_v35  ;;  %v93_v40 = vld [vmem:[#allocation2 + $0x50] sm:$0xff]  ;;  %691 = vmatpush.msra.mxu2 %v159_v37  ;;  %v91_v44 = vld [vmem:[#allocation2 + $0x40] sm:$0xff] }
  0x28   :  { %v157_v41 = vld [vmem:[#allocation2 + $0x250] sm:$0xff]  ;;  %671 = vmatpush.msra.mxu1 %v127_v38  ;;  %v155_v45 = vld [vmem:[#allocation2 + $0x240] sm:$0xff]  ;;  %652 = vmatpush.msra.mxu0 %v93_v40 }
  0x29   :  { %v125_v42 = vld [vmem:[#allocation2 + $0x150] sm:$0xff]  ;;  %711 = vmatpush.msra.mxu3 %v191_v39  ;;  %692 = vmatpush.msra.mxu2 %v157_v41  ;;  %v123_v46 = vld [vmem:[#allocation2 + $0x140] sm:$0xff] }
  0x2a   :  { %v189_v43 = vld [vmem:[#allocation2 + $0x350] sm:$0xff]  ;;  %v187_v47 = vld [vmem:[#allocation2 + $0x340] sm:$0xff]  ;;  %672 = vmatpush.msra.mxu1 %v125_v42  ;;  %653 = vmatpush.msra.mxu0 %v91_v44 }
  0x2b   :  { %712 = vmatpush.msra.mxu3 %v189_v43  ;;  %v89_v48 = vld [vmem:[#allocation2 + $0x30] sm:$0xff]  ;;  %693 = vmatpush.msra.mxu2 %v155_v45  ;;  %v87_v52 = vld [vmem:[#allocation2 + $0x20] sm:$0xff] }
  0x2c   :  { %v153_v49 = vld [vmem:[#allocation2 + $0x230] sm:$0xff]  ;;  %673 = vmatpush.msra.mxu1 %v123_v46  ;;  %v151_v53 = vld [vmem:[#allocation2 + $0x220] sm:$0xff]  ;;  %654 = vmatpush.msra.mxu0 %v89_v48  ;;  %v81_v46 = vld [vmem:[%s1586_s0 + $0x10] sm:$0xff] }
  0x2d   :  { %v121_v50 = vld [vmem:[#allocation2 + $0x130] sm:$0xff]  ;;  %713 = vmatpush.msra.mxu3 %v187_v47  ;;  %694 = vmatpush.msra.mxu2 %v153_v49  ;;  %v119_v54 = vld [vmem:[#allocation2 + $0x120] sm:$0xff]  ;;  %v1544_v48 = vld.sshfl [vmem:[#allocation1] sm:$0xff pattern:$0x73625140] }
  0x2e   :  { %v185_v51 = vld [vmem:[#allocation2 + $0x330] sm:$0xff]  ;;  %v183_v55 = vld [vmem:[#allocation2 + $0x320] sm:$0xff]  ;;  %674 = vmatpush.msra.mxu1 %v121_v50  ;;  %655 = vmatpush.msra.mxu0 %v87_v52  ;;  %v1546_v49 = vld.sshfl [vmem:[#allocation1 + $0x10] sm:$0xff pattern:$0x73625140] }
  0x2f   :  { %714 = vmatpush.msra.mxu3 %v185_v51  ;;  %v85_v56 = vld [vmem:[#allocation2 + $0x10] sm:$0xff]  ;;  %695 = vmatpush.msra.mxu2 %v151_v53  ;;  %v83_v60 = vld [vmem:[#allocation2] sm:$0xff] }
  0x30   :  { %v149_v57 = vld [vmem:[#allocation2 + $0x210] sm:$0xff]  ;;  %675 = vmatpush.msra.mxu1 %v119_v54  ;;  %v147_v61 = vld [vmem:[#allocation2 + $0x200] sm:$0xff]  ;;  %656 = vmatpush.msra.mxu0 %v85_v56 }
  0x31   :  { %v117_v58 = vld [vmem:[#allocation2 + $0x110] sm:$0xff]  ;;  %715 = vmatpush.msra.mxu3 %v183_v55  ;;  %696 = vmatpush.msra.mxu2 %v149_v57  ;;  %v115_v0 = vld [vmem:[#allocation2 + $0x100] sm:$0xff] }
  0x32   :  { %v181_v59 = vld [vmem:[#allocation2 + $0x310] sm:$0xff]  ;;  %676 = vmatpush.msra.mxu1 %v117_v58  ;;  %v179_v1 = vld [vmem:[#allocation2 + $0x300] sm:$0xff]  ;;  %657 = vmatpush.msra.mxu0 %v83_v60 }
  0x33   :  { %v241_v62 = vld [vmem:[#allocation2 + $0x4f0] sm:$0xff]  ;;  %716 = vmatpush.msra.mxu3 %v181_v59  ;;  %697 = vmatpush.msra.mxu2 %v147_v61  ;;  %v239_v2 = vld [vmem:[#allocation2 + $0x4e0] sm:$0xff] }
  0x34   :  { %v305_v63 = vld [vmem:[#allocation2 + $0x6f0] sm:$0xff]  ;;  %722 = vmatpush.msrb.mxu0 %v241_v62  ;;  %v303_v4 = vld [vmem:[#allocation2 + $0x6e0] sm:$0xff]  ;;  %677 = vmatpush.msra.mxu1 %v115_v0 }
  0x35   :  { %v273_v3 = vld [vmem:[#allocation2 + $0x5f0] sm:$0xff]  ;;  %762 = vmatpush.msrb.mxu2 %v305_v63  ;;  %717 = vmatpush.msra.mxu3 %v179_v1  ;;  %v271_v7 = vld [vmem:[#allocation2 + $0x5e0] sm:$0xff] }
  0x36   :  { %v337_v5 = vld [vmem:[#allocation2 + $0x7f0] sm:$0xff]  ;;  %723 = vmatpush.msrb.mxu0 %v239_v2  ;;  %742 = vmatpush.msrb.mxu1 %v273_v3  ;;  %v335_v9 = vld [vmem:[#allocation2 + $0x7e0] sm:$0xff] }
  0x37   :  { %v237_v6 = vld [vmem:[#allocation2 + $0x4d0] sm:$0xff]  ;;  %763 = vmatpush.msrb.mxu2 %v303_v4  ;;  %782 = vmatpush.msrb.mxu3 %v337_v5  ;;  %v235_v10 = vld [vmem:[#allocation2 + $0x4c0] sm:$0xff] }
  0x38   :  { %v301_v8 = vld [vmem:[#allocation2 + $0x6d0] sm:$0xff]  ;;  %724 = vmatpush.msrb.mxu0 %v237_v6  ;;  %743 = vmatpush.msrb.mxu1 %v271_v7  ;;  %v299_v12 = vld [vmem:[#allocation2 + $0x6c0] sm:$0xff] }
  0x39   :  { %v269_v11 = vld [vmem:[#allocation2 + $0x5d0] sm:$0xff]  ;;  %764 = vmatpush.msrb.mxu2 %v301_v8  ;;  %783 = vmatpush.msrb.mxu3 %v335_v9  ;;  %v267_v15 = vld [vmem:[#allocation2 + $0x5c0] sm:$0xff] }
  0x3a   :  { %v333_v13 = vld [vmem:[#allocation2 + $0x7d0] sm:$0xff]  ;;  %725 = vmatpush.msrb.mxu0 %v235_v10  ;;  %744 = vmatpush.msrb.mxu1 %v269_v11  ;;  %v331_v17 = vld [vmem:[#allocation2 + $0x7c0] sm:$0xff] }
  0x3b   :  { %v233_v14 = vld [vmem:[#allocation2 + $0x4b0] sm:$0xff]  ;;  %765 = vmatpush.msrb.mxu2 %v299_v12  ;;  %784 = vmatpush.msrb.mxu3 %v333_v13  ;;  %v231_v18 = vld [vmem:[#allocation2 + $0x4a0] sm:$0xff] }
  0x3c   :  { %v297_v16 = vld [vmem:[#allocation2 + $0x6b0] sm:$0xff]  ;;  %726 = vmatpush.msrb.mxu0 %v233_v14  ;;  %745 = vmatpush.msrb.mxu1 %v267_v15  ;;  %v295_v20 = vld [vmem:[#allocation2 + $0x6a0] sm:$0xff] }
  0x3d   :  { %v265_v19 = vld [vmem:[#allocation2 + $0x5b0] sm:$0xff]  ;;  %766 = vmatpush.msrb.mxu2 %v297_v16  ;;  %785 = vmatpush.msrb.mxu3 %v331_v17  ;;  %v263_v23 = vld [vmem:[#allocation2 + $0x5a0] sm:$0xff] }
  0x3e   :  { %v329_v21 = vld [vmem:[#allocation2 + $0x7b0] sm:$0xff]  ;;  %727 = vmatpush.msrb.mxu0 %v231_v18  ;;  %746 = vmatpush.msrb.mxu1 %v265_v19  ;;  %v327_v25 = vld [vmem:[#allocation2 + $0x7a0] sm:$0xff] }
  0x3f   :  { %v229_v22 = vld [vmem:[#allocation2 + $0x490] sm:$0xff]  ;;  %767 = vmatpush.msrb.mxu2 %v295_v20  ;;  %786 = vmatpush.msrb.mxu3 %v329_v21  ;;  %v227_v27 = vld [vmem:[#allocation2 + $0x480] sm:$0xff] }
  0x40   :  { %v293_v24 = vld [vmem:[#allocation2 + $0x690] sm:$0xff]  ;;  %728 = vmatpush.msrb.mxu0 %v229_v22  ;;  %747 = vmatpush.msrb.mxu1 %v263_v23  ;;  %v291_v29 = vld [vmem:[#allocation2 + $0x680] sm:$0xff] }
  0x41   :  { %v261_v28 = vld [vmem:[#allocation2 + $0x590] sm:$0xff]  ;;  %768 = vmatpush.msrb.mxu2 %v293_v24  ;;  %787 = vmatpush.msrb.mxu3 %v327_v25  ;;  %v259_v32 = vld [vmem:[#allocation2 + $0x580] sm:$0xff] }
  0x42   :  { %v325_v30 = vld [vmem:[#allocation2 + $0x790] sm:$0xff]  ;;  %v323_v34 = vld [vmem:[#allocation2 + $0x780] sm:$0xff]  ;;  %729 = vmatpush.msrb.mxu0 %v227_v27  ;;  %748 = vmatpush.msrb.mxu1 %v261_v28 }
  0x43   :  { %v225_v31 = vld [vmem:[#allocation2 + $0x470] sm:$0xff]  ;;  %v223_v35 = vld [vmem:[#allocation2 + $0x460] sm:$0xff]  ;;  %769 = vmatpush.msrb.mxu2 %v291_v29  ;;  %788 = vmatpush.msrb.mxu3 %v325_v30 }
  0x44   :  { %v289_v33 = vld [vmem:[#allocation2 + $0x670] sm:$0xff]  ;;  %v287_v37 = vld [vmem:[#allocation2 + $0x660] sm:$0xff]  ;;  %730 = vmatpush.msrb.mxu0 %v225_v31  ;;  %749 = vmatpush.msrb.mxu1 %v259_v32 }
  0x45   :  { %v257_v36 = vld [vmem:[#allocation2 + $0x570] sm:$0xff]  ;;  %v255_v40 = vld [vmem:[#allocation2 + $0x560] sm:$0xff]  ;;  %770 = vmatpush.msrb.mxu2 %v289_v33  ;;  %789 = vmatpush.msrb.mxu3 %v323_v34 }
  0x46   :  { %v321_v38 = vld [vmem:[#allocation2 + $0x770] sm:$0xff]  ;;  %v319_v42 = vld [vmem:[#allocation2 + $0x760] sm:$0xff]  ;;  %731 = vmatpush.msrb.mxu0 %v223_v35  ;;  %750 = vmatpush.msrb.mxu1 %v257_v36 }
  0x47   :  { %v221_v39 = vld [vmem:[#allocation2 + $0x450] sm:$0xff]  ;;  %v80_v43 = vld [vmem:[%s1586_s0 + $0x8] sm:$0xff]  ;;  %771 = vmatpush.msrb.mxu2 %v287_v37  ;;  %790 = vmatpush.msrb.mxu3 %v321_v38 }
  0x48   :  { %v285_v41 = vld [vmem:[#allocation2 + $0x650] sm:$0xff]  ;;  %v219_v44 = vld [vmem:[#allocation2 + $0x440] sm:$0xff]  ;;  %607 = vst [vmem:[#allocation1 + $0x20] ss:$4 sm:$0xff] %v80_v43  ;;  %732 = vmatpush.msrb.mxu0 %v221_v39  ;;  %751 = vmatpush.msrb.mxu1 %v255_v40 }
  0x49   :  { %v253_v45 = vld [vmem:[#allocation2 + $0x550] sm:$0xff]  ;;  %v283_v47 = vld [vmem:[#allocation2 + $0x640] sm:$0xff]  ;;  %772 = vmatpush.msrb.mxu2 %v285_v41  ;;  %791 = vmatpush.msrb.mxu3 %v319_v42 }
  0x4a   :  { %v1548_v50 = vld.sshfl [vmem:[#allocation1 + $0x8] sm:$0xff pattern:$0x73625140]  ;;  %v1550_v51 = vld.sshfl [vmem:[#allocation1 + $0x18] sm:$0xff pattern:$0x73625140]  ;;  %733 = vmatpush.msrb.mxu0 %v219_v44  ;;  %752 = vmatpush.msrb.mxu1 %v253_v45 }
  0x4b   :  { %v317_v52 = vld [vmem:[#allocation2 + $0x750] sm:$0xff]  ;;  %v251_v54 = vld [vmem:[#allocation2 + $0x540] sm:$0xff]  ;;  %616 = vst [vmem:[#allocation1] ss:$4 sm:$0xff] %v81_v46  ;;  %773 = vmatpush.msrb.mxu2 %v283_v47  ;;  %658 = vmatmul.f32.vlgmr.msra.gmra.mxu0 %v1544_v48 }
  0x4c   :  { %v217_v53 = vld [vmem:[#allocation2 + $0x430] sm:$0xff]  ;;  %v315_v56 = vld [vmem:[#allocation2 + $0x740] sm:$0xff]  ;;  %792 = vmatpush.msrb.mxu3 %v317_v52  ;;  %753 = vmatpush.msrb.mxu1 %v251_v54 }
  0x4d   :  { %v281_v55 = vld [vmem:[#allocation2 + $0x630] sm:$0xff]  ;;  %v215_v57 = vld [vmem:[#allocation2 + $0x420] sm:$0xff]  ;;  %734 = vmatpush.msrb.mxu0 %v217_v53  ;;  %698 = vmatmul.f32.vlgmr.msra.gmra.mxu2 %v1546_v49 }
  0x4e   :  { %v249_v58 = vld [vmem:[#allocation2 + $0x530] sm:$0xff]  ;;  %v279_v59 = vld [vmem:[#allocation2 + $0x620] sm:$0xff]  ;;  %774 = vmatpush.msrb.mxu2 %v281_v55  ;;  %793 = vmatpush.msrb.mxu3 %v315_v56 }
  0x4f   :  { %v313_v60 = vld [vmem:[#allocation2 + $0x730] sm:$0xff]  ;;  %v247_v62 = vld [vmem:[#allocation2 + $0x520] sm:$0xff]  ;;  %v1555_v0 = vld.sshfl [vmem:[#allocation1 + $0x30] sm:$0xff pattern:$0x73625140]  ;;  %735 = vmatpush.msrb.mxu0 %v215_v57  ;;  %754 = vmatpush.msrb.mxu1 %v249_v58 }
  0x50   :  { %v213_v61 = vld [vmem:[#allocation2 + $0x410] sm:$0xff]  ;;  %v1557_v1 = vld.sshfl [vmem:[#allocation1 + $0x20] sm:$0xff pattern:$0x73625140]  ;;  %v311_v5 = vld [vmem:[#allocation2 + $0x720] sm:$0xff]  ;;  %775 = vmatpush.msrb.mxu2 %v279_v59  ;;  %794 = vmatpush.msrb.mxu3 %v313_v60 }
  0x51   :  { %v82_v63 = vld [vmem:[%s1586_s0 + $0x18] sm:$0xff]  ;;  %v1561_v3 = vld.sshfl [vmem:[#allocation1 + $0x28] sm:$0xff pattern:$0x73625140]  ;;  %736 = vmatpush.msrb.mxu0 %v213_v61  ;;  %755 = vmatpush.msrb.mxu1 %v247_v62 }
  0x52   :  { %v1559_v2 = vld.sshfl [vmem:[#allocation1 + $0x38] sm:$0xff pattern:$0x73625140]  ;;  %v211_v6 = vld [vmem:[#allocation2 + $0x400] sm:$0xff]  ;;  %795 = vmatpush.msrb.mxu3 %v311_v5  ;;  %678 = vmatmul.f32.vlgmr.msra.gmra.mxu1 %v1548_v50 }
  0x53   :  { %v277_v4 = vld [vmem:[#allocation2 + $0x610] sm:$0xff]  ;;  %617 = vst [vmem:[#allocation1 + $0x20] ss:$4 sm:$0xff] %v82_v63  ;;  %v275_v8 = vld [vmem:[#allocation2 + $0x600] sm:$0xff]  ;;  %737 = vmatpush.msrb.mxu0 %v211_v6  ;;  %718 = vmatmul.f32.vlgmr.msra.gmra.mxu3 %v1550_v51 }
  0x54   :  { %v245_v7 = vld [vmem:[#allocation2 + $0x510] sm:$0xff]  ;;  %776 = vmatpush.msrb.mxu2 %v277_v4  ;;  %v243_v12 = vld [vmem:[#allocation2 + $0x500] sm:$0xff]  ;;  %738 = vmatmul.f32.vlgmr.msrb.gmra.mxu0 %v1557_v1 }
  0x55   :  { %v309_v9 = vld [vmem:[#allocation2 + $0x710] sm:$0xff]  ;;  %756 = vmatpush.msrb.mxu1 %v245_v7  ;;  %v307_v13 = vld [vmem:[#allocation2 + $0x700] sm:$0xff] }
  0x56   :  { %v369_v10 = vld [vmem:[#allocation2 + $0x8f0] sm:$0xff]  ;;  %777 = vmatpush.msrb.mxu2 %v275_v8  ;;  %796 = vmatpush.msrb.mxu3 %v309_v9  ;;  %v367_v14 = vld [vmem:[#allocation2 + $0x8e0] sm:$0xff] }
  0x57   :  { %v433_v11 = vld [vmem:[#allocation2 + $0xaf0] sm:$0xff]  ;;  %802 = vmatpush.msra.mxu0 %v369_v10  ;;  %757 = vmatpush.msrb.mxu1 %v243_v12  ;;  %v431_v16 = vld [vmem:[#allocation2 + $0xae0] sm:$0xff] }
  0x58   :  { %842 = vmatpush.msra.mxu2 %v433_v11  ;;  %v401_v15 = vld [vmem:[#allocation2 + $0x9f0] sm:$0xff]  ;;  %797 = vmatpush.msrb.mxu3 %v307_v13  ;;  %v399_v19 = vld [vmem:[#allocation2 + $0x9e0] sm:$0xff] }
  0x59   :  { %v465_v17 = vld [vmem:[#allocation2 + $0xbf0] sm:$0xff]  ;;  %803 = vmatpush.msra.mxu0 %v367_v14  ;;  %822 = vmatpush.msra.mxu1 %v401_v15  ;;  %v463_v21 = vld [vmem:[#allocation2 + $0xbe0] sm:$0xff] }
  0x5a   :  { %v365_v18 = vld [vmem:[#allocation2 + $0x8d0] sm:$0xff]  ;;  %843 = vmatpush.msra.mxu2 %v431_v16  ;;  %862 = vmatpush.msra.mxu3 %v465_v17  ;;  %v363_v22 = vld [vmem:[#allocation2 + $0x8c0] sm:$0xff] }
  0x5b   :  { %v429_v20 = vld [vmem:[#allocation2 + $0xad0] sm:$0xff]  ;;  %804 = vmatpush.msra.mxu0 %v365_v18  ;;  %823 = vmatpush.msra.mxu1 %v399_v19  ;;  %v427_v24 = vld [vmem:[#allocation2 + $0xac0] sm:$0xff]  ;;  %v618_v18 = vld.sshfl [vmem:[#allocation1] sm:$0xff pattern:$0x73625140] }
  0x5c   :  { %v397_v23 = vld [vmem:[#allocation2 + $0x9d0] sm:$0xff]  ;;  %844 = vmatpush.msra.mxu2 %v429_v20  ;;  %863 = vmatpush.msra.mxu3 %v463_v21  ;;  %v395_v27 = vld [vmem:[#allocation2 + $0x9c0] sm:$0xff]  ;;  %v620_v19 = vld.sshfl [vmem:[#allocation1 + $0x10] sm:$0xff pattern:$0x73625140] }
  0x5d   :  { %v461_v25 = vld [vmem:[#allocation2 + $0xbd0] sm:$0xff]  ;;  %805 = vmatpush.msra.mxu0 %v363_v22  ;;  %824 = vmatpush.msra.mxu1 %v397_v23  ;;  %v459_v29 = vld [vmem:[#allocation2 + $0xbc0] sm:$0xff] }
  0x5e   :  { %v361_v26 = vld [vmem:[#allocation2 + $0x8b0] sm:$0xff]  ;;  %845 = vmatpush.msra.mxu2 %v427_v24  ;;  %864 = vmatpush.msra.mxu3 %v461_v25  ;;  %v359_v30 = vld [vmem:[#allocation2 + $0x8a0] sm:$0xff] }
  0x5f   :  { %v425_v28 = vld [vmem:[#allocation2 + $0xab0] sm:$0xff]  ;;  %778 = vmatmul.f32.vlgmr.msrb.gmra.mxu2 %v1555_v0  ;;  %806 = vmatpush.msra.mxu0 %v361_v26  ;;  %v423_v32 = vld [vmem:[#allocation2 + $0xaa0] sm:$0xff] }
  0x60   :  { %825 = vmatpush.msra.mxu1 %v395_v27  ;;  %846 = vmatpush.msra.mxu2 %v425_v28  ;;  %v393_v31 = vld [vmem:[#allocation2 + $0x9b0] sm:$0xff]  ;;  %v391_v35 = vld [vmem:[#allocation2 + $0x9a0] sm:$0xff] }
  0x61   :  { %865 = vmatpush.msra.mxu3 %v459_v29  ;;  %v457_v33 = vld [vmem:[#allocation2 + $0xbb0] sm:$0xff]  ;;  %807 = vmatpush.msra.mxu0 %v359_v30  ;;  %v455_v37 = vld [vmem:[#allocation2 + $0xba0] sm:$0xff] }
  0x62   :  { %798 = vmatmul.f32.vlgmr.msrb.gmra.mxu3 %v1559_v2  ;;  %v357_v34 = vld [vmem:[#allocation2 + $0x890] sm:$0xff]  ;;  %826 = vmatpush.msra.mxu1 %v393_v31  ;;  %v355_v38 = vld [vmem:[#allocation2 + $0x880] sm:$0xff] }
  0x63   :  { %847 = vmatpush.msra.mxu2 %v423_v32  ;;  %v421_v36 = vld [vmem:[#allocation2 + $0xa90] sm:$0xff]  ;;  %866 = vmatpush.msra.mxu3 %v457_v33  ;;  %v419_v40 = vld [vmem:[#allocation2 + $0xa80] sm:$0xff] }
  0x64   :  { %758 = vmatmul.f32.vlgmr.msrb.gmra.mxu1 %v1561_v3  ;;  %v389_v39 = vld [vmem:[#allocation2 + $0x990] sm:$0xff]  ;;  %808 = vmatpush.msra.mxu0 %v357_v34  ;;  %v387_v43 = vld [vmem:[#allocation2 + $0x980] sm:$0xff] }
  0x65   :  { %827 = vmatpush.msra.mxu1 %v391_v35  ;;  %v453_v41 = vld [vmem:[#allocation2 + $0xb90] sm:$0xff]  ;;  %848 = vmatpush.msra.mxu2 %v421_v36  ;;  %v451_v45 = vld [vmem:[#allocation2 + $0xb80] sm:$0xff] }
  0x66   :  { %867 = vmatpush.msra.mxu3 %v455_v37  ;;  %v353_v42 = vld [vmem:[#allocation2 + $0x870] sm:$0xff]  ;;  %809 = vmatpush.msra.mxu0 %v355_v38  ;;  %v351_v46 = vld [vmem:[#allocation2 + $0x860] sm:$0xff] }
  0x67   :  { %828 = vmatpush.msra.mxu1 %v389_v39  ;;  %v417_v44 = vld [vmem:[#allocation2 + $0xa70] sm:$0xff]  ;;  %849 = vmatpush.msra.mxu2 %v419_v40  ;;  %v415_v52 = vld [vmem:[#allocation2 + $0xa60] sm:$0xff] }
  0x68   :  { %868 = vmatpush.msra.mxu3 %v453_v41  ;;  %v385_v47 = vld [vmem:[#allocation2 + $0x970] sm:$0xff]  ;;  %810 = vmatpush.msra.mxu0 %v353_v42  ;;  %v383_v55 = vld [vmem:[#allocation2 + $0x960] sm:$0xff] }
  0x69   :  { %829 = vmatpush.msra.mxu1 %v387_v43  ;;  %v449_v53 = vld [vmem:[#allocation2 + $0xb70] sm:$0xff]  ;;  %850 = vmatpush.msra.mxu2 %v417_v44  ;;  %v447_v57 = vld [vmem:[#allocation2 + $0xb60] sm:$0xff] }
  0x6a   :  { %869 = vmatpush.msra.mxu3 %v451_v45  ;;  %v349_v54 = vld [vmem:[#allocation2 + $0x850] sm:$0xff]  ;;  %811 = vmatpush.msra.mxu0 %v351_v46  ;;  %v347_v58 = vld [vmem:[#allocation2 + $0x840] sm:$0xff] }
  0x6b   :  { %830 = vmatpush.msra.mxu1 %v385_v47  ;;  %v413_v56 = vld [vmem:[#allocation2 + $0xa50] sm:$0xff]  ;;  %851 = vmatpush.msra.mxu2 %v415_v52  ;;  %v411_v60 = vld [vmem:[#allocation2 + $0xa40] sm:$0xff] }
  0x6c   :  { %870 = vmatpush.msra.mxu3 %v449_v53  ;;  %v381_v59 = vld [vmem:[#allocation2 + $0x950] sm:$0xff]  ;;  %812 = vmatpush.msra.mxu0 %v349_v54  ;;  %v379_v63 = vld [vmem:[#allocation2 + $0x940] sm:$0xff] }
  0x6d   :  { %831 = vmatpush.msra.mxu1 %v383_v55  ;;  %v445_v61 = vld [vmem:[#allocation2 + $0xb50] sm:$0xff]  ;;  %852 = vmatpush.msra.mxu2 %v413_v56  ;;  %v443_v5 = vld [vmem:[#allocation2 + $0xb40] sm:$0xff] }
  0x6e   :  { %871 = vmatpush.msra.mxu3 %v447_v57  ;;  %v345_v62 = vld [vmem:[#allocation2 + $0x830] sm:$0xff]  ;;  %813 = vmatpush.msra.mxu0 %v347_v58  ;;  %v343_v6 = vld [vmem:[#allocation2 + $0x820] sm:$0xff] }
  0x6f   :  { %832 = vmatpush.msra.mxu1 %v381_v59  ;;  %v409_v4 = vld [vmem:[#allocation2 + $0xa30] sm:$0xff]  ;;  %853 = vmatpush.msra.mxu2 %v411_v60  ;;  %v407_v8 = vld [vmem:[#allocation2 + $0xa20] sm:$0xff] }
  0x70   :  { %872 = vmatpush.msra.mxu3 %v445_v61  ;;  %v377_v7 = vld [vmem:[#allocation2 + $0x930] sm:$0xff]  ;;  %814 = vmatpush.msra.mxu0 %v345_v62  ;;  %v375_v11 = vld [vmem:[#allocation2 + $0x920] sm:$0xff] }
  0x71   :  { %833 = vmatpush.msra.mxu1 %v379_v63  ;;  %v441_v9 = vld [vmem:[#allocation2 + $0xb30] sm:$0xff]  ;;  %854 = vmatpush.msra.mxu2 %v409_v4  ;;  %v439_v13 = vld [vmem:[#allocation2 + $0xb20] sm:$0xff] }
  0x72   :  { %873 = vmatpush.msra.mxu3 %v443_v5  ;;  %v341_v10 = vld [vmem:[#allocation2 + $0x810] sm:$0xff]  ;;  %815 = vmatpush.msra.mxu0 %v343_v6  ;;  %v339_v14 = vld [vmem:[#allocation2 + $0x800] sm:$0xff] }
  0x73   :  { %834 = vmatpush.msra.mxu1 %v377_v7  ;;  %v405_v12 = vld [vmem:[#allocation2 + $0xa10] sm:$0xff]  ;;  %855 = vmatpush.msra.mxu2 %v407_v8  ;;  %v403_v16 = vld [vmem:[#allocation2 + $0xa00] sm:$0xff] }
  0x74   :  { %874 = vmatpush.msra.mxu3 %v441_v9  ;;  %v373_v15 = vld [vmem:[#allocation2 + $0x910] sm:$0xff]  ;;  %816 = vmatpush.msra.mxu0 %v341_v10  ;;  %v371_v22 = vld [vmem:[#allocation2 + $0x900] sm:$0xff] }
  0x75   :  { %835 = vmatpush.msra.mxu1 %v375_v11  ;;  %v437_v17 = vld [vmem:[#allocation2 + $0xb10] sm:$0xff]  ;;  %856 = vmatpush.msra.mxu2 %v405_v12  ;;  %v435_v23 = vld [vmem:[#allocation2 + $0xb00] sm:$0xff] }
  0x76   :  { %875 = vmatpush.msra.mxu3 %v439_v13  ;;  %817 = vmatpush.msra.mxu0 %v339_v14  ;;  %v497_v20 = vld [vmem:[#allocation2 + $0xcf0] sm:$0xff]  ;;  %v619_v24 = vld.sshfl [vmem:[#allocation1 + $0x8] sm:$0xff pattern:$0x73625140] }
  0x77   :  { %836 = vmatpush.msra.mxu1 %v373_v15  ;;  %v561_v21 = vld [vmem:[#allocation2 + $0xef0] sm:$0xff]  ;;  %857 = vmatpush.msra.mxu2 %v403_v16  ;;  %v495_v26 = vld [vmem:[#allocation2 + $0xce0] sm:$0xff] }
  0x78   :  { %876 = vmatpush.msra.mxu3 %v437_v17  ;;  %818 = vmatmul.f32.vlgmr.msra.gmra.mxu0 %v618_v18  ;;  %v621_v25 = vld.sshfl [vmem:[#allocation1 + $0x18] sm:$0xff pattern:$0x73625140]  ;;  %v559_v28 = vld [vmem:[#allocation2 + $0xee0] sm:$0xff] }
  0x79   :  { %858 = vmatmul.f32.vlgmr.msra.gmra.mxu2 %v620_v19  ;;  %882 = vmatpush.msrb.mxu0 %v497_v20  ;;  %v529_v27 = vld [vmem:[#allocation2 + $0xdf0] sm:$0xff]  ;;  %v527_v31 = vld [vmem:[#allocation2 + $0xde0] sm:$0xff] }
  0x7a   :  { %922 = vmatpush.msrb.mxu2 %v561_v21  ;;  %837 = vmatpush.msra.mxu1 %v371_v22  ;;  %v593_v29 = vld [vmem:[#allocation2 + $0xff0] sm:$0xff]  ;;  %v591_v33 = vld [vmem:[#allocation2 + $0xfe0] sm:$0xff] }
  0x7b   :  { %877 = vmatpush.msra.mxu3 %v435_v23  ;;  %838 = vmatmul.f32.vlgmr.msra.gmra.mxu1 %v619_v24  ;;  %v493_v30 = vld [vmem:[#allocation2 + $0xcd0] sm:$0xff]  ;;  %v491_v34 = vld [vmem:[#allocation2 + $0xcc0] sm:$0xff] }
  0x7c   :  { %878 = vmatmul.f32.vlgmr.msra.gmra.mxu3 %v621_v25  ;;  %883 = vmatpush.msrb.mxu0 %v495_v26  ;;  %v557_v32 = vld [vmem:[#allocation2 + $0xed0] sm:$0xff]  ;;  %v555_v36 = vld [vmem:[#allocation2 + $0xec0] sm:$0xff] }
  0x7d   :  { %902 = vmatpush.msrb.mxu1 %v529_v27  ;;  %923 = vmatpush.msrb.mxu2 %v559_v28  ;;  %v525_v35 = vld [vmem:[#allocation2 + $0xdd0] sm:$0xff]  ;;  %v523_v39 = vld [vmem:[#allocation2 + $0xdc0] sm:$0xff] }
  0x7e   :  { %942 = vmatpush.msrb.mxu3 %v593_v29  ;;  %884 = vmatpush.msrb.mxu0 %v493_v30  ;;  %v589_v37 = vld [vmem:[#allocation2 + $0xfd0] sm:$0xff]  ;;  %v587_v41 = vld [vmem:[#allocation2 + $0xfc0] sm:$0xff]  ;;  %v622_v30 = vld.sshfl [vmem:[#allocation1 + $0x20] sm:$0xff pattern:$0x73625140] }
  0x7f   :  { %903 = vmatpush.msrb.mxu1 %v527_v31  ;;  %924 = vmatpush.msrb.mxu2 %v557_v32  ;;  %v489_v38 = vld [vmem:[#allocation2 + $0xcb0] sm:$0xff]  ;;  %v487_v42 = vld [vmem:[#allocation2 + $0xca0] sm:$0xff]  ;;  %v624_v31 = vld.sshfl [vmem:[#allocation1 + $0x30] sm:$0xff pattern:$0x73625140] }
  0x80   :  { %943 = vmatpush.msrb.mxu3 %v591_v33  ;;  %885 = vmatpush.msrb.mxu0 %v491_v34  ;;  %v553_v40 = vld [vmem:[#allocation2 + $0xeb0] sm:$0xff]  ;;  %v551_v44 = vld [vmem:[#allocation2 + $0xea0] sm:$0xff]  ;;  %v114_v32 = vld [vmem:[#allocation2 + $0xf8] sm:$0xff] }
  0x81   :  { %904 = vmatpush.msrb.mxu1 %v525_v35  ;;  %925 = vmatpush.msrb.mxu2 %v555_v36  ;;  %v521_v43 = vld [vmem:[#allocation2 + $0xdb0] sm:$0xff]  ;;  %v519_v47 = vld [vmem:[#allocation2 + $0xda0] sm:$0xff]  ;;  %v178_v33 = vld [vmem:[#allocation2 + $0x2f8] sm:$0xff] }
  0x82   :  { %944 = vmatpush.msrb.mxu3 %v589_v37  ;;  %886 = vmatpush.msrb.mxu0 %v489_v38  ;;  %v585_v45 = vld [vmem:[#allocation2 + $0xfb0] sm:$0xff]  ;;  %v583_v53 = vld [vmem:[#allocation2 + $0xfa0] sm:$0xff]  ;;  %v112_v38 = vld [vmem:[#allocation2 + $0xe8] sm:$0xff] }
  0x83   :  { %905 = vmatpush.msrb.mxu1 %v523_v39  ;;  %926 = vmatpush.msrb.mxu2 %v553_v40  ;;  %v485_v46 = vld [vmem:[#allocation2 + $0xc90] sm:$0xff]  ;;  %v483_v54 = vld [vmem:[#allocation2 + $0xc80] sm:$0xff]  ;;  %v146_v39 = vld [vmem:[#allocation2 + $0x1f8] sm:$0xff] }
  0x84   :  { %945 = vmatpush.msrb.mxu3 %v587_v41  ;;  %887 = vmatpush.msrb.mxu0 %v487_v42  ;;  %v549_v52 = vld [vmem:[#allocation2 + $0xe90] sm:$0xff]  ;;  %v547_v56 = vld [vmem:[#allocation2 + $0xe80] sm:$0xff]  ;;  %v176_v40 = vld [vmem:[#allocation2 + $0x2e8] sm:$0xff] }
  0x85   :  { %906 = vmatpush.msrb.mxu1 %v521_v43  ;;  %927 = vmatpush.msrb.mxu2 %v551_v44  ;;  %v517_v55 = vld [vmem:[#allocation2 + $0xd90] sm:$0xff]  ;;  %v515_v59 = vld [vmem:[#allocation2 + $0xd80] sm:$0xff]  ;;  %v210_v41 = vld [vmem:[#allocation2 + $0x3f8] sm:$0xff] }
  0x86   :  { %946 = vmatpush.msrb.mxu3 %v585_v45  ;;  %888 = vmatpush.msrb.mxu0 %v485_v46  ;;  %v581_v57 = vld [vmem:[#allocation2 + $0xf90] sm:$0xff]  ;;  %v579_v61 = vld [vmem:[#allocation2 + $0xf80] sm:$0xff]  ;;  %v110_v42 = vld [vmem:[#allocation2 + $0xd8] sm:$0xff] }
  0x87   :  { %907 = vmatpush.msrb.mxu1 %v519_v47  ;;  %928 = vmatpush.msrb.mxu2 %v549_v52  ;;  %v481_v58 = vld [vmem:[#allocation2 + $0xc70] sm:$0xff]  ;;  %v479_v62 = vld [vmem:[#allocation2 + $0xc60] sm:$0xff]  ;;  %v144_v43 = vld [vmem:[#allocation2 + $0x1e8] sm:$0xff] }
  0x88   :  { %947 = vmatpush.msrb.mxu3 %v583_v53  ;;  %889 = vmatpush.msrb.mxu0 %v483_v54  ;;  %v545_v60 = vld [vmem:[#allocation2 + $0xe70] sm:$0xff]  ;;  %v543_v4 = vld [vmem:[#allocation2 + $0xe60] sm:$0xff]  ;;  %v174_v44 = vld [vmem:[#allocation2 + $0x2d8] sm:$0xff] }
  0x89   :  { %908 = vmatpush.msrb.mxu1 %v517_v55  ;;  %929 = vmatpush.msrb.mxu2 %v547_v56  ;;  %v513_v63 = vld [vmem:[#allocation2 + $0xd70] sm:$0xff]  ;;  %v511_v7 = vld [vmem:[#allocation2 + $0xd60] sm:$0xff]  ;;  %v208_v45 = vld [vmem:[#allocation2 + $0x3e8] sm:$0xff] }
  0x8a   :  { %948 = vmatpush.msrb.mxu3 %v581_v57  ;;  %890 = vmatpush.msrb.mxu0 %v481_v58  ;;  %v577_v5 = vld [vmem:[#allocation2 + $0xf70] sm:$0xff]  ;;  %v575_v9 = vld [vmem:[#allocation2 + $0xf60] sm:$0xff]  ;;  %v108_v46 = vld [vmem:[#allocation2 + $0xc8] sm:$0xff] }
  0x8b   :  { %909 = vmatpush.msrb.mxu1 %v515_v59  ;;  %930 = vmatpush.msrb.mxu2 %v545_v60  ;;  %v477_v6 = vld [vmem:[#allocation2 + $0xc50] sm:$0xff]  ;;  %v475_v10 = vld [vmem:[#allocation2 + $0xc40] sm:$0xff]  ;;  %v142_v47 = vld [vmem:[#allocation2 + $0x1d8] sm:$0xff] }
  0x8c   :  { %949 = vmatpush.msrb.mxu3 %v579_v61  ;;  %891 = vmatpush.msrb.mxu0 %v479_v62  ;;  %v541_v8 = vld [vmem:[#allocation2 + $0xe50] sm:$0xff]  ;;  %v539_v12 = vld [vmem:[#allocation2 + $0xe40] sm:$0xff]  ;;  %v172_v52 = vld [vmem:[#allocation2 + $0x2c8] sm:$0xff] }
  0x8d   :  { %910 = vmatpush.msrb.mxu1 %v513_v63  ;;  %931 = vmatpush.msrb.mxu2 %v543_v4  ;;  %v509_v11 = vld [vmem:[#allocation2 + $0xd50] sm:$0xff]  ;;  %v507_v15 = vld [vmem:[#allocation2 + $0xd40] sm:$0xff]  ;;  %v206_v53 = vld [vmem:[#allocation2 + $0x3d8] sm:$0xff] }
  0x8e   :  { %950 = vmatpush.msrb.mxu3 %v577_v5  ;;  %892 = vmatpush.msrb.mxu0 %v477_v6  ;;  %v573_v13 = vld [vmem:[#allocation2 + $0xf50] sm:$0xff]  ;;  %v571_v17 = vld [vmem:[#allocation2 + $0xf40] sm:$0xff]  ;;  %v106_v54 = vld [vmem:[#allocation2 + $0xb8] sm:$0xff] }
  0x8f   :  { %911 = vmatpush.msrb.mxu1 %v511_v7  ;;  %932 = vmatpush.msrb.mxu2 %v541_v8  ;;  %v473_v14 = vld [vmem:[#allocation2 + $0xc30] sm:$0xff]  ;;  %v471_v18 = vld [vmem:[#allocation2 + $0xc20] sm:$0xff]  ;;  %v140_v55 = vld [vmem:[#allocation2 + $0x1c8] sm:$0xff] }
  0x90   :  { %951 = vmatpush.msrb.mxu3 %v575_v9  ;;  %893 = vmatpush.msrb.mxu0 %v475_v10  ;;  %v537_v16 = vld [vmem:[#allocation2 + $0xe30] sm:$0xff]  ;;  %v535_v20 = vld [vmem:[#allocation2 + $0xe20] sm:$0xff]  ;;  %v170_v56 = vld [vmem:[#allocation2 + $0x2b8] sm:$0xff] }
  0x91   :  { %912 = vmatpush.msrb.mxu1 %v509_v11  ;;  %933 = vmatpush.msrb.mxu2 %v539_v12  ;;  %v505_v19 = vld [vmem:[#allocation2 + $0xd30] sm:$0xff]  ;;  %v503_v23 = vld [vmem:[#allocation2 + $0xd20] sm:$0xff]  ;;  %v204_v57 = vld [vmem:[#allocation2 + $0x3c8] sm:$0xff] }
  0x92   :  { %952 = vmatpush.msrb.mxu3 %v573_v13  ;;  %894 = vmatpush.msrb.mxu0 %v473_v14  ;;  %v569_v21 = vld [vmem:[#allocation2 + $0xf30] sm:$0xff]  ;;  %v567_v25 = vld [vmem:[#allocation2 + $0xf20] sm:$0xff]  ;;  %v104_v58 = vld [vmem:[#allocation2 + $0xa8] sm:$0xff] }
  0x93   :  { %913 = vmatpush.msrb.mxu1 %v507_v15  ;;  %934 = vmatpush.msrb.mxu2 %v537_v16  ;;  %v469_v22 = vld [vmem:[#allocation2 + $0xc10] sm:$0xff]  ;;  %v467_v26 = vld [vmem:[#allocation2 + $0xc00] sm:$0xff]  ;;  %v138_v59 = vld [vmem:[#allocation2 + $0x1b8] sm:$0xff] }
  0x94   :  { %953 = vmatpush.msrb.mxu3 %v571_v17  ;;  %895 = vmatpush.msrb.mxu0 %v471_v18  ;;  %v533_v24 = vld [vmem:[#allocation2 + $0xe10] sm:$0xff]  ;;  %v531_v28 = vld [vmem:[#allocation2 + $0xe00] sm:$0xff]  ;;  %v168_v60 = vld [vmem:[#allocation2 + $0x2a8] sm:$0xff] }
  0x95   :  { %914 = vmatpush.msrb.mxu1 %v505_v19  ;;  %935 = vmatpush.msrb.mxu2 %v535_v20  ;;  %v501_v27 = vld [vmem:[#allocation2 + $0xd10] sm:$0xff]  ;;  %v499_v34 = vld [vmem:[#allocation2 + $0xd00] sm:$0xff]  ;;  %v202_v61 = vld [vmem:[#allocation2 + $0x3b8] sm:$0xff] }
  0x96   :  { %954 = vmatpush.msrb.mxu3 %v569_v21  ;;  %896 = vmatpush.msrb.mxu0 %v469_v22  ;;  %v565_v29 = vld [vmem:[#allocation2 + $0xf10] sm:$0xff]  ;;  %v563_v35 = vld [vmem:[#allocation2 + $0xf00] sm:$0xff]  ;;  %v102_v62 = vld [vmem:[#allocation2 + $0x98] sm:$0xff] }
  0x97   :  { %915 = vmatpush.msrb.mxu1 %v503_v23  ;;  %936 = vmatpush.msrb.mxu2 %v533_v24  ;;  %v623_v36 = vld.sshfl [vmem:[#allocation1 + $0x28] sm:$0xff pattern:$0x73625140]  ;;  %v625_v37 = vld.sshfl [vmem:[#allocation1 + $0x38] sm:$0xff pattern:$0x73625140] }
  0x98   :  { %955 = vmatpush.msrb.mxu3 %v567_v25  ;;  %897 = vmatpush.msrb.mxu0 %v467_v26  ;;  %v136_v63 = vld [vmem:[#allocation2 + $0x1a8] sm:$0xff]  ;;  %v166_v4 = vld [vmem:[#allocation2 + $0x298] sm:$0xff] }
  0x99   :  { %916 = vmatpush.msrb.mxu1 %v501_v27  ;;  %937 = vmatpush.msrb.mxu2 %v531_v28  ;;  %v200_v5 = vld [vmem:[#allocation2 + $0x3a8] sm:$0xff]  ;;  %v134_v7 = vld [vmem:[#allocation2 + $0x198] sm:$0xff] }
  0x9a   :  { %956 = vmatpush.msrb.mxu3 %v565_v29  ;;  %898 = vmatmul.f32.vlgmr.msrb.gmra.mxu0 %v622_v30  ;;  %v100_v6 = vld [vmem:[#allocation2 + $0x88] sm:$0xff]  ;;  %v198_v9 = vld [vmem:[#allocation2 + $0x398] sm:$0xff] }
  0x9b   :  { %938 = vmatmul.f32.vlgmr.msrb.gmra.mxu2 %v624_v31  ;;  %962 = vmatpush.msra.mxu0 %v114_v32  ;;  %v164_v8 = vld [vmem:[#allocation2 + $0x288] sm:$0xff]  ;;  %v98_v10 = vld [vmem:[#allocation2 + $0x78] sm:$0xff] }
  0x9c   :  { %1002 = vmatpush.msra.mxu2 %v178_v33  ;;  %917 = vmatpush.msrb.mxu1 %v499_v34  ;;  %v132_v11 = vld [vmem:[#allocation2 + $0x188] sm:$0xff]  ;;  %v162_v12 = vld [vmem:[#allocation2 + $0x278] sm:$0xff] }
  0x9d   :  { %957 = vmatpush.msrb.mxu3 %v563_v35  ;;  %918 = vmatmul.f32.vlgmr.msrb.gmra.mxu1 %v623_v36  ;;  %v196_v13 = vld [vmem:[#allocation2 + $0x388] sm:$0xff]  ;;  %v130_v15 = vld [vmem:[#allocation2 + $0x178] sm:$0xff] }
  0x9e   :  { %958 = vmatmul.f32.vlgmr.msrb.gmra.mxu3 %v625_v37  ;;  %963 = vmatpush.msra.mxu0 %v112_v38  ;;  %v96_v14 = vld [vmem:[#allocation2 + $0x68] sm:$0xff]  ;;  %v194_v17 = vld [vmem:[#allocation2 + $0x378] sm:$0xff] }
  0x9f   :  { %982 = vmatpush.msra.mxu1 %v146_v39  ;;  %1003 = vmatpush.msra.mxu2 %v176_v40  ;;  %v160_v16 = vld [vmem:[#allocation2 + $0x268] sm:$0xff]  ;;  %v94_v18 = vld [vmem:[#allocation2 + $0x58] sm:$0xff] }
  0xa0   :  { %1022 = vmatpush.msra.mxu3 %v210_v41  ;;  %964 = vmatpush.msra.mxu0 %v110_v42  ;;  %v128_v19 = vld [vmem:[#allocation2 + $0x168] sm:$0xff]  ;;  %v158_v20 = vld [vmem:[#allocation2 + $0x258] sm:$0xff] }
  0xa1   :  { %983 = vmatpush.msra.mxu1 %v144_v43  ;;  %1004 = vmatpush.msra.mxu2 %v174_v44  ;;  %v192_v21 = vld [vmem:[#allocation2 + $0x368] sm:$0xff]  ;;  %v126_v23 = vld [vmem:[#allocation2 + $0x158] sm:$0xff] }
  0xa2   :  { %1023 = vmatpush.msra.mxu3 %v208_v45  ;;  %965 = vmatpush.msra.mxu0 %v108_v46  ;;  %v92_v22 = vld [vmem:[#allocation2 + $0x48] sm:$0xff]  ;;  %v190_v25 = vld [vmem:[#allocation2 + $0x358] sm:$0xff] }
  0xa3   :  { %984 = vmatpush.msra.mxu1 %v142_v47  ;;  %1005 = vmatpush.msra.mxu2 %v172_v52  ;;  %v156_v24 = vld [vmem:[#allocation2 + $0x248] sm:$0xff]  ;;  %v90_v26 = vld [vmem:[#allocation2 + $0x38] sm:$0xff] }
  0xa4   :  { %1024 = vmatpush.msra.mxu3 %v206_v53  ;;  %966 = vmatpush.msra.mxu0 %v106_v54  ;;  %v124_v27 = vld [vmem:[#allocation2 + $0x148] sm:$0xff]  ;;  %v154_v28 = vld [vmem:[#allocation2 + $0x238] sm:$0xff] }
  0xa5   :  { %985 = vmatpush.msra.mxu1 %v140_v55  ;;  %1006 = vmatpush.msra.mxu2 %v170_v56  ;;  %v188_v29 = vld [vmem:[#allocation2 + $0x348] sm:$0xff]  ;;  %v122_v31 = vld [vmem:[#allocation2 + $0x138] sm:$0xff] }
  0xa6   :  { %1025 = vmatpush.msra.mxu3 %v204_v57  ;;  %967 = vmatpush.msra.mxu0 %v104_v58  ;;  %v88_v30 = vld [vmem:[#allocation2 + $0x28] sm:$0xff]  ;;  %v186_v33 = vld [vmem:[#allocation2 + $0x338] sm:$0xff] }
  0xa7   :  { %986 = vmatpush.msra.mxu1 %v138_v59  ;;  %1007 = vmatpush.msra.mxu2 %v168_v60  ;;  %v152_v32 = vld [vmem:[#allocation2 + $0x228] sm:$0xff]  ;;  %v86_v34 = vld [vmem:[#allocation2 + $0x18] sm:$0xff] }
  0xa8   :  { %1026 = vmatpush.msra.mxu3 %v202_v61  ;;  %968 = vmatpush.msra.mxu0 %v102_v62  ;;  %v120_v35 = vld [vmem:[#allocation2 + $0x128] sm:$0xff]  ;;  %v150_v36 = vld [vmem:[#allocation2 + $0x218] sm:$0xff] }
  0xa9   :  { %987 = vmatpush.msra.mxu1 %v136_v63  ;;  %1008 = vmatpush.msra.mxu2 %v166_v4  ;;  %v184_v37 = vld [vmem:[#allocation2 + $0x328] sm:$0xff]  ;;  %v118_v39 = vld [vmem:[#allocation2 + $0x118] sm:$0xff] }
  0xaa   :  { %1027 = vmatpush.msra.mxu3 %v200_v5  ;;  %969 = vmatpush.msra.mxu0 %v100_v6  ;;  %v84_v38 = vld [vmem:[#allocation2 + $0x8] sm:$0xff]  ;;  %v182_v41 = vld [vmem:[#allocation2 + $0x318] sm:$0xff] }
  0xab   :  { %988 = vmatpush.msra.mxu1 %v134_v7  ;;  %1009 = vmatpush.msra.mxu2 %v164_v8  ;;  %v148_v40 = vld [vmem:[#allocation2 + $0x208] sm:$0xff]  ;;  %v242_v42 = vld [vmem:[#allocation2 + $0x4f8] sm:$0xff] }
  0xac   :  { %1028 = vmatpush.msra.mxu3 %v198_v9  ;;  %970 = vmatpush.msra.mxu0 %v98_v10  ;;  %v306_v43 = vld [vmem:[#allocation2 + $0x6f8] sm:$0xff]  ;;  %v116_v44 = vld [vmem:[#allocation2 + $0x108] sm:$0xff] }
  0xad   :  { %989 = vmatpush.msra.mxu1 %v132_v11  ;;  %1010 = vmatpush.msra.mxu2 %v162_v12  ;;  %v180_v45 = vld [vmem:[#allocation2 + $0x308] sm:$0xff]  ;;  %v274_v47 = vld [vmem:[#allocation2 + $0x5f8] sm:$0xff] }
  0xae   :  { %1029 = vmatpush.msra.mxu3 %v196_v13  ;;  %971 = vmatpush.msra.mxu0 %v96_v14  ;;  %v240_v46 = vld [vmem:[#allocation2 + $0x4e8] sm:$0xff]  ;;  %v338_v53 = vld [vmem:[#allocation2 + $0x7f8] sm:$0xff] }
  0xaf   :  { %990 = vmatpush.msra.mxu1 %v130_v15  ;;  %1011 = vmatpush.msra.mxu2 %v160_v16  ;;  %v304_v52 = vld [vmem:[#allocation2 + $0x6e8] sm:$0xff]  ;;  %v238_v54 = vld [vmem:[#allocation2 + $0x4d8] sm:$0xff] }
  0xb0   :  { %1030 = vmatpush.msra.mxu3 %v194_v17  ;;  %972 = vmatpush.msra.mxu0 %v94_v18  ;;  %v272_v55 = vld [vmem:[#allocation2 + $0x5e8] sm:$0xff]  ;;  %v302_v56 = vld [vmem:[#allocation2 + $0x6d8] sm:$0xff] }
  0xb1   :  { %991 = vmatpush.msra.mxu1 %v128_v19  ;;  %1012 = vmatpush.msra.mxu2 %v158_v20  ;;  %v336_v57 = vld [vmem:[#allocation2 + $0x7e8] sm:$0xff]  ;;  %v270_v59 = vld [vmem:[#allocation2 + $0x5d8] sm:$0xff] }
  0xb2   :  { %1031 = vmatpush.msra.mxu3 %v192_v21  ;;  %973 = vmatpush.msra.mxu0 %v92_v22  ;;  %v236_v58 = vld [vmem:[#allocation2 + $0x4c8] sm:$0xff]  ;;  %v334_v61 = vld [vmem:[#allocation2 + $0x7d8] sm:$0xff] }
  0xb3   :  { %992 = vmatpush.msra.mxu1 %v126_v23  ;;  %1013 = vmatpush.msra.mxu2 %v156_v24  ;;  %v300_v60 = vld [vmem:[#allocation2 + $0x6c8] sm:$0xff]  ;;  %v234_v62 = vld [vmem:[#allocation2 + $0x4b8] sm:$0xff] }
  0xb4   :  { %1032 = vmatpush.msra.mxu3 %v190_v25  ;;  %974 = vmatpush.msra.mxu0 %v90_v26  ;;  %v268_v63 = vld [vmem:[#allocation2 + $0x5c8] sm:$0xff]  ;;  %v298_v4 = vld [vmem:[#allocation2 + $0x6b8] sm:$0xff] }
  0xb5   :  { %993 = vmatpush.msra.mxu1 %v124_v27  ;;  %1014 = vmatpush.msra.mxu2 %v154_v28  ;;  %v332_v5 = vld [vmem:[#allocation2 + $0x7c8] sm:$0xff]  ;;  %v266_v7 = vld [vmem:[#allocation2 + $0x5b8] sm:$0xff] }
  0xb6   :  { %1033 = vmatpush.msra.mxu3 %v188_v29  ;;  %975 = vmatpush.msra.mxu0 %v88_v30  ;;  %v232_v6 = vld [vmem:[#allocation2 + $0x4a8] sm:$0xff]  ;;  %v330_v9 = vld [vmem:[#allocation2 + $0x7b8] sm:$0xff] }
  0xb7   :  { %994 = vmatpush.msra.mxu1 %v122_v31  ;;  %1015 = vmatpush.msra.mxu2 %v152_v32  ;;  %v296_v8 = vld [vmem:[#allocation2 + $0x6a8] sm:$0xff]  ;;  %v230_v10 = vld [vmem:[#allocation2 + $0x498] sm:$0xff] }
  0xb8   :  { %1034 = vmatpush.msra.mxu3 %v186_v33  ;;  %976 = vmatpush.msra.mxu0 %v86_v34  ;;  %v264_v11 = vld [vmem:[#allocation2 + $0x5a8] sm:$0xff]  ;;  %v294_v12 = vld [vmem:[#allocation2 + $0x698] sm:$0xff] }
  0xb9   :  { %995 = vmatpush.msra.mxu1 %v120_v35  ;;  %1016 = vmatpush.msra.mxu2 %v150_v36  ;;  %v328_v13 = vld [vmem:[#allocation2 + $0x7a8] sm:$0xff]  ;;  %v262_v15 = vld [vmem:[#allocation2 + $0x598] sm:$0xff] }
  0xba   :  { %1035 = vmatpush.msra.mxu3 %v184_v37  ;;  %977 = vmatpush.msra.mxu0 %v84_v38  ;;  %v228_v14 = vld [vmem:[#allocation2 + $0x488] sm:$0xff]  ;;  %v326_v17 = vld [vmem:[#allocation2 + $0x798] sm:$0xff] }
  0xbb   :  { %996 = vmatpush.msra.mxu1 %v118_v39  ;;  %1017 = vmatpush.msra.mxu2 %v148_v40  ;;  %v292_v16 = vld [vmem:[#allocation2 + $0x688] sm:$0xff]  ;;  %v226_v18 = vld [vmem:[#allocation2 + $0x478] sm:$0xff] }
  0xbc   :  { %1036 = vmatpush.msra.mxu3 %v182_v41  ;;  %1042 = vmatpush.msrb.mxu0 %v242_v42  ;;  %v260_v19 = vld [vmem:[#allocation2 + $0x588] sm:$0xff]  ;;  %v290_v20 = vld [vmem:[#allocation2 + $0x678] sm:$0xff] }
  0xbd   :  { %1082 = vmatpush.msrb.mxu2 %v306_v43  ;;  %997 = vmatpush.msra.mxu1 %v116_v44  ;;  %v324_v21 = vld [vmem:[#allocation2 + $0x788] sm:$0xff]  ;;  %v258_v23 = vld [vmem:[#allocation2 + $0x578] sm:$0xff] }
  0xbe   :  { %1037 = vmatpush.msra.mxu3 %v180_v45  ;;  %1043 = vmatpush.msrb.mxu0 %v240_v46  ;;  %v224_v22 = vld [vmem:[#allocation2 + $0x468] sm:$0xff]  ;;  %v322_v25 = vld [vmem:[#allocation2 + $0x778] sm:$0xff] }
  0xbf   :  { %1062 = vmatpush.msrb.mxu1 %v274_v47  ;;  %1083 = vmatpush.msrb.mxu2 %v304_v52  ;;  %v288_v24 = vld [vmem:[#allocation2 + $0x668] sm:$0xff]  ;;  %v222_v26 = vld [vmem:[#allocation2 + $0x458] sm:$0xff] }
  0xc0   :  { %1102 = vmatpush.msrb.mxu3 %v338_v53  ;;  %1044 = vmatpush.msrb.mxu0 %v238_v54  ;;  %v256_v27 = vld [vmem:[#allocation2 + $0x568] sm:$0xff]  ;;  %v286_v28 = vld [vmem:[#allocation2 + $0x658] sm:$0xff] }
  0xc1   :  { %1063 = vmatpush.msrb.mxu1 %v272_v55  ;;  %1084 = vmatpush.msrb.mxu2 %v302_v56  ;;  %v320_v29 = vld [vmem:[#allocation2 + $0x768] sm:$0xff]  ;;  %v254_v31 = vld [vmem:[#allocation2 + $0x558] sm:$0xff] }
  0xc2   :  { %1103 = vmatpush.msrb.mxu3 %v336_v57  ;;  %1045 = vmatpush.msrb.mxu0 %v236_v58  ;;  %v220_v30 = vld [vmem:[#allocation2 + $0x448] sm:$0xff]  ;;  %v318_v33 = vld [vmem:[#allocation2 + $0x758] sm:$0xff] }
  0xc3   :  { %1064 = vmatpush.msrb.mxu1 %v270_v59  ;;  %1085 = vmatpush.msrb.mxu2 %v300_v60  ;;  %v284_v32 = vld [vmem:[#allocation2 + $0x648] sm:$0xff]  ;;  %v218_v34 = vld [vmem:[#allocation2 + $0x438] sm:$0xff] }
  0xc4   :  { %1104 = vmatpush.msrb.mxu3 %v334_v61  ;;  %1046 = vmatpush.msrb.mxu0 %v234_v62  ;;  %v252_v35 = vld [vmem:[#allocation2 + $0x548] sm:$0xff]  ;;  %v282_v36 = vld [vmem:[#allocation2 + $0x638] sm:$0xff] }
  0xc5   :  { %1065 = vmatpush.msrb.mxu1 %v268_v63  ;;  %1086 = vmatpush.msrb.mxu2 %v298_v4  ;;  %v316_v37 = vld [vmem:[#allocation2 + $0x748] sm:$0xff]  ;;  %v250_v39 = vld [vmem:[#allocation2 + $0x538] sm:$0xff] }
  0xc6   :  { %1105 = vmatpush.msrb.mxu3 %v332_v5  ;;  %1047 = vmatpush.msrb.mxu0 %v232_v6  ;;  %v216_v38 = vld [vmem:[#allocation2 + $0x428] sm:$0xff]  ;;  %v314_v41 = vld [vmem:[#allocation2 + $0x738] sm:$0xff] }
  0xc7   :  { %1066 = vmatpush.msrb.mxu1 %v266_v7  ;;  %1087 = vmatpush.msrb.mxu2 %v296_v8  ;;  %v280_v40 = vld [vmem:[#allocation2 + $0x628] sm:$0xff]  ;;  %v214_v42 = vld [vmem:[#allocation2 + $0x418] sm:$0xff] }
  0xc8   :  { %1106 = vmatpush.msrb.mxu3 %v330_v9  ;;  %1048 = vmatpush.msrb.mxu0 %v230_v10  ;;  %v248_v43 = vld [vmem:[#allocation2 + $0x528] sm:$0xff]  ;;  %v278_v44 = vld [vmem:[#allocation2 + $0x618] sm:$0xff] }
  0xc9   :  { %1067 = vmatpush.msrb.mxu1 %v264_v11  ;;  %1088 = vmatpush.msrb.mxu2 %v294_v12  ;;  %v312_v45 = vld [vmem:[#allocation2 + $0x728] sm:$0xff]  ;;  %v246_v47 = vld [vmem:[#allocation2 + $0x518] sm:$0xff] }
  0xca   :  { %1107 = vmatpush.msrb.mxu3 %v328_v13  ;;  %1049 = vmatpush.msrb.mxu0 %v228_v14  ;;  %v212_v46 = vld [vmem:[#allocation2 + $0x408] sm:$0xff]  ;;  %v310_v53 = vld [vmem:[#allocation2 + $0x718] sm:$0xff] }
  0xcb   :  { %1068 = vmatpush.msrb.mxu1 %v262_v15  ;;  %1089 = vmatpush.msrb.mxu2 %v292_v16  ;;  %v276_v52 = vld [vmem:[#allocation2 + $0x608] sm:$0xff]  ;;  %v370_v54 = vld [vmem:[#allocation2 + $0x8f8] sm:$0xff] }
  0xcc   :  { %1108 = vmatpush.msrb.mxu3 %v326_v17  ;;  %1050 = vmatpush.msrb.mxu0 %v226_v18  ;;  %v434_v55 = vld [vmem:[#allocation2 + $0xaf8] sm:$0xff]  ;;  %v244_v56 = vld [vmem:[#allocation2 + $0x508] sm:$0xff] }
  0xcd   :  { %1069 = vmatpush.msrb.mxu1 %v260_v19  ;;  %1090 = vmatpush.msrb.mxu2 %v290_v20  ;;  %v308_v57 = vld [vmem:[#allocation2 + $0x708] sm:$0xff]  ;;  %v402_v59 = vld [vmem:[#allocation2 + $0x9f8] sm:$0xff] }
  0xce   :  { %1109 = vmatpush.msrb.mxu3 %v324_v21  ;;  %1051 = vmatpush.msrb.mxu0 %v224_v22  ;;  %v368_v58 = vld [vmem:[#allocation2 + $0x8e8] sm:$0xff]  ;;  %v466_v61 = vld [vmem:[#allocation2 + $0xbf8] sm:$0xff] }
  0xcf   :  { %1070 = vmatpush.msrb.mxu1 %v258_v23  ;;  %1091 = vmatpush.msrb.mxu2 %v288_v24  ;;  %v432_v60 = vld [vmem:[#allocation2 + $0xae8] sm:$0xff]  ;;  %v366_v62 = vld [vmem:[#allocation2 + $0x8d8] sm:$0xff] }
  0xd0   :  { %1110 = vmatpush.msrb.mxu3 %v322_v25  ;;  %1052 = vmatpush.msrb.mxu0 %v222_v26  ;;  %v400_v63 = vld [vmem:[#allocation2 + $0x9e8] sm:$0xff]  ;;  %v430_v4 = vld [vmem:[#allocation2 + $0xad8] sm:$0xff] }
  0xd1   :  { %1071 = vmatpush.msrb.mxu1 %v256_v27  ;;  %1092 = vmatpush.msrb.mxu2 %v286_v28  ;;  %v398_v5 = vld [vmem:[#allocation2 + $0x9d8] sm:$0xff]  ;;  %v428_v6 = vld [vmem:[#allocation2 + $0xac8] sm:$0xff] }
  0xd2   :  { %1111 = vmatpush.msrb.mxu3 %v320_v29  ;;  %1053 = vmatpush.msrb.mxu0 %v220_v30  ;;  %v462_v7 = vld [vmem:[#allocation2 + $0xbd8] sm:$0xff]  ;;  %v460_v9 = vld [vmem:[#allocation2 + $0xbc8] sm:$0xff] }
  0xd3   :  { %1072 = vmatpush.msrb.mxu1 %v254_v31  ;;  %1093 = vmatpush.msrb.mxu2 %v284_v32  ;;  %v362_v8 = vld [vmem:[#allocation2 + $0x8b8] sm:$0xff]  ;;  %v360_v10 = vld [vmem:[#allocation2 + $0x8a8] sm:$0xff] }
  0xd4   :  { %1112 = vmatpush.msrb.mxu3 %v318_v33  ;;  %1054 = vmatpush.msrb.mxu0 %v218_v34  ;;  %v394_v11 = vld [vmem:[#allocation2 + $0x9b8] sm:$0xff]  ;;  %v424_v12 = vld [vmem:[#allocation2 + $0xaa8] sm:$0xff] }
  0xd5   :  { %1073 = vmatpush.msrb.mxu1 %v252_v35  ;;  %1094 = vmatpush.msrb.mxu2 %v282_v36  ;;  %v458_v13 = vld [vmem:[#allocation2 + $0xbb8] sm:$0xff]  ;;  %v392_v15 = vld [vmem:[#allocation2 + $0x9a8] sm:$0xff] }
  0xd6   :  { %1113 = vmatpush.msrb.mxu3 %v316_v37  ;;  %1055 = vmatpush.msrb.mxu0 %v216_v38  ;;  %v358_v14 = vld [vmem:[#allocation2 + $0x898] sm:$0xff]  ;;  %v456_v17 = vld [vmem:[#allocation2 + $0xba8] sm:$0xff] }
  0xd7   :  { %1074 = vmatpush.msrb.mxu1 %v250_v39  ;;  %1095 = vmatpush.msrb.mxu2 %v280_v40  ;;  %v422_v16 = vld [vmem:[#allocation2 + $0xa98] sm:$0xff]  ;;  %v420_v19 = vld [vmem:[#allocation2 + $0xa88] sm:$0xff] }
  0xd8   :  { %1114 = vmatpush.msrb.mxu3 %v314_v41  ;;  %1056 = vmatpush.msrb.mxu0 %v214_v42  ;;  %v390_v18 = vld [vmem:[#allocation2 + $0x998] sm:$0xff]  ;;  %v452_v22 = vld [vmem:[#allocation2 + $0xb88] sm:$0xff] }
  0xd9   :  { %1075 = vmatpush.msrb.mxu1 %v248_v43  ;;  %1096 = vmatpush.msrb.mxu2 %v278_v44  ;;  %v454_v20 = vld [vmem:[#allocation2 + $0xb98] sm:$0xff]  ;;  %v352_v23 = vld [vmem:[#allocation2 + $0x868] sm:$0xff] }
  0xda   :  { %1115 = vmatpush.msrb.mxu3 %v312_v45  ;;  %1057 = vmatpush.msrb.mxu0 %v212_v46  ;;  %v418_v21 = vld [vmem:[#allocation2 + $0xa78] sm:$0xff]  ;;  %v384_v27 = vld [vmem:[#allocation2 + $0x968] sm:$0xff] }
  0xdb   :  { %1076 = vmatpush.msrb.mxu1 %v246_v47  ;;  %1097 = vmatpush.msrb.mxu2 %v276_v52  ;;  %v386_v24 = vld [vmem:[#allocation2 + $0x978] sm:$0xff]  ;;  %v448_v29 = vld [vmem:[#allocation2 + $0xb68] sm:$0xff] }
  0xdc   :  { %1116 = vmatpush.msrb.mxu3 %v310_v53  ;;  %978 = vmatmul.f32.vlgmr.msra.gmra.mxu0 %v1544_v48  ;;  %v464_v48 = vld [vmem:[#allocation2 + $0xbe8] sm:$0xff]  ;;  %v450_v25 = vld [vmem:[#allocation2 + $0xb78] sm:$0xff] }
  0xdd   :  { %1018 = vmatmul.f32.vlgmr.msra.gmra.mxu2 %v1546_v49  ;;  %1122 = vmatpush.msra.mxu0 %v370_v54  ;;  %v364_v49 = vld [vmem:[#allocation2 + $0x8c8] sm:$0xff]  ;;  %v350_v26 = vld [vmem:[#allocation2 + $0x858] sm:$0xff] }
  0xde   :  { %1162 = vmatpush.msra.mxu2 %v434_v55  ;;  %1077 = vmatpush.msrb.mxu1 %v244_v56  ;;  %v414_v28 = vld [vmem:[#allocation2 + $0xa58] sm:$0xff]  ;;  %v348_v30 = vld [vmem:[#allocation2 + $0x848] sm:$0xff] }
  0xdf   :  { %1117 = vmatpush.msrb.mxu3 %v308_v57  ;;  %998 = vmatmul.f32.vlgmr.msra.gmra.mxu1 %v1548_v50  ;;  %v396_v50 = vld [vmem:[#allocation2 + $0x9c8] sm:$0xff]  ;;  %v382_v31 = vld [vmem:[#allocation2 + $0x958] sm:$0xff] }
  0xe0   :  { %1038 = vmatmul.f32.vlgmr.msra.gmra.mxu3 %v1550_v51  ;;  %1123 = vmatpush.msra.mxu0 %v368_v58  ;;  %v426_v51 = vld [vmem:[#allocation2 + $0xab8] sm:$0xff]  ;;  %v412_v32 = vld [vmem:[#allocation2 + $0xa48] sm:$0xff] }
  0xe1   :  { %1142 = vmatpush.msra.mxu1 %v402_v59  ;;  %1163 = vmatpush.msra.mxu2 %v432_v60  ;;  %v446_v33 = vld [vmem:[#allocation2 + $0xb58] sm:$0xff]  ;;  %v380_v35 = vld [vmem:[#allocation2 + $0x948] sm:$0xff] }
  0xe2   :  { %1182 = vmatpush.msra.mxu3 %v466_v61  ;;  %1124 = vmatpush.msra.mxu0 %v366_v62  ;;  %v346_v34 = vld [vmem:[#allocation2 + $0x838] sm:$0xff]  ;;  %v444_v37 = vld [vmem:[#allocation2 + $0xb48] sm:$0xff] }
  0xe3   :  { %1143 = vmatpush.msra.mxu1 %v400_v63  ;;  %1164 = vmatpush.msra.mxu2 %v430_v4  ;;  %v410_v36 = vld [vmem:[#allocation2 + $0xa38] sm:$0xff]  ;;  %v344_v38 = vld [vmem:[#allocation2 + $0x828] sm:$0xff]  ;;  %v1377_v4 = vld.sshfl [vmem:[#allocation1 + $0x8] sm:$0xff pattern:$0x73625140] }
  0xe4   :  { %1183 = vmatpush.msra.mxu3 %v464_v48  ;;  %1125 = vmatpush.msra.mxu0 %v364_v49  ;;  %v378_v39 = vld [vmem:[#allocation2 + $0x938] sm:$0xff]  ;;  %v408_v40 = vld [vmem:[#allocation2 + $0xa28] sm:$0xff]  ;;  %v1378_v48 = vld.sshfl [vmem:[#allocation1 + $0x18] sm:$0xff pattern:$0x73625140] }
  0xe5   :  { %1144 = vmatpush.msra.mxu1 %v398_v5  ;;  %1165 = vmatpush.msra.mxu2 %v428_v6  ;;  %v442_v41 = vld [vmem:[#allocation2 + $0xb38] sm:$0xff]  ;;  %v376_v43 = vld [vmem:[#allocation2 + $0x928] sm:$0xff] }
  0xe6   :  { %1184 = vmatpush.msra.mxu3 %v462_v7  ;;  %1098 = vmatmul.f32.vlgmr.msrb.gmra.mxu2 %v1555_v0  ;;  %v356_v0 = vld [vmem:[#allocation2 + $0x888] sm:$0xff]  ;;  %v342_v42 = vld [vmem:[#allocation2 + $0x818] sm:$0xff] }
  0xe7   :  { %1126 = vmatpush.msra.mxu0 %v362_v8  ;;  %1145 = vmatpush.msra.mxu1 %v396_v50  ;;  %v406_v44 = vld [vmem:[#allocation2 + $0xa18] sm:$0xff]  ;;  %v440_v45 = vld [vmem:[#allocation2 + $0xb28] sm:$0xff]  ;;  %v1579_v8 = vld [vmem:[#allocation4] sm:$0x3] }
  0xe8   :  { %1166 = vmatpush.msra.mxu2 %v426_v51  ;;  %1185 = vmatpush.msra.mxu3 %v460_v9  ;;  %v340_v46 = vld [vmem:[#allocation2 + $0x808] sm:$0xff]  ;;  %v374_v47 = vld [vmem:[#allocation2 + $0x918] sm:$0xff] }
  0xe9   :  { %1058 = vmatmul.f32.vlgmr.msrb.gmra.mxu0 %v1557_v1  ;;  %1118 = vmatmul.f32.vlgmr.msrb.gmra.mxu3 %v1559_v2  ;;  %v354_v1 = vld [vmem:[#allocation2 + $0x878] sm:$0xff]  ;;  %v388_v2 = vld [vmem:[#allocation2 + $0x988] sm:$0xff] }
  0xea   :  { %1127 = vmatpush.msra.mxu0 %v360_v10  ;;  %1146 = vmatpush.msra.mxu1 %v394_v11  ;;  %v404_v52 = vld [vmem:[#allocation2 + $0xa08] sm:$0xff]  ;;  %v438_v53 = vld [vmem:[#allocation2 + $0xb18] sm:$0xff] }
  0xeb   :  { %1167 = vmatpush.msra.mxu2 %v424_v12  ;;  %1186 = vmatpush.msra.mxu3 %v458_v13  ;;  %v498_v54 = vld [vmem:[#allocation2 + $0xcf8] sm:$0xff]  ;;  %v372_v56 = vld [vmem:[#allocation2 + $0x908] sm:$0xff]  ;;  %v597_v13 = vperm.slane %v1579_v8, 0 }
  0xec   :  { %1078 = vmatmul.f32.vlgmr.msrb.gmra.mxu1 %v1561_v3  ;;  %1128 = vmatpush.msra.mxu0 %v358_v14  ;;  %v416_v3 = vld [vmem:[#allocation2 + $0xa68] sm:$0xff]  ;;  %v562_v55 = vld [vmem:[#allocation2 + $0xef8] sm:$0xff] }
  0xed   :  { %1147 = vmatpush.msra.mxu1 %v392_v15  ;;  %1168 = vmatpush.msra.mxu2 %v422_v16  ;;  %v436_v57 = vld [vmem:[#allocation2 + $0xb08] sm:$0xff]  ;;  %v1375_v58 = vld.sshfl [vmem:[#allocation1] sm:$0xff pattern:$0x73625140]  ;;  %v659_v16 = vpop.f32.mrf.mxu0 }
  0xee   :  { %1187 = vmatpush.msra.mxu3 %v456_v17  ;;  %1129 = vmatpush.msra.mxu0 %v356_v0  ;;  %v1376_v59 = vld.sshfl [vmem:[#allocation1 + $0x10] sm:$0xff pattern:$0x73625140]  ;;  %v530_v61 = vld [vmem:[#allocation2 + $0xdf8] sm:$0xff] }
  0xef   :  { %1148 = vmatpush.msra.mxu1 %v390_v18  ;;  %1169 = vmatpush.msra.mxu2 %v420_v19  ;;  %v496_v60 = vld [vmem:[#allocation2 + $0xce8] sm:$0xff]  ;;  %v594_v63 = vld [vmem:[#allocation2 + $0xff8] sm:$0xff] }
  0xf0   :  { %1188 = vmatpush.msra.mxu3 %v454_v20  ;;  %1130 = vmatpush.msra.mxu0 %v354_v1  ;;  %v560_v62 = vld [vmem:[#allocation2 + $0xee8] sm:$0xff]  ;;  %v494_v49 = vld [vmem:[#allocation2 + $0xcd8] sm:$0xff] }
  0xf1   :  { %1149 = vmatpush.msra.mxu1 %v388_v2  ;;  %1170 = vmatpush.msra.mxu2 %v418_v21  ;;  %v528_v5 = vld [vmem:[#allocation2 + $0xde8] sm:$0xff]  ;;  %v558_v6 = vld [vmem:[#allocation2 + $0xed8] sm:$0xff]  ;;  %v660_v2 = vadd.f32 %v659_v16, %v597_v13 }
  0xf2   :  { %1189 = vmatpush.msra.mxu3 %v452_v22  ;;  %1131 = vmatpush.msra.mxu0 %v352_v23  ;;  %v592_v7 = vld [vmem:[#allocation2 + $0xfe8] sm:$0xff]  ;;  %v526_v51 = vld [vmem:[#allocation2 + $0xdd8] sm:$0xff]  ;;  %v679_v23 = vpop.f32.mrf.mxu1 }
  0xf3   :  { %1150 = vmatpush.msra.mxu1 %v386_v24  ;;  %1171 = vmatpush.msra.mxu2 %v416_v3  ;;  %v492_v50 = vld [vmem:[#allocation2 + $0xcc8] sm:$0xff]  ;;  %v590_v10 = vld [vmem:[#allocation2 + $0xfd8] sm:$0xff] }
  0xf4   :  { %1190 = vmatpush.msra.mxu3 %v450_v25  ;;  %1132 = vmatpush.msra.mxu0 %v350_v26  ;;  %v556_v9 = vld [vmem:[#allocation2 + $0xec8] sm:$0xff]  ;;  %v490_v11 = vld [vmem:[#allocation2 + $0xcb8] sm:$0xff] }
  0xf5   :  { %1151 = vmatpush.msra.mxu1 %v384_v27  ;;  %1172 = vmatpush.msra.mxu2 %v414_v28  ;;  %v524_v12 = vld [vmem:[#allocation2 + $0xdc8] sm:$0xff]  ;;  %v554_v14 = vld [vmem:[#allocation2 + $0xeb8] sm:$0xff] }
  0xf6   :  { %1191 = vmatpush.msra.mxu3 %v448_v29  ;;  %1133 = vmatpush.msra.mxu0 %v348_v30  ;;  %v588_v15 = vld [vmem:[#allocation2 + $0xfc8] sm:$0xff]  ;;  %v522_v0 = vld [vmem:[#allocation2 + $0xdb8] sm:$0xff]  ;;  %v680_v29 = vadd.f32 %v679_v23, %v660_v2 }
  0xf7   :  { %1152 = vmatpush.msra.mxu1 %v382_v31  ;;  %1173 = vmatpush.msra.mxu2 %v412_v32  ;;  %v488_v17 = vld [vmem:[#allocation2 + $0xca8] sm:$0xff]  ;;  %v586_v19 = vld [vmem:[#allocation2 + $0xfb8] sm:$0xff]  ;;  %v699_v32 = vpop.f32.mrf.mxu2 }
  0xf8   :  { %1192 = vmatpush.msra.mxu3 %v446_v33  ;;  %1134 = vmatpush.msra.mxu0 %v346_v34  ;;  %v552_v18 = vld [vmem:[#allocation2 + $0xea8] sm:$0xff]  ;;  %v486_v20 = vld [vmem:[#allocation2 + $0xc98] sm:$0xff] }
  0xf9   :  { %1153 = vmatpush.msra.mxu1 %v380_v35  ;;  %1174 = vmatpush.msra.mxu2 %v410_v36  ;;  %v520_v1 = vld [vmem:[#allocation2 + $0xda8] sm:$0xff]  ;;  %v550_v21 = vld [vmem:[#allocation2 + $0xe98] sm:$0xff] }
  0xfa   :  { %1193 = vmatpush.msra.mxu3 %v444_v37  ;;  %1135 = vmatpush.msra.mxu0 %v344_v38  ;;  %v584_v22 = vld [vmem:[#allocation2 + $0xfa8] sm:$0xff]  ;;  %v518_v3 = vld [vmem:[#allocation2 + $0xd98] sm:$0xff] }
  0xfb   :  { %1154 = vmatpush.msra.mxu1 %v378_v39  ;;  %1175 = vmatpush.msra.mxu2 %v408_v40  ;;  %v484_v24 = vld [vmem:[#allocation2 + $0xc88] sm:$0xff]  ;;  %v582_v26 = vld [vmem:[#allocation2 + $0xf98] sm:$0xff]  ;;  %v700_v39 = vadd.f32 %v699_v32, %v680_v29 }
  0xfc   :  { %1194 = vmatpush.msra.mxu3 %v442_v41  ;;  %1136 = vmatpush.msra.mxu0 %v342_v42  ;;  %v548_v25 = vld [vmem:[#allocation2 + $0xe88] sm:$0xff]  ;;  %v482_v27 = vld [vmem:[#allocation2 + $0xc78] sm:$0xff]  ;;  %v719_v42 = vpop.f32.mrf.mxu3 }
  0xfd   :  { %1155 = vmatpush.msra.mxu1 %v376_v43  ;;  %1176 = vmatpush.msra.mxu2 %v406_v44  ;;  %v516_v28 = vld [vmem:[#allocation2 + $0xd88] sm:$0xff]  ;;  %v546_v30 = vld [vmem:[#allocation2 + $0xe78] sm:$0xff] }
  0xfe   :  { %1195 = vmatpush.msra.mxu3 %v440_v45  ;;  %1137 = vmatpush.msra.mxu0 %v340_v46  ;;  %v580_v31 = vld [vmem:[#allocation2 + $0xf88] sm:$0xff]  ;;  %v514_v34 = vld [vmem:[#allocation2 + $0xd78] sm:$0xff] }
  0xff   :  { %1156 = vmatpush.msra.mxu1 %v374_v47  ;;  %1177 = vmatpush.msra.mxu2 %v404_v52  ;;  %v480_v33 = vld [vmem:[#allocation2 + $0xc68] sm:$0xff]  ;;  %v578_v36 = vld [vmem:[#allocation2 + $0xf78] sm:$0xff] }
 0x100   :  { %1196 = vmatpush.msra.mxu3 %v438_v53  ;;  %1138 = vmatmul.f32.vlgmr.msra.gmra.mxu0 %v1375_v58  ;;  %v544_v35 = vld [vmem:[#allocation2 + $0xe68] sm:$0xff]  ;;  %v478_v37 = vld [vmem:[#allocation2 + $0xc58] sm:$0xff]  ;;  %v720_v53 = vadd.f32 %v719_v42, %v700_v39 }
 0x101   :  { %1178 = vmatmul.f32.vlgmr.msra.gmra.mxu2 %v1376_v59  ;;  %1202 = vmatpush.msrb.mxu0 %v498_v54  ;;  %v512_v38 = vld [vmem:[#allocation2 + $0xd68] sm:$0xff]  ;;  %v542_v40 = vld [vmem:[#allocation2 + $0xe58] sm:$0xff] }
 0x102   :  { %1242 = vmatpush.msrb.mxu2 %v562_v55  ;;  %1157 = vmatpush.msra.mxu1 %v372_v56  ;;  %v576_v41 = vld [vmem:[#allocation2 + $0xf68] sm:$0xff]  ;;  %v510_v44 = vld [vmem:[#allocation2 + $0xd58] sm:$0xff]  ;;  %v739_v56 = vpop.f32.mrf.mxu0 }
 0x103   :  { %1197 = vmatpush.msra.mxu3 %v436_v57  ;;  %1158 = vmatmul.f32.vlgmr.msra.gmra.mxu1 %v1377_v4  ;;  %v476_v43 = vld [vmem:[#allocation2 + $0xc48] sm:$0xff]  ;;  %v574_v46 = vld [vmem:[#allocation2 + $0xf58] sm:$0xff] }
 0x104   :  { %1198 = vmatmul.f32.vlgmr.msra.gmra.mxu3 %v1378_v48  ;;  %1203 = vmatpush.msrb.mxu0 %v496_v60  ;;  %v540_v45 = vld [vmem:[#allocation2 + $0xe48] sm:$0xff]  ;;  %v474_v47 = vld [vmem:[#allocation2 + $0xc38] sm:$0xff] }
 0x105   :  { %1222 = vmatpush.msrb.mxu1 %v530_v61  ;;  %1243 = vmatpush.msrb.mxu2 %v560_v62  ;;  %v508_v52 = vld [vmem:[#allocation2 + $0xd48] sm:$0xff]  ;;  %v538_v54 = vld [vmem:[#allocation2 + $0xe38] sm:$0xff] }
 0x106   :  { %1262 = vmatpush.msrb.mxu3 %v594_v63  ;;  %1204 = vmatpush.msrb.mxu0 %v494_v49  ;;  %v572_v55 = vld [vmem:[#allocation2 + $0xf48] sm:$0xff]  ;;  %v506_v58 = vld [vmem:[#allocation2 + $0xd38] sm:$0xff]  ;;  %v740_v63 = vadd.f32 %v739_v56, %v720_v53  ;;  %v759_v49 = vpop.f32.mrf.mxu1 }
 0x107   :  { %1223 = vmatpush.msrb.mxu1 %v528_v5  ;;  %1244 = vmatpush.msrb.mxu2 %v558_v6  ;;  %v472_v57 = vld [vmem:[#allocation2 + $0xc28] sm:$0xff]  ;;  %v570_v60 = vld [vmem:[#allocation2 + $0xf38] sm:$0xff] }
 0x108   :  { %1263 = vmatpush.msrb.mxu3 %v592_v7  ;;  %1205 = vmatpush.msrb.mxu0 %v492_v50  ;;  %v536_v59 = vld [vmem:[#allocation2 + $0xe28] sm:$0xff]  ;;  %v470_v61 = vld [vmem:[#allocation2 + $0xc18] sm:$0xff] }
 0x109   :  { %1224 = vmatpush.msrb.mxu1 %v526_v51  ;;  %1245 = vmatpush.msrb.mxu2 %v556_v9  ;;  %v504_v62 = vld [vmem:[#allocation2 + $0xd28] sm:$0xff]  ;;  %v534_v4 = vld [vmem:[#allocation2 + $0xe18] sm:$0xff]  ;;  %v760_v51 = vadd.f32 %v759_v49, %v740_v63 }
 0x10a   :  { %1264 = vmatpush.msrb.mxu3 %v590_v10  ;;  %1206 = vmatpush.msrb.mxu0 %v490_v11  ;;  %v568_v48 = vld [vmem:[#allocation2 + $0xf28] sm:$0xff]  ;;  %v502_v6 = vld [vmem:[#allocation2 + $0xd18] sm:$0xff]  ;;  %v779_v11 = vpop.f32.mrf.mxu2 }
 0x10b   :  { %1225 = vmatpush.msrb.mxu1 %v524_v12  ;;  %1246 = vmatpush.msrb.mxu2 %v554_v14  ;;  %v468_v5 = vld [vmem:[#allocation2 + $0xc08] sm:$0xff]  ;;  %v566_v50 = vld [vmem:[#allocation2 + $0xf18] sm:$0xff]  ;;  %v780_v16 = vadd.f32 %v779_v11, %v760_v51 }
 0x10c   :  { %1265 = vmatpush.msrb.mxu3 %v588_v15  ;;  %1207 = vmatpush.msrb.mxu0 %v488_v17  ;;  %v532_v7 = vld [vmem:[#allocation2 + $0xe08] sm:$0xff]  ;;  %v1297_v9 = vld [vmem:[#allocation6 + $0x78] sm:$0xff]  ;;  %v1296_v15 = vld [vmem:[#allocation6 + $0x70] sm:$0xff] }
 0x10d   :  { %1226 = vmatpush.msrb.mxu1 %v522_v0  ;;  %1247 = vmatpush.msrb.mxu2 %v552_v18  ;;  %v500_v10 = vld [vmem:[#allocation2 + $0xd08] sm:$0xff]  ;;  %v1379_v13 = vld.sshfl [vmem:[#allocation1 + $0x20] sm:$0xff pattern:$0x73625140]  ;;  %v799_v18 = vpop.f32.mrf.mxu3 }
 0x10e   :  { %1266 = vmatpush.msrb.mxu3 %v586_v19  ;;  %1208 = vmatpush.msrb.mxu0 %v486_v20  ;;  %v564_v12 = vld [vmem:[#allocation2 + $0xf08] sm:$0xff]  ;;  %v1381_v17 = vld.sshfl [vmem:[#allocation1 + $0x28] sm:$0xff pattern:$0x73625140]  ;;  %v800_v2 = vadd.f32 %v799_v18, %v780_v16  ;;  %v1292_v23 = vld [vmem:[#allocation6 + $0x50] sm:$0xff] }
 0x10f   :  { %1227 = vmatpush.msrb.mxu1 %v520_v1  ;;  %1248 = vmatpush.msrb.mxu2 %v550_v21  ;;  %v1380_v14 = vld.sshfl [vmem:[#allocation1 + $0x30] sm:$0xff pattern:$0x73625140]  ;;  %v1382_v19 = vld.sshfl [vmem:[#allocation1 + $0x38] sm:$0xff pattern:$0x73625140]  ;;  %v819_v1 = vpop.f32.mrf.mxu0 }
 0x110   :  { %1267 = vmatpush.msrb.mxu3 %v584_v22  ;;  %1209 = vmatpush.msrb.mxu0 %v484_v24  ;;  %v1295_v0 = vld [vmem:[#allocation6 + $0x68] sm:$0xff]  ;;  %v1294_v20 = vld [vmem:[#allocation6 + $0x60] sm:$0xff]  ;;  %v1293_v21 = vld [vmem:[#allocation6 + $0x58] sm:$0xff]  ;;  %v820_v22 = vadd.f32 %v819_v1, %v800_v2  ;;  %v839_v24 = vpop.f32.mrf.mxu1 }
 0x111   :  { %1228 = vmatpush.msrb.mxu1 %v518_v3  ;;  %1249 = vmatpush.msrb.mxu2 %v548_v25  ;;  %v1291_v3 = vld [vmem:[#allocation6 + $0x48] sm:$0xff]  ;;  %v1289_v29 = vld [vmem:[#allocation6 + $0x38] sm:$0xff]  ;;  %v1308_v56 = vld [vmem:[#allocation6 + $0xd0] sm:$0xff] }
 0x112   :  { %1268 = vmatpush.msrb.mxu3 %v582_v26  ;;  %1210 = vmatpush.msrb.mxu0 %v482_v27  ;;  %v859_v25 = vpop.f32.mrf.mxu2  ;;  %v840_v26 = vadd.f32 %v839_v24, %v820_v22  ;;  %v1290_v27 = vld [vmem:[#allocation6 + $0x40] sm:$0xff]  ;;  %v1311_v53 = vld [vmem:[#allocation6 + $0xe8] sm:$0xff] }
 0x113   :  { %1229 = vmatpush.msrb.mxu1 %v516_v28  ;;  %1250 = vmatpush.msrb.mxu2 %v546_v30 }
 0x114   :  { %1269 = vmatpush.msrb.mxu3 %v580_v31  ;;  %1211 = vmatpush.msrb.mxu0 %v480_v33  ;;  %v860_v28 = vadd.f32 %v859_v25, %v840_v26  ;;  %v1288_v31 = vld [vmem:[#allocation6 + $0x30] sm:$0xff] }
 0x115   :  { %1230 = vmatpush.msrb.mxu1 %v514_v34  ;;  %1251 = vmatpush.msrb.mxu2 %v544_v35  ;;  %v879_v30 = vpop.f32.mrf.mxu3  ;;  %v1287_v34 = vld [vmem:[#allocation6 + $0x28] sm:$0xff] }
 0x116   :  { %1270 = vmatpush.msrb.mxu3 %v578_v36  ;;  %1212 = vmatpush.msrb.mxu0 %v478_v37  ;;  %v880_v33 = vadd.f32 %v879_v30, %v860_v28  ;;  %v1286_v36 = vld [vmem:[#allocation6 + $0x20] sm:$0xff] }
 0x117   :  { %1231 = vmatpush.msrb.mxu1 %v512_v38  ;;  %1252 = vmatpush.msrb.mxu2 %v542_v40  ;;  %v899_v32 = vpop.f32.mrf.mxu0  ;;  %v1285_v38 = vld [vmem:[#allocation6 + $0x18] sm:$0xff] }
 0x118   :  { %1271 = vmatpush.msrb.mxu3 %v576_v41  ;;  %1213 = vmatpush.msrb.mxu0 %v476_v43  ;;  %v900_v35 = vadd.f32 %v899_v32, %v880_v33  ;;  %v1284_v41 = vld [vmem:[#allocation6 + $0x10] sm:$0xff]  ;;  %v1283_v43 = vld [vmem:[#allocation6 + $0x8] sm:$0xff]  ;;  %v1374_v32 = vld [vmem:[#allocation7] ss:$0 sm:$0xff] }
 0x119   :  { %1232 = vmatpush.msrb.mxu1 %v510_v44  ;;  %1253 = vmatpush.msrb.mxu2 %v540_v45  ;;  %v1282_v45 = vld [vmem:[#allocation6] sm:$0xff] }
 0x11a   :  { %1272 = vmatpush.msrb.mxu3 %v574_v46  ;;  %1214 = vmatpush.msrb.mxu0 %v474_v47  ;;  %v919_v37 = vpop.f32.mrf.mxu1  ;;  %v1313_v47 = vld [vmem:[#allocation6 + $0xf8] sm:$0xff] }
 0x11b   :  { %1233 = vmatpush.msrb.mxu1 %v508_v52  ;;  %1254 = vmatpush.msrb.mxu2 %v538_v54  ;;  %v920_v40 = vadd.f32 %v919_v37, %v900_v35  ;;  %v1312_v52 = vld [vmem:[#allocation6 + $0xf0] sm:$0xff]  ;;  %v1310_v54 = vld [vmem:[#allocation6 + $0xe0] sm:$0xff] }
 0x11c   :  { %1273 = vmatpush.msrb.mxu3 %v572_v55  ;;  %1215 = vmatpush.msrb.mxu0 %v472_v57  ;;  %v1309_v55 = vld [vmem:[#allocation6 + $0xd8] sm:$0xff]  ;;  %v1307_v57 = vld [vmem:[#allocation6 + $0xc8] sm:$0xff] }
 0x11d   :  { %1234 = vmatpush.msrb.mxu1 %v506_v58  ;;  %1255 = vmatpush.msrb.mxu2 %v536_v59  ;;  %v598_v58 = vperm.slane %v1579_v8, 1  ;;  %v1301_v8 = vld [vmem:[#allocation6 + $0x98] sm:$0xff] }
 0x11e   :  { %1274 = vmatpush.msrb.mxu3 %v570_v60  ;;  %1216 = vmatpush.msrb.mxu0 %v470_v61  ;;  %v939_v39 = vpop.f32.mrf.mxu2  ;;  %v1306_v60 = vld [vmem:[#allocation6 + $0xc0] sm:$0xff]  ;;  %v1305_v61 = vld [vmem:[#allocation6 + $0xb8] sm:$0xff] }
 0x11f   :  { %1235 = vmatpush.msrb.mxu1 %v504_v62  ;;  %1256 = vmatpush.msrb.mxu2 %v534_v4  ;;  %v940_v42 = vadd.f32 %v939_v39, %v920_v40  ;;  %v1304_v4 = vld [vmem:[#allocation6 + $0xb0] sm:$0xff] }
 0x120   :  { %1275 = vmatpush.msrb.mxu3 %v568_v48  ;;  %1217 = vmatpush.msrb.mxu0 %v468_v5 }
 0x121   :  { %1236 = vmatpush.msrb.mxu1 %v502_v6  ;;  %1257 = vmatpush.msrb.mxu2 %v532_v7  ;;  %v959_v44 = vpop.f32.mrf.mxu3  ;;  %v1303_v7 = vld [vmem:[#allocation6 + $0xa8] sm:$0xff] }
 0x122   :  { %1276 = vmatpush.msrb.mxu3 %v566_v50  ;;  %1218 = vmatmul.f32.vlgmr.msrb.gmra.mxu0 %v1379_v13  ;;  %v960_v46 = vadd.f32 %v959_v44, %v940_v42  ;;  %v1302_v50 = vld [vmem:[#allocation6 + $0xa0] sm:$0xff]  ;;  %v1299_v13 = vld [vmem:[#allocation6 + $0x88] sm:$0xff] }
 0x123   :  { %1258 = vmatmul.f32.vlgmr.msrb.gmra.mxu2 %v1380_v14  ;;  %1318 = vmatpush.msra.mxu0 %v1297_v9  ;;  %v1298_v14 = vld [vmem:[#allocation6 + $0x80] sm:$0xff] }
 0x124   :  { %1237 = vmatpush.msrb.mxu1 %v500_v10  ;;  %1277 = vmatpush.msrb.mxu3 %v564_v12  ;;  %v1300_v10 = vld [vmem:[#allocation6 + $0x90] sm:$0xff] }
 0x125   :  { %1238 = vmatmul.f32.vlgmr.msrb.gmra.mxu1 %v1381_v17  ;;  %1278 = vmatmul.f32.vlgmr.msrb.gmra.mxu3 %v1382_v19 }
 0x126   :  { %1319 = vmatpush.msra.mxu0 %v1296_v15  ;;  %1338 = vmatpush.msra.mxu1 %v1313_v47 }
 0x128   :  { %1320 = vmatpush.msra.mxu0 %v1295_v0  ;;  %1339 = vmatpush.msra.mxu1 %v1312_v52 }
 0x12a   :  { %1321 = vmatpush.msra.mxu0 %v1294_v20  ;;  %1340 = vmatpush.msra.mxu1 %v1311_v53 }
 0x12c   :  { %1322 = vmatpush.msra.mxu0 %v1293_v21  ;;  %1341 = vmatpush.msra.mxu1 %v1310_v54 }
 0x12e   :  { %1323 = vmatpush.msra.mxu0 %v1292_v23  ;;  %1342 = vmatpush.msra.mxu1 %v1309_v55 }
 0x130   :  { %1324 = vmatpush.msra.mxu0 %v1291_v3  ;;  %1343 = vmatpush.msra.mxu1 %v1308_v56 }
 0x132   :  { %1325 = vmatpush.msra.mxu0 %v1290_v27  ;;  %1344 = vmatpush.msra.mxu1 %v1307_v57 }
 0x134   :  { %1326 = vmatpush.msra.mxu0 %v1289_v29  ;;  %1345 = vmatpush.msra.mxu1 %v1306_v60 }
 0x136   :  { %1327 = vmatpush.msra.mxu0 %v1288_v31  ;;  %1346 = vmatpush.msra.mxu1 %v1305_v61 }
 0x138   :  { %1328 = vmatpush.msra.mxu0 %v1287_v34  ;;  %1347 = vmatpush.msra.mxu1 %v1304_v4 }
 0x13a   :  { %1329 = vmatpush.msra.mxu0 %v1286_v36  ;;  %1348 = vmatpush.msra.mxu1 %v1303_v7 }
 0x13c   :  { %1330 = vmatpush.msra.mxu0 %v1285_v38  ;;  %1349 = vmatpush.msra.mxu1 %v1302_v50 }
 0x13e   :  { %1331 = vmatpush.msra.mxu0 %v1284_v41  ;;  %1350 = vmatpush.msra.mxu1 %v1301_v8 }
 0x140   :  { %1332 = vmatpush.msra.mxu0 %v1283_v43  ;;  %1351 = vmatpush.msra.mxu1 %v1300_v10 }
 0x142   :  { %1333 = vmatpush.msra.mxu0 %v1282_v45  ;;  %1352 = vmatpush.msra.mxu1 %v1299_v13 }
 0x143   :  { %1334 = vmatmul.f32.vlgmr.msra.gmra.mxu0 %v960_v46 }
 0x144   :  { %1353 = vmatpush.msra.mxu1 %v1298_v14 }
 0x159   :  { %v979_v59 = vpop.f32.mrf.mxu0 }
 0x15a   :  { %v980_v62 = vadd.f32 %v979_v59, %v598_v58 }
 0x15c   :  { %v999_v63 = vpop.f32.mrf.mxu1 }
 0x15d   :  { %v1000_v48 = vadd.f32 %v999_v63, %v980_v62 }
 0x160   :  { %v1019_v49 = vpop.f32.mrf.mxu2 }
 0x161   :  { %v1020_v5 = vadd.f32 %v1019_v49, %v1000_v48 }
 0x163   :  { %v1039_v6 = vpop.f32.mrf.mxu3 }
 0x164   :  { %v1040_v51 = vadd.f32 %v1039_v6, %v1020_v5 }
 0x166   :  { %v1059_v9 = vpop.f32.mrf.mxu0 }
 0x167   :  { %v1060_v11 = vadd.f32 %v1059_v9, %v1040_v51 }
 0x169   :  { %v1079_v12 = vpop.f32.mrf.mxu1  ;;  %v1099_v16 = vpop.f32.mrf.mxu2 }
 0x16a   :  { %v1080_v15 = vadd.f32 %v1079_v12, %v1060_v11 }
 0x16c   :  { %v1100_v17 = vadd.f32 %v1099_v16, %v1080_v15  ;;  %v1119_v0 = vpop.f32.mrf.mxu3 }
 0x16e   :  { %v1120_v19 = vadd.f32 %v1119_v0, %v1100_v17 }
 0x17d   :  { %v1139_v18 = vpop.f32.mrf.mxu0 }
 0x17e   :  { %v1140_v20 = vadd.f32 %v1139_v18, %v1120_v19 }
 0x180   :  { %v1159_v1 = vpop.f32.mrf.mxu1 }
 0x181   :  { %v1160_v21 = vadd.f32 %v1159_v1, %v1140_v20 }
 0x184   :  { %v1179_v2 = vpop.f32.mrf.mxu2 }
 0x185   :  { %v1180_v22 = vadd.f32 %v1179_v2, %v1160_v21 }
 0x187   :  { %v1199_v23 = vpop.f32.mrf.mxu3 }
 0x188   :  { %v1200_v24 = vadd.f32 %v1199_v23, %v1180_v22 }
 0x19f   :  { %v1219_v3 = vpop.f32.mrf.mxu0 }
 0x1a0   :  { %v1220_v25 = vadd.f32 %v1219_v3, %v1200_v24 }
 0x1a2   :  { %v1239_v26 = vpop.f32.mrf.mxu1 }
 0x1a3   :  { %v1240_v27 = vadd.f32 %v1239_v26, %v1220_v25 }
 0x1a6   :  { %v1259_v28 = vpop.f32.mrf.mxu2 }
 0x1a7   :  { %v1260_v29 = vadd.f32 %v1259_v28, %v1240_v27 }
 0x1a8   :  { %v1279_v30 = vpop.f32.mrf.mxu3 }
 0x1a9   :  { %v1280_v31 = vadd.f32 %v1279_v30, %v1260_v29 }
 0x1ab   :  { %1354 = vmatmul.f32.vlgmr.msra.gmra.mxu1 %v1280_v31 }
 0x1c0   :  { %v1335_v33 = vpop.f32.mrf.mxu0 }
 0x1c1   :  { %v1336_v34 = vadd.f32 %v1374_v32, %v1335_v33 }
 0x228   :  { %v1355_v35 = vpop.f32.mrf.mxu1 }
 0x229   :  { %v1356_v36 = vadd.f32 %v1355_v35, %v1336_v34 }
 0x22b   :  { %1358 = vst [vmem:[%s1591_s5] sm:$0x3] %v1356_v36 }
 0x22c   :  { %1363 = vsyncpa [#allocation3], 1 }
 0x22d   :  { %1364 = vsyncpa [#allocation5], 1 }
 0x22e   :  { %1365 = vsyncpa [#allocation8], 1 }

</bundles_post_ra>
